<compile_context>
chip_gen: v5e
topology: v5e:2x2
jax: 0.10.0
libtpu: 0.0.40
codegen_flags: <defaults>
</compile_context>

<pallas_src>
import functools
import numpy as np

import jax
import jax.numpy as jnp
from jax import lax
from jax.experimental import pallas as pl
from jax.experimental.pallas import tpu as pltpu


# ---------------------------------------------------------------------------
# Deterministic re-implementations of the repo helpers used by TinyConv.__init__
# ---------------------------------------------------------------------------
def _conv_out(n, k, s, p):
    return (n + 2 * p - k) // s + 1


def gen_conv_params(in_features, kernel_size=3, stride=2, threshold=40):
    a, b = in_features
    params = []
    while a * b > threshold:
        ka = kernel_size if a >= kernel_size else a
        kb = kernel_size if b >= kernel_size else b
        sa = stride if a >= kernel_size else 1
        sb = stride if b >= kernel_size else 1
        pa, pb = 0, 0
        params.append(((ka, kb), (sa, sb), (pa, pb)))
        a = _conv_out(a, ka, sa, pa)
        b = _conv_out(b, kb, sb, pb)
    params.append(((a, b), (1, 1), (0, 0)))  # final "single-cell" conv
    return params


def get_iter(x, n):
    if isinstance(x, int):
        return [x] * n
    x = list(x)
    assert len(x) == n
    return x


def _round_up(x, m):
    return (x + m - 1) // m * m


def _pad2d(a, rows, cols):
    return np.pad(a, ((0, rows - a.shape[0]), (0, cols - a.shape[1])))


# ---------------------------------------------------------------------------
# Fold one Conv2d(bias=False) layer into a dense operator over flattened NCHW vecs
# ---------------------------------------------------------------------------
def conv_to_dense(w, H, W, stride, padding):
    """w: (OC, IC, KH, KW) -> B: (IC*H*W, OC*OH*OW) s.t. vec_out = vec_in @ B,
    channel-major flattening (idx = c*H*W + h*W + w), identical to nn.Conv2d."""
    OC, IC, KH, KW = w.shape
    sh, sw = stride
    ph, pw = padding
    assert ph == 0 and pw == 0  # gen_conv_params always emits zero padding
    OH = _conv_out(H, KH, sh, 0)
    OW = _conv_out(W, KW, sw, 0)
    w_np = np.asarray(w)
    B = np.zeros((IC, H, W, OC, OH, OW), np.float32)
    for i in range(KH):
        for j in range(KW):
            wij = w_np[:, :, i, j].T  # (IC, OC)
            for oh in range(OH):
                for ow in range(OW):
                    B[:, oh * sh + i, ow * sw + j, :, oh, ow] += wij
    return B.reshape(IC * H * W, OC * OH * OW), OH, OW


def _quantize_per_col(B):
    """Symmetric per-output-column int8 quantization of a dense operator."""
    amax = np.max(np.abs(B), axis=0)
    scale = np.maximum(amax, 1e-30) / 127.0
    q = np.clip(np.rint(B / scale), -127, 127).astype(np.int8)
    return q, scale.astype(np.float32)


# ---------------------------------------------------------------------------
# Pallas kernel: the entire layer chain (matmul [+dequant] + ReLU) in one call.
# ---------------------------------------------------------------------------
def _make_fused_kernel(n_layers, quantized):
    def kernel(*refs):
        x_ref = refs[0]
        b_refs = refs[1:1 + n_layers]
        if quantized:
            s_refs = refs[1 + n_layers:1 + 2 * n_layers]
            o_ref = refs[1 + 2 * n_layers]
        else:
            s_refs = None
            o_ref = refs[1 + n_layers]

        h = x_ref[...]                                   # (Mt, Dp0) bf16
        for l in range(n_layers):
            if quantized:
                # int8 -> bf16 is exact for |q| <= 127; scale applied after dot.
                w = b_refs[l][...].astype(jnp.float32).astype(jnp.bfloat16)
            else:
                w = b_refs[l][...]
            acc = jnp.dot(h, w, preferred_element_type=jnp.float32)  # MXU, f32 acc
            if quantized:
                acc = acc * s_refs[l][...]               # per-column dequant (f32 VPU)
            acc = jnp.maximum(acc, 0.0)                  # ReLU in f32
            h = acc if l == n_layers - 1 else acc.astype(jnp.bfloat16)
        o_ref[...] = h.astype(o_ref.dtype)               # single lane-dense store
    return kernel


@functools.partial(jax.jit, static_argnames=("out_chw", "flops_per_row", "m_tile"))
def _tinyconv_forward(x, ops, scales, *, out_chw, flops_per_row, m_tile=256):
    N = x.shape[0]
    Din_p = ops[0].shape[0]
    Dout_p = ops[-1].shape[1]
    n_layers = len(ops)
    quantized = len(scales) > 0

    # Single cast + zero-pad (no extra zeros/.at[].set round trips).  The original
    # module's x_padded copy is a no-op on the 2-D feature path, so it is skipped.
    x_rows = x.reshape(N, -1)                       # channel-major NCHW flattening
    Din = x_rows.shape[1]

    gridded = N > m_tile
    if gridded:
        Mp = _round_up(N, m_tile)                   # tile-aligned
    else:
        Mp = _round_up(max(N, 16), 16)              # bf16 sublane tile = 16 rows
    x_pad = jnp.pad(x_rows.astype(jnp.bfloat16),
                    ((0, Mp - N), (0, Din_p - Din)))

    weight_bytes = (sum(int(o.size) * o.dtype.itemsize for o in ops)
                    + sum(int(s.size) * 4 for s in scales))
    cost = pl.CostEstimate(
        flops=flops_per_row * N,                    # true conv FLOPs, not padded fold
        transcendentals=0,
        bytes_accessed=int(x_pad.size) * 2 + weight_bytes + Mp * Dout_p * 4)

    kernel = _make_fused_kernel(n_layers, quantized)
    out_shape = jax.ShapeDtypeStruct((Mp, Dout_p), jnp.float32)
    args = (x_pad,) + tuple(ops) + tuple(scales)

    if not gridded:
        # Small batch: grid-less call, whole arrays resident in VMEM.
        out = pl.pallas_call(kernel, out_shape=out_shape, cost_estimate=cost)(*args)
    else:
        # Large batch: parallel M grid (both TensorCores on v7x); weights use a
        # constant index_map and stay VMEM-resident across M steps.
        const = lambda i: (0, 0)
        widest = max(int(o.shape[1]) for o in ops)
        budget = (2 * m_tile * Din_p * 2            # x tile, double-buffered bf16
                  + 2 * weight_bytes                # operators (+scales), 2x buffered
                  + 2 * m_tile * Dout_p * 4         # out tile, double-buffered f32
                  + 6 * max(int(o.size) for o in ops)   # in-kernel dequant temporaries
                  + 6 * m_tile * widest)            # per-layer f32 acc + bf16 copy
        vmem_limit = min(max(2 * budget, 16 * 2**20), 64 * 2**20)
        out = pl.pallas_call(
            kernel,
            out_shape=out_shape,
            grid=(Mp // m_tile,),
            in_specs=[pl.BlockSpec((m_tile, Din_p), lambda i: (i, 0))]
                     + [pl.BlockSpec(o.shape, const) for o in ops]
                     + [pl.BlockSpec(s.shape, const) for s in scales],
            out_specs=pl.BlockSpec((m_tile, Dout_p), lambda i: (i, 0)),
            compiler_params=pltpu.CompilerParams(
                dimension_semantics=("parallel",),
                vmem_limit_bytes=int(vmem_limit)),
            cost_estimate=cost,
        )(*args)

    oc, oh, ow = out_chw
    return out[:N, :oc * oh * ow].reshape(N, oc, oh, ow)   # NCHW, as in PyTorch


# ---------------------------------------------------------------------------
# TinyConv (2-D feature path, bias=False, ReLU, no batchnorm)
# ---------------------------------------------------------------------------
class TinyConvPallas:
    def __init__(self, in_features, in_channels=1, out_channels=1,
                 kernel_size=3, stride=2, threshold=40, key=None,
                 weight_dtype="int8"):
        assert isinstance(in_features, (tuple, list)) and len(in_features) == 2
        assert weight_dtype in ("int8", "bfloat16")
        self.in_features = tuple(in_features)
        self.in_channels = in_channels
        self.conv_params = gen_conv_params(in_features, kernel_size, stride, threshold)
        self.out_channels = get_iter(out_channels, len(self.conv_params))
        key = key if key is not None else jax.random.PRNGKey(0)

        # ---- conv weights (OIHW, bias=False), kept for the reference path ----
        self.weights = []
        ic = in_channels
        for i, (k, _s, _p) in enumerate(self.conv_params):
            key, sub = jax.random.split(key)
            oc = self.out_channels[i]
            kh, kw = k
            fan_in = ic * kh * kw
            w = jax.random.normal(sub, (oc, ic, kh, kw), jnp.float32) * (2.0 / fan_in) ** 0.5
            self.weights.append(w)
            ic = oc

        # ---- fold every conv layer into a dense (Din, Dout) operator (once) ----
        a, b = self.in_features
        H, W = a, b
        ic = in_channels
        dims = [in_channels * H * W]
        ops = []
        flops = 0
        for w, (_k, s, p) in zip(self.weights, self.conv_params):
            B, H, W = conv_to_dense(w, H, W, s, p)
            ops.append(B)
            oc, _, kh, kw = w.shape
            flops += 2 * oc * H * W * ic * kh * kw      # true conv FLOPs per sample
            dims.append(oc * H * W)
            ic = oc
        self.out_spatial = (H, W)
        self.dims = dims
        self.flops_per_row = int(flops)

        # Pad operators to lane-aligned blocks.  Zero rows/cols are exactly
        # preserved through matmul [+ dequant] + ReLU, so padding never changes
        # the result (relies on gen_conv_params emitting zero conv padding).
        pdims = [max(_round_up(d, 128), 128) for d in dims]
        ops_padded, scales = [], []
        for l, B in enumerate(ops):
            if weight_dtype == "int8":
                q, s = _quantize_per_col(B)
                ops_padded.append(jnp.asarray(_pad2d(q, pdims[l], pdims[l + 1]),
                                              jnp.int8))
                s_pad = np.zeros((1, pdims[l + 1]), np.float32)
                s_pad[0, :s.size] = s
                scales.append(jnp.asarray(s_pad))
            else:
                ops_padded.append(jnp.asarray(_pad2d(B, pdims[l], pdims[l + 1]),
                                              jnp.bfloat16))
        self.ops_padded = tuple(ops_padded)
        self.scales = tuple(scales)

    def __call__(self, x):
        return _tinyconv_forward(
            x, self.ops_padded, self.scales,
            out_chw=(self.out_channels[-1], self.out_spatial[0], self.out_spatial[1]),
            flops_per_row=self.flops_per_row,
        )


# ---------------------------------------------------------------------------
# Pure-JAX reference (lax.conv, f32 end-to-end) for correctness check
# ---------------------------------------------------------------------------
def reference_forward(model, x):
    a, b = model.in_features
    N = x.shape[0]
    h = x.reshape(N, model.in_channels, a, b)
    for w, (_k, s, p) in zip(model.weights, model.conv_params):
        y = lax.conv_general_dilated(
            h, w, window_strides=s,
            padding=[(p[0], p[0]), (p[1], p[1])],
            dimension_numbers=('NCHW', 'OIHW', 'NCHW'))
        h = jnp.maximum(y, 0.0)
    return h


def _check(out, ref, atol, rtol):
    err = float(jnp.max(jnp.abs(out - ref)))
    bound = atol + rtol * float(jnp.max(jnp.abs(ref)))
    assert err < bound, (err, bound)
    return err


if __name__ == "__main__":
    key = jax.random.PRNGKey(0)
    kx, kw, kx2 = jax.random.split(key, 3)

    N, C, A, B = 2, 4, 16, 16
    x = jax.random.normal(kx, (N, C, A, B), jnp.float32)

    # 1) int8-compressed folded operators (default): halves the dominant weight
    #    DMA; in-kernel dequant, bf16 MXU, f32 accumulate.  Small-batch gridless path.
    model_i8 = TinyConvPallas((A, B), in_channels=C, out_channels=8,
                              kernel_size=3, stride=2, threshold=40, key=kw,
                              weight_dtype="int8")
    out_i8 = jax.block_until_ready(model_i8(x))
    ref = jax.block_until_ready(reference_forward(model_i8, x))
    assert out_i8.shape == ref.shape == (N, 8, 1, 1), (out_i8.shape, ref.shape)
    _check(out_i8, ref, atol=5e-2, rtol=3e-2)       # bf16 act + int8 weight error

    # 2) bf16-weight variant (same kernel minus dequant) — tight tolerance anchor.
    model_bf16 = TinyConvPallas((A, B), in_channels=C, out_channels=8,
                                kernel_size=3, stride=2, threshold=40, key=kw,
                                weight_dtype="bfloat16")
    out_bf = jax.block_until_ready(model_bf16(x))
    ref_bf = jax.block_until_ready(reference_forward(model_bf16, x))
    _check(out_bf, ref_bf, atol=5e-2, rtol=1e-2)

    # 3) large-batch gridded path: parallel 256-row M tiles, weights VMEM-resident
    #    across grid steps (exercises the v7x/v6e 2-TensorCore / full-MXU path).
    N2 = 300
    x2 = jax.random.normal(kx2, (N2, C, A, B), jnp.float32)
    out2 = jax.block_until_ready(model_i8(x2))
    ref2 = jax.block_until_ready(reference_forward(model_i8, x2))
    assert out2.shape == ref2.shape == (N2, 8, 1, 1), (out2.shape, ref2.shape)
    _check(out2, ref2, atol=5e-2, rtol=3e-2)

    print("KERNEL_OK")
</pallas_src>

<mosaic_0001>
module attributes {stable_mosaic.version = 11 : i64} {
  func.func @kernel(%arg0: memref<16x1024xbf16, #tpu.memory_space<vmem>>, %arg1: memref<1024x512xi8, #tpu.memory_space<vmem>>, %arg2: memref<512x128xi8, #tpu.memory_space<vmem>>, %arg3: memref<128x128xi8, #tpu.memory_space<vmem>>, %arg4: memref<1x512xf32, #tpu.memory_space<vmem>>, %arg5: memref<1x128xf32, #tpu.memory_space<vmem>>, %arg6: memref<1x128xf32, #tpu.memory_space<vmem>>, %arg7: memref<16x128xf32, #tpu.memory_space<vmem>>) attributes {dimension_semantics = [], scalar_prefetch = 0 : i64, scratch_operands = 0 : i64, tpu.core_type = #tpu.core_type<tc>} {
    %c0 = arith.constant 0 : index
    %c0_0 = arith.constant 0 : index
    %0 = vector.load %arg0[%c0, %c0_0] : memref<16x1024xbf16, #tpu.memory_space<vmem>>, vector<16x1024xbf16>
    %c0_1 = arith.constant 0 : index
    %c0_2 = arith.constant 0 : index
    %1 = vector.load %arg1[%c0_1, %c0_2] : memref<1024x512xi8, #tpu.memory_space<vmem>>, vector<1024x512xi8>
    %2 = arith.sitofp %1 : vector<1024x512xi8> to vector<1024x512xf32>
    %3 = arith.truncf %2 : vector<1024x512xf32> to vector<1024x512xbf16>
    %cst = arith.constant dense<0.000000e+00> : vector<16x512xf32>
    %4 = tpu.matmul %0, %3, %cst {dimension_numbers = #tpu.dot_dimension_numbers<[1], [0], [0], [1], [0, 0, 1, 1], [], []>} : vector<16x1024xbf16>, vector<1024x512xbf16>, vector<16x512xf32> -> vector<16x512xf32>
    %c0_3 = arith.constant 0 : index
    %c0_4 = arith.constant 0 : index
    %5 = vector.load %arg4[%c0_3, %c0_4] : memref<1x512xf32, #tpu.memory_space<vmem>>, vector<1x512xf32>
    %6 = vector.broadcast %5 : vector<1x512xf32> to vector<16x512xf32>
    %7 = arith.mulf %4, %6 : vector<16x512xf32>
    %cst_5 = arith.constant 0.000000e+00 : f32
    %8 = vector.broadcast %cst_5 : f32 to vector<16x512xf32>
    %9 = arith.maximumf %7, %8 : vector<16x512xf32>
    %10 = arith.truncf %9 : vector<16x512xf32> to vector<16x512xbf16>
    %c0_6 = arith.constant 0 : index
    %c0_7 = arith.constant 0 : index
    %11 = vector.load %arg2[%c0_6, %c0_7] : memref<512x128xi8, #tpu.memory_space<vmem>>, vector<512x128xi8>
    %12 = arith.sitofp %11 : vector<512x128xi8> to vector<512x128xf32>
    %13 = arith.truncf %12 : vector<512x128xf32> to vector<512x128xbf16>
    %cst_8 = arith.constant dense<0.000000e+00> : vector<16x128xf32>
    %14 = tpu.matmul %10, %13, %cst_8 {dimension_numbers = #tpu.dot_dimension_numbers<[1], [0], [0], [1], [0, 0, 1, 1], [], []>} : vector<16x512xbf16>, vector<512x128xbf16>, vector<16x128xf32> -> vector<16x128xf32>
    %c0_9 = arith.constant 0 : index
    %c0_10 = arith.constant 0 : index
    %15 = vector.load %arg5[%c0_9, %c0_10] : memref<1x128xf32, #tpu.memory_space<vmem>>, vector<1x128xf32>
    %16 = vector.broadcast %15 : vector<1x128xf32> to vector<16x128xf32>
    %17 = arith.mulf %14, %16 : vector<16x128xf32>
    %cst_11 = arith.constant 0.000000e+00 : f32
    %18 = vector.broadcast %cst_11 : f32 to vector<16x128xf32>
    %19 = arith.maximumf %17, %18 : vector<16x128xf32>
    %20 = arith.truncf %19 : vector<16x128xf32> to vector<16x128xbf16>
    %c0_12 = arith.constant 0 : index
    %c0_13 = arith.constant 0 : index
    %21 = vector.load %arg3[%c0_12, %c0_13] : memref<128x128xi8, #tpu.memory_space<vmem>>, vector<128x128xi8>
    %22 = arith.sitofp %21 : vector<128x128xi8> to vector<128x128xf32>
    %23 = arith.truncf %22 : vector<128x128xf32> to vector<128x128xbf16>
    %cst_14 = arith.constant dense<0.000000e+00> : vector<16x128xf32>
    %24 = tpu.matmul %20, %23, %cst_14 {dimension_numbers = #tpu.dot_dimension_numbers<[1], [0], [0], [1], [0, 0, 1, 1], [], []>} : vector<16x128xbf16>, vector<128x128xbf16>, vector<16x128xf32> -> vector<16x128xf32>
    %c0_15 = arith.constant 0 : index
    %c0_16 = arith.constant 0 : index
    %25 = vector.load %arg6[%c0_15, %c0_16] : memref<1x128xf32, #tpu.memory_space<vmem>>, vector<1x128xf32>
    %26 = vector.broadcast %25 : vector<1x128xf32> to vector<16x128xf32>
    %27 = arith.mulf %24, %26 : vector<16x128xf32>
    %cst_17 = arith.constant 0.000000e+00 : f32
    %28 = vector.broadcast %cst_17 : f32 to vector<16x128xf32>
    %29 = arith.maximumf %27, %28 : vector<16x128xf32>
    %c0_18 = arith.constant 0 : index
    %c0_19 = arith.constant 0 : index
    %30 = vector.load %arg7[%c0_18, %c0_19] : memref<16x128xf32, #tpu.memory_space<vmem>>, vector<16x128xf32>
    tpu.vector_store %arg7[%c0_18, %c0_19], %29 {strides = array<i32>} : memref<16x128xf32, #tpu.memory_space<vmem>>, vector<16x128xf32>,
    return
  }
}

</mosaic_0001>

<bundles_post_ra>
// kernel: _tinyconv_forward.1
= control target key start
LH: loop header
LB: loop body
LE: loop exit
PB: predicated region body
PF: predicated region fallthrough
CT: control target
= control target key end

     0   :  { %12 = vsyncpa [#allocation3], 0  ;;  %s2361_s27 = smov [#allocation2]   ;;  %s2362_s29 = smov 512   ;;  %s2686_s0 = inlined_call_operand.vmem [shape: bf16[16,1024], index: 0, kind: input, shape index: {}]   ;;  %s2687_s1 = inlined_call_operand.hbm [shape: s8[1024,512], index: 1, kind: input, shape index: {}]   ;;  %s2688_s2 = inlined_call_operand.vmem [shape: s8[512,128], index: 2, kind: input, shape index: {}]   ;;  %s2689_s3 = inlined_call_operand.vmem [shape: s8[128,128], index: 3, kind: input, shape index: {}]   ;;  %s2690_s4 = inlined_call_operand.vmem [shape: f32[1,512], index: 4, kind: input, shape index: {}]   ;;  %s2691_s5 = inlined_call_operand.vmem [shape: f32[1,128], index: 5, kind: input, shape index: {}]   ;;  %s2692_s6 = inlined_call_operand.vmem [shape: f32[1,128], index: 6, kind: input, shape index: {}]   ;;  %s2693_s7 = inlined_call_operand.vmem [shape: f32[16,128], index: 7, kind: output, shape index: {}]  }
   0x1   :  { %s19_s26 = sshll.u32 %s2687_s1, 4  ;;  %s21_s28 = sshll.u32 %s2361_s27, 4  ;;  %s20_s26 = int_to_ptr.hbm [resolvable:$true] %s19_s26  ;;  %s22_s28 = int_to_ptr.vmem [resolvable:$true] %s21_s28 }
   0x2   :  { %s2363_s30 = smov 32  }
   0x3   :  { %27 = dma.hbm_to_vmem [thread:$0]  %s20_s26, 16384, %s22_s28, [#allocation3], %s2362_s29, %s2362_s29, %s2363_s30  }
   0x4   :  { %2359 = dma.done.wait [#allocation3], 16384  }
   0x5   :  { %2360 = vsyncadd [#allocation3], 4294950912  ;;  %v62_v0 = vld [vmem:[#allocation2 + $0x60] sm:$0xff] }
   0x6   :  { %v78_v1 = vld [vmem:[#allocation2 + $0xe0] sm:$0xff]  ;;  %v234_v3 = vunpack.c.2.s8 %v62_v0  ;;  %v238_v4 = vunpack.c.3.s8 %v62_v0  ;;  %v226_v22 = vunpack.c.0.s8 %v62_v0  ;;  %v230_v23 = vunpack.c.1.s8 %v62_v0 }
   0x7   :  { %v94_v2 = vld [vmem:[#allocation2 + $0x160] sm:$0xff]  ;;  %v298_v5 = vunpack.c.2.s8 %v78_v1  ;;  %v302_v6 = vunpack.c.3.s8 %v78_v1  ;;  %v290_v26 = vunpack.c.0.s8 %v78_v1  ;;  %v294_v27 = vunpack.c.1.s8 %v78_v1 }
   0x8   :  { %v110_v7 = vld [vmem:[#allocation2 + $0x1e0] sm:$0xff]  ;;  %v362_v8 = vunpack.c.2.s8 %v94_v2  ;;  %v366_v9 = vunpack.c.3.s8 %v94_v2  ;;  %v746_v12 = vcvt.s32.f32 %v234_v3  ;;  %v750_v13 = vcvt.s32.f32 %v238_v4 }
   0x9   :  { %v426_v10 = vunpack.c.2.s8 %v110_v7  ;;  %v430_v11 = vunpack.c.3.s8 %v110_v7  ;;  %v810_v14 = vcvt.s32.f32 %v298_v5  ;;  %v814_v15 = vcvt.s32.f32 %v302_v6  ;;  %v58_v28 = vld [vmem:[#allocation2 + $0x40] sm:$0xff] }
   0xa   :  { %v874_v16 = vcvt.s32.f32 %v362_v8  ;;  %v878_v17 = vcvt.s32.f32 %v366_v9  ;;  %v1230_v20 = vpack.c.bf16 %v750_v13, %v746_v12  ;;  %v738_v29 = vcvt.s32.f32 %v226_v22  ;;  %v74_v37 = vld [vmem:[#allocation2 + $0xc0] sm:$0xff] }
   0xb   :  { %v938_v18 = vcvt.s32.f32 %v426_v10  ;;  %v942_v19 = vcvt.s32.f32 %v430_v11  ;;  %v1262_v21 = vpack.c.bf16 %v814_v15, %v810_v14  ;;  %v742_v30 = vcvt.s32.f32 %v230_v23  ;;  %v90_v42 = vld [vmem:[#allocation2 + $0x140] sm:$0xff] }
   0xc   :  { %v1294_v24 = vpack.c.bf16 %v878_v17, %v874_v16  ;;  %1498 = vmatpush.bf16.msra.mxu0 %v1230_v20  ;;  %v354_v31 = vunpack.c.0.s8 %v94_v2  ;;  %v358_v32 = vunpack.c.1.s8 %v94_v2  ;;  %v802_v33 = vcvt.s32.f32 %v290_v26  ;;  %v106_v47 = vld [vmem:[#allocation2 + $0x1c0] sm:$0xff] }
   0xd   :  { %v1326_v25 = vpack.c.bf16 %v942_v19, %v938_v18  ;;  %1512 = vmatpush.bf16.msra.mxu1 %v1262_v21  ;;  %v806_v34 = vcvt.s32.f32 %v294_v27  ;;  %v418_v35 = vunpack.c.0.s8 %v110_v7  ;;  %v422_v36 = vunpack.c.1.s8 %v110_v7  ;;  %v54_v8 = vld [vmem:[#allocation2 + $0x20] sm:$0xff] }
   0xe   :  { %1526 = vmatpush.bf16.msra.mxu2 %v1294_v24  ;;  %v1226_v38 = vpack.c.bf16 %v742_v30, %v738_v29  ;;  %v866_v39 = vcvt.s32.f32 %v354_v31  ;;  %v870_v40 = vcvt.s32.f32 %v358_v32  ;;  %v218_v41 = vunpack.c.2.s8 %v58_v28  ;;  %v70_v17 = vld [vmem:[#allocation2 + $0xa0] sm:$0xff] }
   0xf   :  { %1540 = vmatpush.bf16.msra.mxu3 %v1326_v25  ;;  %v1258_v43 = vpack.c.bf16 %v806_v34, %v802_v33  ;;  %v930_v44 = vcvt.s32.f32 %v418_v35  ;;  %v934_v45 = vcvt.s32.f32 %v422_v36  ;;  %v222_v46 = vunpack.c.3.s8 %v58_v28  ;;  %v86_v22 = vld [vmem:[#allocation2 + $0x120] sm:$0xff] }
  0x10   :  { %1499 = vmatpush.bf16.msra.mxu0 %v1226_v38  ;;  %v1290_v48 = vpack.c.bf16 %v870_v40, %v866_v39  ;;  %v730_v49 = vcvt.s32.f32 %v218_v41  ;;  %v282_v50 = vunpack.c.2.s8 %v74_v37  ;;  %v286_v51 = vunpack.c.3.s8 %v74_v37  ;;  %v102_v27 = vld [vmem:[#allocation2 + $0x1a0] sm:$0xff] }
  0x11   :  { %1513 = vmatpush.bf16.msra.mxu1 %v1258_v43  ;;  %v1322_v52 = vpack.c.bf16 %v934_v45, %v930_v44  ;;  %v734_v53 = vcvt.s32.f32 %v222_v46  ;;  %v346_v54 = vunpack.c.2.s8 %v90_v42  ;;  %v350_v55 = vunpack.c.3.s8 %v90_v42 }
  0x12   :  { %1527 = vmatpush.bf16.msra.mxu2 %v1290_v48  ;;  %v794_v56 = vcvt.s32.f32 %v282_v50  ;;  %v798_v57 = vcvt.s32.f32 %v286_v51  ;;  %v410_v58 = vunpack.c.2.s8 %v106_v47  ;;  %v414_v59 = vunpack.c.3.s8 %v106_v47 }
  0x13   :  { %1541 = vmatpush.bf16.msra.mxu3 %v1322_v52  ;;  %v1222_v60 = vpack.c.bf16 %v734_v53, %v730_v49  ;;  %v858_v61 = vcvt.s32.f32 %v346_v54  ;;  %v862_v62 = vcvt.s32.f32 %v350_v55  ;;  %v210_v63 = vunpack.c.0.s8 %v58_v28  ;;  %v50_v52 = vld [vmem:[#allocation2] sm:$0xff] }
  0x14   :  { %v1254_v0 = vpack.c.bf16 %v798_v57, %v794_v56  ;;  %v922_v1 = vcvt.s32.f32 %v410_v58  ;;  %v926_v2 = vcvt.s32.f32 %v414_v59  ;;  %v214_v3 = vunpack.c.1.s8 %v58_v28 }
  0x15   :  { %1500 = vmatpush.bf16.msra.mxu0 %v1222_v60  ;;  %v1286_v4 = vpack.c.bf16 %v862_v62, %v858_v61  ;;  %v722_v5 = vcvt.s32.f32 %v210_v63  ;;  %v274_v6 = vunpack.c.0.s8 %v74_v37  ;;  %v278_v7 = vunpack.c.1.s8 %v74_v37  ;;  %v66_v61 = vld [vmem:[#allocation2 + $0x80] sm:$0xff] }
  0x16   :  { %1514 = vmatpush.bf16.msra.mxu1 %v1254_v0  ;;  %v1318_v9 = vpack.c.bf16 %v926_v2, %v922_v1  ;;  %v726_v10 = vcvt.s32.f32 %v214_v3  ;;  %v338_v11 = vunpack.c.0.s8 %v90_v42  ;;  %v342_v12 = vunpack.c.1.s8 %v90_v42  ;;  %v82_v2 = vld [vmem:[#allocation2 + $0x100] sm:$0xff] }
  0x17   :  { %1528 = vmatpush.bf16.msra.mxu2 %v1286_v4  ;;  %v786_v13 = vcvt.s32.f32 %v274_v6  ;;  %v790_v14 = vcvt.s32.f32 %v278_v7  ;;  %v402_v15 = vunpack.c.0.s8 %v106_v47  ;;  %v406_v16 = vunpack.c.1.s8 %v106_v47  ;;  %v98_v7 = vld [vmem:[#allocation2 + $0x180] sm:$0xff] }
  0x18   :  { %1542 = vmatpush.bf16.msra.mxu3 %v1318_v9  ;;  %v1218_v18 = vpack.c.bf16 %v726_v10, %v722_v5  ;;  %v850_v19 = vcvt.s32.f32 %v338_v11  ;;  %v854_v20 = vcvt.s32.f32 %v342_v12  ;;  %v202_v21 = vunpack.c.2.s8 %v54_v8 }
  0x19   :  { %v1250_v23 = vpack.c.bf16 %v790_v14, %v786_v13  ;;  %v914_v24 = vcvt.s32.f32 %v402_v15  ;;  %v918_v25 = vcvt.s32.f32 %v406_v16  ;;  %v206_v26 = vunpack.c.3.s8 %v54_v8 }
  0x1a   :  { %1501 = vmatpush.bf16.msra.mxu0 %v1218_v18  ;;  %v1282_v28 = vpack.c.bf16 %v854_v20, %v850_v19  ;;  %v714_v29 = vcvt.s32.f32 %v202_v21  ;;  %v266_v30 = vunpack.c.2.s8 %v70_v17  ;;  %v270_v31 = vunpack.c.3.s8 %v70_v17 }
  0x1b   :  { %1515 = vmatpush.bf16.msra.mxu1 %v1250_v23  ;;  %v1314_v32 = vpack.c.bf16 %v918_v25, %v914_v24  ;;  %v718_v33 = vcvt.s32.f32 %v206_v26  ;;  %v330_v34 = vunpack.c.2.s8 %v86_v22  ;;  %v334_v35 = vunpack.c.3.s8 %v86_v22 }
  0x1c   :  { %1529 = vmatpush.bf16.msra.mxu2 %v1282_v28  ;;  %v778_v36 = vcvt.s32.f32 %v266_v30  ;;  %v782_v37 = vcvt.s32.f32 %v270_v31  ;;  %v394_v38 = vunpack.c.2.s8 %v102_v27  ;;  %v398_v39 = vunpack.c.3.s8 %v102_v27 }
  0x1d   :  { %1543 = vmatpush.bf16.msra.mxu3 %v1314_v32  ;;  %v1214_v40 = vpack.c.bf16 %v718_v33, %v714_v29  ;;  %v842_v41 = vcvt.s32.f32 %v330_v34  ;;  %v846_v42 = vcvt.s32.f32 %v334_v35  ;;  %v194_v43 = vunpack.c.0.s8 %v54_v8  ;;  %v126_v32 = vld [vmem:[#allocation2 + $0x260] sm:$0xff] }
  0x1e   :  { %v1246_v44 = vpack.c.bf16 %v782_v37, %v778_v36  ;;  %v906_v45 = vcvt.s32.f32 %v394_v38  ;;  %v910_v46 = vcvt.s32.f32 %v398_v39  ;;  %v198_v47 = vunpack.c.1.s8 %v54_v8 }
  0x1f   :  { %1502 = vmatpush.bf16.msra.mxu0 %v1214_v40  ;;  %v1278_v48 = vpack.c.bf16 %v846_v42, %v842_v41  ;;  %v706_v49 = vcvt.s32.f32 %v194_v43  ;;  %v258_v50 = vunpack.c.0.s8 %v70_v17  ;;  %v262_v51 = vunpack.c.1.s8 %v70_v17  ;;  %v142_v41 = vld [vmem:[#allocation2 + $0x2e0] sm:$0xff] }
  0x20   :  { %1516 = vmatpush.bf16.msra.mxu1 %v1246_v44  ;;  %v1310_v53 = vpack.c.bf16 %v910_v46, %v906_v45  ;;  %v710_v54 = vcvt.s32.f32 %v198_v47  ;;  %v322_v55 = vunpack.c.0.s8 %v86_v22  ;;  %v326_v56 = vunpack.c.1.s8 %v86_v22  ;;  %v158_v46 = vld [vmem:[#allocation2 + $0x360] sm:$0xff] }
  0x21   :  { %1530 = vmatpush.bf16.msra.mxu2 %v1278_v48  ;;  %v770_v57 = vcvt.s32.f32 %v258_v50  ;;  %v774_v58 = vcvt.s32.f32 %v262_v51  ;;  %v386_v59 = vunpack.c.0.s8 %v102_v27  ;;  %v390_v60 = vunpack.c.1.s8 %v102_v27  ;;  %v174_v51 = vld [vmem:[#allocation2 + $0x3e0] sm:$0xff] }
  0x22   :  { %1544 = vmatpush.bf16.msra.mxu3 %v1310_v53  ;;  %v1210_v62 = vpack.c.bf16 %v710_v54, %v706_v49  ;;  %v834_v63 = vcvt.s32.f32 %v322_v55  ;;  %v838_v0 = vcvt.s32.f32 %v326_v56  ;;  %v186_v1 = vunpack.c.2.s8 %v50_v52 }
  0x23   :  { %v1242_v3 = vpack.c.bf16 %v774_v58, %v770_v57  ;;  %v898_v4 = vcvt.s32.f32 %v386_v59  ;;  %v902_v5 = vcvt.s32.f32 %v390_v60  ;;  %v190_v6 = vunpack.c.3.s8 %v50_v52 }
  0x24   :  { %1503 = vmatpush.bf16.msra.mxu0 %v1210_v62  ;;  %v1274_v8 = vpack.c.bf16 %v838_v0, %v834_v63  ;;  %v698_v9 = vcvt.s32.f32 %v186_v1  ;;  %v250_v10 = vunpack.c.2.s8 %v66_v61  ;;  %v254_v11 = vunpack.c.3.s8 %v66_v61 }
  0x25   :  { %1517 = vmatpush.bf16.msra.mxu1 %v1242_v3  ;;  %v1306_v12 = vpack.c.bf16 %v902_v5, %v898_v4  ;;  %v702_v13 = vcvt.s32.f32 %v190_v6  ;;  %v314_v14 = vunpack.c.2.s8 %v82_v2  ;;  %v318_v15 = vunpack.c.3.s8 %v82_v2 }
  0x26   :  { %1531 = vmatpush.bf16.msra.mxu2 %v1274_v8  ;;  %v762_v16 = vcvt.s32.f32 %v250_v10  ;;  %v766_v17 = vcvt.s32.f32 %v254_v11  ;;  %v378_v18 = vunpack.c.2.s8 %v98_v7  ;;  %v382_v19 = vunpack.c.3.s8 %v98_v7 }
  0x27   :  { %1545 = vmatpush.bf16.msra.mxu3 %v1306_v12  ;;  %v1206_v20 = vpack.c.bf16 %v702_v13, %v698_v9  ;;  %v826_v21 = vcvt.s32.f32 %v314_v14  ;;  %v830_v22 = vcvt.s32.f32 %v318_v15  ;;  %v178_v23 = vunpack.c.0.s8 %v50_v52  ;;  %v122_v12 = vld [vmem:[#allocation2 + $0x240] sm:$0xff] }
  0x28   :  { %v1238_v24 = vpack.c.bf16 %v766_v17, %v762_v16  ;;  %v890_v25 = vcvt.s32.f32 %v378_v18  ;;  %v894_v26 = vcvt.s32.f32 %v382_v19  ;;  %v182_v27 = vunpack.c.1.s8 %v50_v52 }
  0x29   :  { %1504 = vmatpush.bf16.msra.mxu0 %v1206_v20  ;;  %v1270_v28 = vpack.c.bf16 %v830_v22, %v826_v21  ;;  %v690_v29 = vcvt.s32.f32 %v178_v23  ;;  %v242_v30 = vunpack.c.0.s8 %v66_v61  ;;  %v246_v31 = vunpack.c.1.s8 %v66_v61  ;;  %v138_v21 = vld [vmem:[#allocation2 + $0x2c0] sm:$0xff] }
  0x2a   :  { %1518 = vmatpush.bf16.msra.mxu1 %v1238_v24  ;;  %v1302_v33 = vpack.c.bf16 %v894_v26, %v890_v25  ;;  %v694_v34 = vcvt.s32.f32 %v182_v27  ;;  %v306_v35 = vunpack.c.0.s8 %v82_v2  ;;  %v310_v36 = vunpack.c.1.s8 %v82_v2  ;;  %v154_v26 = vld [vmem:[#allocation2 + $0x340] sm:$0xff] }
  0x2b   :  { %1532 = vmatpush.bf16.msra.mxu2 %v1270_v28  ;;  %v754_v37 = vcvt.s32.f32 %v242_v30  ;;  %v758_v38 = vcvt.s32.f32 %v246_v31  ;;  %v370_v39 = vunpack.c.0.s8 %v98_v7  ;;  %v374_v40 = vunpack.c.1.s8 %v98_v7  ;;  %v170_v31 = vld [vmem:[#allocation2 + $0x3c0] sm:$0xff] }
  0x2c   :  { %1546 = vmatpush.bf16.msra.mxu3 %v1302_v33  ;;  %v1202_v42 = vpack.c.bf16 %v694_v34, %v690_v29  ;;  %v818_v43 = vcvt.s32.f32 %v306_v35  ;;  %v822_v44 = vcvt.s32.f32 %v310_v36  ;;  %v490_v45 = vunpack.c.2.s8 %v126_v32 }
  0x2d   :  { %v1234_v47 = vpack.c.bf16 %v758_v38, %v754_v37  ;;  %v882_v48 = vcvt.s32.f32 %v370_v39  ;;  %v886_v49 = vcvt.s32.f32 %v374_v40  ;;  %v494_v50 = vunpack.c.3.s8 %v126_v32 }
  0x2e   :  { %1505 = vmatpush.bf16.msra.mxu0 %v1202_v42  ;;  %v1266_v52 = vpack.c.bf16 %v822_v44, %v818_v43  ;;  %v1002_v53 = vcvt.s32.f32 %v490_v45  ;;  %v554_v54 = vunpack.c.2.s8 %v142_v41  ;;  %v558_v55 = vunpack.c.3.s8 %v142_v41 }
  0x2f   :  { %1519 = vmatpush.bf16.msra.mxu1 %v1234_v47  ;;  %v1298_v56 = vpack.c.bf16 %v886_v49, %v882_v48  ;;  %v1006_v57 = vcvt.s32.f32 %v494_v50  ;;  %v618_v58 = vunpack.c.2.s8 %v158_v46  ;;  %v622_v59 = vunpack.c.3.s8 %v158_v46 }
  0x30   :  { %1533 = vmatpush.bf16.msra.mxu2 %v1266_v52  ;;  %v1066_v60 = vcvt.s32.f32 %v554_v54  ;;  %v1070_v61 = vcvt.s32.f32 %v558_v55  ;;  %v682_v62 = vunpack.c.2.s8 %v174_v51  ;;  %v686_v63 = vunpack.c.3.s8 %v174_v51 }
  0x31   :  { %1547 = vmatpush.bf16.msra.mxu3 %v1298_v56  ;;  %v1358_v0 = vpack.c.bf16 %v1006_v57, %v1002_v53  ;;  %v1130_v1 = vcvt.s32.f32 %v618_v58  ;;  %v1134_v2 = vcvt.s32.f32 %v622_v59  ;;  %v482_v3 = vunpack.c.0.s8 %v126_v32  ;;  %v2292_v56 = vld [vmem:[%s2686_s0] sm:$0xf] }
  0x32   :  { %v1390_v4 = vpack.c.bf16 %v1070_v61, %v1066_v60  ;;  %v1194_v5 = vcvt.s32.f32 %v682_v62  ;;  %v1198_v6 = vcvt.s32.f32 %v686_v63  ;;  %v486_v7 = vunpack.c.1.s8 %v126_v32  ;;  %v2326_v57 = vld [vmem:[%s2686_s0 + $0x1c] sm:$0xf0]  ;;  %v2300_v62 = vld [vmem:[%s2686_s0 + $0x8] sm:$0xf] }
  0x33   :  { %1554 = vmatpush.bf16.msrb.mxu0 %v1358_v0  ;;  %v1422_v8 = vpack.c.bf16 %v1134_v2, %v1130_v1  ;;  %v994_v9 = vcvt.s32.f32 %v482_v3  ;;  %v546_v10 = vunpack.c.0.s8 %v142_v41  ;;  %v550_v11 = vunpack.c.1.s8 %v142_v41  ;;  %v2327_v63 = vld [vmem:[%s2686_s0 + $0x24] sm:$0xf0] }
  0x34   :  { %1568 = vmatpush.bf16.msrb.mxu1 %v1390_v4  ;;  %v1454_v13 = vpack.c.bf16 %v1198_v6, %v1194_v5  ;;  %v998_v14 = vcvt.s32.f32 %v486_v7  ;;  %v610_v15 = vunpack.c.0.s8 %v158_v46  ;;  %v614_v16 = vunpack.c.1.s8 %v158_v46  ;;  %v118_v4 = vld [vmem:[#allocation2 + $0x220] sm:$0xff] }
  0x35   :  { %1582 = vmatpush.bf16.msrb.mxu2 %v1422_v8  ;;  %v1058_v17 = vcvt.s32.f32 %v546_v10  ;;  %v1062_v18 = vcvt.s32.f32 %v550_v11  ;;  %v674_v19 = vunpack.c.0.s8 %v174_v51  ;;  %v678_v20 = vunpack.c.1.s8 %v174_v51  ;;  %v2419_v5 = vld [vmem:[#allocation2 + $0x2a0] sm:$0xff] }
  0x36   :  { %1596 = vmatpush.bf16.msrb.mxu3 %v1454_v13  ;;  %v1354_v22 = vpack.c.bf16 %v998_v14, %v994_v9  ;;  %v1122_v23 = vcvt.s32.f32 %v610_v15  ;;  %v1126_v24 = vcvt.s32.f32 %v614_v16  ;;  %v474_v25 = vunpack.c.2.s8 %v122_v12  ;;  %v150_v10 = vld [vmem:[#allocation2 + $0x320] sm:$0xff] }
  0x37   :  { %v1386_v27 = vpack.c.bf16 %v1062_v18, %v1058_v17  ;;  %v1186_v28 = vcvt.s32.f32 %v674_v19  ;;  %v1190_v29 = vcvt.s32.f32 %v678_v20  ;;  %v478_v30 = vunpack.c.3.s8 %v122_v12  ;;  %v2425_v15 = vld [vmem:[#allocation2 + $0x3a0] sm:$0xff] }
  0x38   :  { %1555 = vmatpush.bf16.msrb.mxu0 %v1354_v22  ;;  %v1418_v32 = vpack.c.bf16 %v1126_v24, %v1122_v23  ;;  %v986_v33 = vcvt.s32.f32 %v474_v25  ;;  %v538_v34 = vunpack.c.2.s8 %v138_v21  ;;  %v542_v35 = vunpack.c.3.s8 %v138_v21  ;;  %v2322_v20 = vld [vmem:[%s2686_s0 + $0x4] sm:$0xf] }
  0x39   :  { %1569 = vmatpush.bf16.msrb.mxu1 %v1386_v27  ;;  %v1450_v36 = vpack.c.bf16 %v1190_v29, %v1186_v28  ;;  %v990_v37 = vcvt.s32.f32 %v478_v30  ;;  %v602_v38 = vunpack.c.2.s8 %v154_v26  ;;  %v606_v39 = vunpack.c.3.s8 %v154_v26  ;;  %v2294_v25 = vld [vmem:[%s2686_s0 + $0x20] sm:$0xf0]  ;;  %v2302_v27 = vld [vmem:[%s2686_s0 + $0x28] sm:$0xf0] }
  0x3a   :  { %1583 = vmatpush.bf16.msrb.mxu2 %v1418_v32  ;;  %v1050_v40 = vcvt.s32.f32 %v538_v34  ;;  %v1054_v41 = vcvt.s32.f32 %v542_v35  ;;  %v666_v42 = vunpack.c.2.s8 %v170_v31  ;;  %v670_v43 = vunpack.c.3.s8 %v170_v31 }
  0x3b   :  { %1597 = vmatpush.bf16.msrb.mxu3 %v1450_v36  ;;  %v1350_v44 = vpack.c.bf16 %v990_v37, %v986_v33  ;;  %v1114_v45 = vcvt.s32.f32 %v602_v38  ;;  %v1118_v46 = vcvt.s32.f32 %v606_v39  ;;  %v466_v47 = vunpack.c.0.s8 %v122_v12 }
  0x3c   :  { %v1382_v48 = vpack.c.bf16 %v1054_v41, %v1050_v40  ;;  %v1178_v49 = vcvt.s32.f32 %v666_v42  ;;  %v1182_v50 = vcvt.s32.f32 %v670_v43  ;;  %v470_v51 = vunpack.c.1.s8 %v122_v12 }
  0x3d   :  { %1556 = vmatpush.bf16.msrb.mxu0 %v1350_v44  ;;  %v1414_v52 = vpack.c.bf16 %v1118_v46, %v1114_v45  ;;  %v978_v53 = vcvt.s32.f32 %v466_v47  ;;  %v530_v54 = vunpack.c.0.s8 %v138_v21  ;;  %v534_v55 = vunpack.c.1.s8 %v138_v21 }
  0x3e   :  { %1570 = vmatpush.bf16.msrb.mxu1 %v1382_v48  ;;  %v1446_v58 = vpack.c.bf16 %v1182_v50, %v1178_v49  ;;  %v982_v59 = vcvt.s32.f32 %v470_v51  ;;  %v594_v60 = vunpack.c.0.s8 %v154_v26  ;;  %v598_v61 = vunpack.c.1.s8 %v154_v26  ;;  %v2323_v26 = vld [vmem:[%s2686_s0 + $0xc] sm:$0xf]  ;;  %v114_v48 = vld [vmem:[#allocation2 + $0x200] sm:$0xff] }
  0x3f   :  { %1584 = vmatpush.bf16.msrb.mxu2 %v1414_v52  ;;  %v1042_v0 = vcvt.s32.f32 %v530_v54  ;;  %v1046_v1 = vcvt.s32.f32 %v534_v55  ;;  %v658_v2 = vunpack.c.0.s8 %v170_v31  ;;  %v662_v3 = vunpack.c.1.s8 %v170_v31 }
  0x40   :  { %1598 = vmatpush.bf16.msrb.mxu3 %v1446_v58  ;;  %v1346_v6 = vpack.c.bf16 %v982_v59, %v978_v53  ;;  %v1106_v7 = vcvt.s32.f32 %v594_v60  ;;  %v1110_v8 = vcvt.s32.f32 %v598_v61  ;;  %v2421_v9 = vor.u32 %v2326_v57, %v2292_v56  ;;  %v130_v53 = vld [vmem:[#allocation2 + $0x280] sm:$0xff] }
  0x41   :  { %v1378_v11 = vpack.c.bf16 %v1046_v1, %v1042_v0  ;;  %v1170_v12 = vcvt.s32.f32 %v658_v2  ;;  %v1174_v13 = vcvt.s32.f32 %v662_v3  ;;  %v2423_v14 = vor.u32 %v2327_v63, %v2300_v62  ;;  %v146_v62 = vld [vmem:[#allocation2 + $0x300] sm:$0xff] }
  0x42   :  { %1557 = vmatpush.bf16.msrb.mxu0 %v1346_v6  ;;  %v1410_v16 = vpack.c.bf16 %v1110_v8, %v1106_v7  ;;  %v458_v17 = vunpack.c.2.s8 %v118_v4  ;;  %v462_v18 = vunpack.c.3.s8 %v118_v4  ;;  %v522_v19 = vunpack.c.2.s8 %v2419_v5  ;;  %v162_v3 = vld [vmem:[#allocation2 + $0x380] sm:$0xff] }
  0x43   :  { %1571 = vmatpush.bf16.msrb.mxu1 %v1378_v11  ;;  %v1442_v21 = vpack.c.bf16 %v1174_v13, %v1170_v12  ;;  %1506 = vmatmul.bf16.vlgmr.msra.gmra.mxu0 %v2421_v9  ;;  %v526_v22 = vunpack.c.3.s8 %v2419_v5  ;;  %v586_v23 = vunpack.c.2.s8 %v150_v10  ;;  %v590_v24 = vunpack.c.3.s8 %v150_v10 }
  0x44   :  { %1585 = vmatpush.bf16.msrb.mxu2 %v1410_v16  ;;  %v970_v28 = vcvt.s32.f32 %v458_v17  ;;  %v974_v29 = vcvt.s32.f32 %v462_v18  ;;  %v1034_v30 = vcvt.s32.f32 %v522_v19  ;;  %v650_v31 = vunpack.c.2.s8 %v2425_v15 }
  0x45   :  { %1599 = vmatpush.bf16.msrb.mxu3 %v1442_v21  ;;  %1534 = vmatmul.bf16.vlgmr.msra.gmra.mxu2 %v2423_v14  ;;  %v1038_v32 = vcvt.s32.f32 %v526_v22  ;;  %v1098_v33 = vcvt.s32.f32 %v586_v23  ;;  %v1102_v34 = vcvt.s32.f32 %v590_v24  ;;  %v654_v35 = vunpack.c.3.s8 %v2425_v15 }
  0x46   :  { %v1342_v36 = vpack.c.bf16 %v974_v29, %v970_v28  ;;  %v1162_v37 = vcvt.s32.f32 %v650_v31  ;;  %v2445_v38 = vor.u32 %v2322_v20, %v2294_v25  ;;  %v2447_v39 = vor.u32 %v2323_v26, %v2302_v27 }
  0x47   :  { %v1374_v40 = vpack.c.bf16 %v1038_v32, %v1034_v30  ;;  %v1406_v41 = vpack.c.bf16 %v1102_v34, %v1098_v33  ;;  %v1166_v42 = vcvt.s32.f32 %v654_v35  ;;  %v450_v43 = vunpack.c.0.s8 %v118_v4  ;;  %v2455_v30 = vld [vmem:[#allocation2 + $0x68] sm:$0xff] }
  0x48   :  { %1558 = vmatpush.bf16.msrb.mxu0 %v1342_v36  ;;  %1520 = vmatmul.bf16.vlgmr.msra.gmra.mxu1 %v2445_v38  ;;  %v454_v44 = vunpack.c.1.s8 %v118_v4  ;;  %v514_v45 = vunpack.c.0.s8 %v2419_v5  ;;  %v518_v46 = vunpack.c.1.s8 %v2419_v5  ;;  %v578_v47 = vunpack.c.0.s8 %v150_v10 }
  0x49   :  { %1572 = vmatpush.bf16.msrb.mxu1 %v1374_v40  ;;  %1586 = vmatpush.bf16.msrb.mxu2 %v1406_v41  ;;  %v1438_v49 = vpack.c.bf16 %v1166_v42, %v1162_v37  ;;  %v962_v50 = vcvt.s32.f32 %v450_v43  ;;  %v582_v51 = vunpack.c.1.s8 %v150_v10  ;;  %v642_v52 = vunpack.c.0.s8 %v2425_v15  ;;  %v2457_v41 = vld [vmem:[#allocation2 + $0xe8] sm:$0xff] }
  0x4a   :  { %1548 = vmatmul.bf16.vlgmr.msra.gmra.mxu3 %v2447_v39  ;;  %v966_v54 = vcvt.s32.f32 %v454_v44  ;;  %v1026_v55 = vcvt.s32.f32 %v514_v45  ;;  %v1030_v56 = vcvt.s32.f32 %v518_v46  ;;  %v1090_v57 = vcvt.s32.f32 %v578_v47  ;;  %v2460_v46 = vld [vmem:[#allocation2 + $0x168] sm:$0xff] }
  0x4b   :  { %1600 = vmatpush.bf16.msrb.mxu3 %v1438_v49  ;;  %v1094_v58 = vcvt.s32.f32 %v582_v51  ;;  %v646_v59 = vunpack.c.1.s8 %v2425_v15  ;;  %v1154_v60 = vcvt.s32.f32 %v642_v52  ;;  %v442_v61 = vunpack.c.2.s8 %v114_v48  ;;  %v2463_v51 = vld [vmem:[#allocation2 + $0x1e8] sm:$0xff] }
  0x4c   :  { %v1338_v63 = vpack.c.bf16 %v966_v54, %v962_v50  ;;  %v1370_v0 = vpack.c.bf16 %v1030_v56, %v1026_v55  ;;  %v446_v1 = vunpack.c.3.s8 %v114_v48  ;;  %v506_v2 = vunpack.c.2.s8 %v130_v53  ;;  %v2308_v56 = vld [vmem:[%s2686_s0 + $0x10] sm:$0xf] }
  0x4d   :  { %v1402_v4 = vpack.c.bf16 %v1094_v58, %v1090_v57  ;;  %v1158_v5 = vcvt.s32.f32 %v646_v59  ;;  %v954_v6 = vcvt.s32.f32 %v442_v61  ;;  %v510_v7 = vunpack.c.3.s8 %v130_v53  ;;  %v2328_v57 = vld [vmem:[%s2686_s0 + $0x2c] sm:$0xf0] }
  0x4e   :  { %1559 = vmatpush.bf16.msrb.mxu0 %v1338_v63  ;;  %1573 = vmatpush.bf16.msrb.mxu1 %v1370_v0  ;;  %v958_v8 = vcvt.s32.f32 %v446_v1  ;;  %v1018_v10 = vcvt.s32.f32 %v506_v2  ;;  %v570_v11 = vunpack.c.2.s8 %v146_v62  ;;  %v574_v12 = vunpack.c.3.s8 %v146_v62  ;;  %v2329_v63 = vld [vmem:[%s2686_s0 + $0x34] sm:$0xf0]  ;;  %v2324_v0 = vld [vmem:[%s2686_s0 + $0x14] sm:$0xf] }
  0x4f   :  { %1587 = vmatpush.bf16.msrb.mxu2 %v1402_v4  ;;  %v1434_v13 = vpack.c.bf16 %v1158_v5, %v1154_v60  ;;  %v1022_v15 = vcvt.s32.f32 %v510_v7  ;;  %v634_v16 = vunpack.c.2.s8 %v162_v3  ;;  %v638_v17 = vunpack.c.3.s8 %v162_v3  ;;  %v2310_v5 = vld [vmem:[%s2686_s0 + $0x30] sm:$0xf0]  ;;  %v2318_v7 = vld [vmem:[%s2686_s0 + $0x38] sm:$0xf0] }
  0x50   :  { %v1334_v18 = vpack.c.bf16 %v958_v8, %v954_v6  ;;  %v1082_v19 = vcvt.s32.f32 %v570_v11  ;;  %v1086_v20 = vcvt.s32.f32 %v574_v12  ;;  %v434_v21 = vunpack.c.0.s8 %v114_v48  ;;  %v2325_v6 = vld [vmem:[%s2686_s0 + $0x1c] sm:$0xf] }
  0x51   :  { %1601 = vmatpush.bf16.msrb.mxu3 %v1434_v13  ;;  %v1366_v22 = vpack.c.bf16 %v1022_v15, %v1018_v10  ;;  %v1146_v23 = vcvt.s32.f32 %v634_v16  ;;  %v1150_v24 = vcvt.s32.f32 %v638_v17  ;;  %v438_v25 = vunpack.c.1.s8 %v114_v48 }
  0x52   :  { %1560 = vmatpush.bf16.msrb.mxu0 %v1334_v18  ;;  %v1398_v26 = vpack.c.bf16 %v1086_v20, %v1082_v19  ;;  %v946_v27 = vcvt.s32.f32 %v434_v21  ;;  %v498_v28 = vunpack.c.0.s8 %v130_v53  ;;  %v502_v29 = vunpack.c.1.s8 %v130_v53 }
  0x53   :  { %1574 = vmatpush.bf16.msrb.mxu1 %v1366_v22  ;;  %v1430_v31 = vpack.c.bf16 %v1150_v24, %v1146_v23  ;;  %v950_v32 = vcvt.s32.f32 %v438_v25  ;;  %v562_v33 = vunpack.c.0.s8 %v146_v62  ;;  %v566_v34 = vunpack.c.1.s8 %v146_v62  ;;  %v2316_v62 = vld [vmem:[%s2686_s0 + $0x18] sm:$0xf] }
  0x54   :  { %1588 = vmatpush.bf16.msrb.mxu2 %v1398_v26  ;;  %v1010_v35 = vcvt.s32.f32 %v498_v28  ;;  %v1014_v36 = vcvt.s32.f32 %v502_v29  ;;  %v626_v37 = vunpack.c.0.s8 %v162_v3  ;;  %v630_v40 = vunpack.c.1.s8 %v162_v3  ;;  %v59_v26 = vld [vmem:[#allocation2 + $0x48] sm:$0xff] }
  0x55   :  { %1602 = vmatpush.bf16.msrb.mxu3 %v1430_v31  ;;  %v1330_v42 = vpack.c.bf16 %v950_v32, %v946_v27  ;;  %v1074_v43 = vcvt.s32.f32 %v562_v33  ;;  %v1078_v44 = vcvt.s32.f32 %v566_v34  ;;  %v235_v45 = vunpack.c.2.s8 %v2455_v30 }
  0x56   :  { %v1362_v47 = vpack.c.bf16 %v1014_v36, %v1010_v35  ;;  %v1138_v48 = vcvt.s32.f32 %v626_v37  ;;  %v1142_v49 = vcvt.s32.f32 %v630_v40  ;;  %v239_v50 = vunpack.c.3.s8 %v2455_v30  ;;  %v75_v35 = vld [vmem:[#allocation2 + $0xc8] sm:$0xff] }
  0x57   :  { %1561 = vmatpush.bf16.msrb.mxu0 %v1330_v42  ;;  %v1394_v52 = vpack.c.bf16 %v1078_v44, %v1074_v43  ;;  %v747_v53 = vcvt.s32.f32 %v235_v45  ;;  %v299_v54 = vunpack.c.2.s8 %v2457_v41  ;;  %v303_v55 = vunpack.c.3.s8 %v2457_v41  ;;  %v91_v42 = vld [vmem:[#allocation2 + $0x148] sm:$0xff] }
  0x58   :  { %1575 = vmatpush.bf16.msrb.mxu1 %v1362_v47  ;;  %v1426_v58 = vpack.c.bf16 %v1142_v49, %v1138_v48  ;;  %v751_v59 = vcvt.s32.f32 %v239_v50  ;;  %v363_v60 = vunpack.c.2.s8 %v2460_v46  ;;  %v367_v61 = vunpack.c.3.s8 %v2460_v46  ;;  %v107_v47 = vld [vmem:[#allocation2 + $0x1c8] sm:$0xff] }
  0x59   :  { %1589 = vmatpush.bf16.msrb.mxu2 %v1394_v52  ;;  %v811_v1 = vcvt.s32.f32 %v299_v54  ;;  %v815_v2 = vcvt.s32.f32 %v303_v55  ;;  %v427_v3 = vunpack.c.2.s8 %v2463_v51  ;;  %v431_v4 = vunpack.c.3.s8 %v2463_v51 }
  0x5a   :  { %1603 = vmatpush.bf16.msrb.mxu3 %v1426_v58  ;;  %v1231_v8 = vpack.c.bf16 %v751_v59, %v747_v53  ;;  %v875_v10 = vcvt.s32.f32 %v363_v60  ;;  %v879_v11 = vcvt.s32.f32 %v367_v61  ;;  %v2495_v12 = vor.u32 %v2328_v57, %v2308_v56 }
  0x5b   :  { %v1263_v13 = vpack.c.bf16 %v815_v2, %v811_v1  ;;  %v939_v15 = vcvt.s32.f32 %v427_v3  ;;  %v943_v16 = vcvt.s32.f32 %v431_v4  ;;  %v2497_v17 = vor.u32 %v2329_v63, %v2316_v62 }
  0x5c   :  { %1610 = vmatpush.bf16.msra.mxu0 %v1231_v8  ;;  %v1295_v18 = vpack.c.bf16 %v879_v11, %v875_v10  ;;  %v2499_v19 = vor.u32 %v2324_v0, %v2310_v5  ;;  %v2501_v20 = vor.u32 %v2325_v6, %v2318_v7  ;;  %v227_v21 = vunpack.c.0.s8 %v2455_v30  ;;  %v55_v8 = vld [vmem:[#allocation2 + $0x28] sm:$0xff] }
  0x5d   :  { %1624 = vmatpush.bf16.msra.mxu1 %v1263_v13  ;;  %v1327_v22 = vpack.c.bf16 %v943_v16, %v939_v15  ;;  %1562 = vmatmul.bf16.vlgmr.msrb.gmra.mxu0 %v2495_v12  ;;  %v231_v23 = vunpack.c.1.s8 %v2455_v30  ;;  %v291_v24 = vunpack.c.0.s8 %v2457_v41  ;;  %v295_v25 = vunpack.c.1.s8 %v2457_v41 }
  0x5e   :  { %1638 = vmatpush.bf16.msra.mxu2 %v1295_v18  ;;  %1576 = vmatmul.bf16.vlgmr.msrb.gmra.mxu1 %v2499_v19  ;;  %v739_v27 = vcvt.s32.f32 %v227_v21  ;;  %v355_v28 = vunpack.c.0.s8 %v2460_v46  ;;  %v359_v29 = vunpack.c.1.s8 %v2460_v46  ;;  %v419_v31 = vunpack.c.0.s8 %v2463_v51 }
  0x5f   :  { %1652 = vmatpush.bf16.msra.mxu3 %v1327_v22  ;;  %1590 = vmatmul.bf16.vlgmr.msrb.gmra.mxu2 %v2497_v17  ;;  %v743_v32 = vcvt.s32.f32 %v231_v23  ;;  %v803_v30 = vcvt.s32.f32 %v291_v24  ;;  %v807_v33 = vcvt.s32.f32 %v295_v25  ;;  %v423_v34 = vunpack.c.1.s8 %v2463_v51  ;;  %v71_v23 = vld [vmem:[#allocation2 + $0xa8] sm:$0xff] }
  0x60   :  { %1604 = vmatmul.bf16.vlgmr.msrb.gmra.mxu3 %v2501_v20  ;;  %v867_v36 = vcvt.s32.f32 %v355_v28  ;;  %v871_v37 = vcvt.s32.f32 %v359_v29  ;;  %v931_v40 = vcvt.s32.f32 %v419_v31  ;;  %v219_v41 = vunpack.c.2.s8 %v59_v26  ;;  %v87_v28 = vld [vmem:[#allocation2 + $0x128] sm:$0xff] }
  0x61   :  { %v1227_v43 = vpack.c.bf16 %v743_v32, %v739_v27  ;;  %v1259_v44 = vpack.c.bf16 %v807_v33, %v803_v30  ;;  %v935_v45 = vcvt.s32.f32 %v423_v34  ;;  %v223_v46 = vunpack.c.3.s8 %v59_v26  ;;  %v103_v33 = vld [vmem:[#allocation2 + $0x1a8] sm:$0xff] }
  0x62   :  { %v1291_v48 = vpack.c.bf16 %v871_v37, %v867_v36  ;;  %v731_v49 = vcvt.s32.f32 %v219_v41  ;;  %v283_v50 = vunpack.c.2.s8 %v75_v35  ;;  %v287_v52 = vunpack.c.3.s8 %v75_v35 }
  0x63   :  { %1611 = vmatpush.bf16.msra.mxu0 %v1227_v43  ;;  %1625 = vmatpush.bf16.msra.mxu1 %v1259_v44  ;;  %v1323_v51 = vpack.c.bf16 %v935_v45, %v931_v40  ;;  %v735_v53 = vcvt.s32.f32 %v223_v46  ;;  %v347_v54 = vunpack.c.2.s8 %v91_v42  ;;  %v351_v55 = vunpack.c.3.s8 %v91_v42 }
  0x64   :  { %1639 = vmatpush.bf16.msra.mxu2 %v1291_v48  ;;  %v795_v56 = vcvt.s32.f32 %v283_v50  ;;  %v799_v57 = vcvt.s32.f32 %v287_v52  ;;  %v411_v58 = vunpack.c.2.s8 %v107_v47  ;;  %v415_v59 = vunpack.c.3.s8 %v107_v47 }
  0x65   :  { %1653 = vmatpush.bf16.msra.mxu3 %v1323_v51  ;;  %v1223_v60 = vpack.c.bf16 %v735_v53, %v731_v49  ;;  %v859_v61 = vcvt.s32.f32 %v347_v54  ;;  %v863_v62 = vcvt.s32.f32 %v351_v55  ;;  %v211_v63 = vunpack.c.0.s8 %v59_v26 }
  0x66   :  { %v1255_v0 = vpack.c.bf16 %v799_v57, %v795_v56  ;;  %v923_v1 = vcvt.s32.f32 %v411_v58  ;;  %v927_v2 = vcvt.s32.f32 %v415_v59  ;;  %v215_v3 = vunpack.c.1.s8 %v59_v26 }
  0x67   :  { %1612 = vmatpush.bf16.msra.mxu0 %v1223_v60  ;;  %v1287_v4 = vpack.c.bf16 %v863_v62, %v859_v61  ;;  %v723_v5 = vcvt.s32.f32 %v211_v63  ;;  %v275_v6 = vunpack.c.0.s8 %v75_v35  ;;  %v279_v7 = vunpack.c.1.s8 %v75_v35  ;;  %v51_v60 = vld [vmem:[#allocation2 + $0x8] sm:$0xff] }
  0x68   :  { %1626 = vmatpush.bf16.msra.mxu1 %v1255_v0  ;;  %v1319_v10 = vpack.c.bf16 %v927_v2, %v923_v1  ;;  %v727_v11 = vcvt.s32.f32 %v215_v3  ;;  %v339_v13 = vunpack.c.0.s8 %v91_v42  ;;  %v343_v15 = vunpack.c.1.s8 %v91_v42 }
  0x69   :  { %1640 = vmatpush.bf16.msra.mxu2 %v1287_v4  ;;  %v787_v16 = vcvt.s32.f32 %v275_v6  ;;  %v791_v18 = vcvt.s32.f32 %v279_v7  ;;  %v403_v21 = vunpack.c.0.s8 %v107_v47  ;;  %v407_v22 = vunpack.c.1.s8 %v107_v47 }
  0x6a   :  { %1654 = vmatpush.bf16.msra.mxu3 %v1319_v10  ;;  %v1219_v24 = vpack.c.bf16 %v727_v11, %v723_v5  ;;  %v851_v25 = vcvt.s32.f32 %v339_v13  ;;  %v855_v26 = vcvt.s32.f32 %v343_v15  ;;  %v203_v27 = vunpack.c.2.s8 %v55_v8  ;;  %v67_v5 = vld [vmem:[#allocation2 + $0x88] sm:$0xff] }
  0x6b   :  { %v1251_v29 = vpack.c.bf16 %v791_v18, %v787_v16  ;;  %v915_v31 = vcvt.s32.f32 %v403_v21  ;;  %v919_v32 = vcvt.s32.f32 %v407_v22  ;;  %v207_v30 = vunpack.c.3.s8 %v55_v8  ;;  %v83_v11 = vld [vmem:[#allocation2 + $0x108] sm:$0xff] }
  0x6c   :  { %1613 = vmatpush.bf16.msra.mxu0 %v1219_v24  ;;  %v1283_v34 = vpack.c.bf16 %v855_v26, %v851_v25  ;;  %v715_v35 = vcvt.s32.f32 %v203_v27  ;;  %v267_v36 = vunpack.c.2.s8 %v71_v23  ;;  %v271_v37 = vunpack.c.3.s8 %v71_v23  ;;  %v99_v21 = vld [vmem:[#allocation2 + $0x188] sm:$0xff] }
  0x6d   :  { %1627 = vmatpush.bf16.msra.mxu1 %v1251_v29  ;;  %v1315_v40 = vpack.c.bf16 %v919_v32, %v915_v31  ;;  %v719_v41 = vcvt.s32.f32 %v207_v30  ;;  %v331_v42 = vunpack.c.2.s8 %v87_v28  ;;  %v335_v43 = vunpack.c.3.s8 %v87_v28 }
  0x6e   :  { %1641 = vmatpush.bf16.msra.mxu2 %v1283_v34  ;;  %v779_v44 = vcvt.s32.f32 %v267_v36  ;;  %v783_v45 = vcvt.s32.f32 %v271_v37  ;;  %v395_v46 = vunpack.c.2.s8 %v103_v33  ;;  %v399_v47 = vunpack.c.3.s8 %v103_v33 }
  0x6f   :  { %1655 = vmatpush.bf16.msra.mxu3 %v1315_v40  ;;  %v1215_v48 = vpack.c.bf16 %v719_v41, %v715_v35  ;;  %v843_v49 = vcvt.s32.f32 %v331_v42  ;;  %v847_v50 = vcvt.s32.f32 %v335_v43  ;;  %v195_v52 = vunpack.c.0.s8 %v55_v8 }
  0x70   :  { %v1247_v51 = vpack.c.bf16 %v783_v45, %v779_v44  ;;  %v907_v53 = vcvt.s32.f32 %v395_v46  ;;  %v911_v54 = vcvt.s32.f32 %v399_v47  ;;  %v199_v55 = vunpack.c.1.s8 %v55_v8 }
  0x71   :  { %1614 = vmatpush.bf16.msra.mxu0 %v1215_v48  ;;  %v1279_v56 = vpack.c.bf16 %v847_v50, %v843_v49  ;;  %v707_v57 = vcvt.s32.f32 %v195_v52  ;;  %v259_v58 = vunpack.c.0.s8 %v71_v23  ;;  %v263_v59 = vunpack.c.1.s8 %v71_v23  ;;  %v127_v48 = vld [vmem:[#allocation2 + $0x268] sm:$0xff] }
  0x72   :  { %1628 = vmatpush.bf16.msra.mxu1 %v1247_v51  ;;  %v1311_v61 = vpack.c.bf16 %v911_v54, %v907_v53  ;;  %v711_v62 = vcvt.s32.f32 %v199_v55  ;;  %v323_v63 = vunpack.c.0.s8 %v87_v28  ;;  %v327_v0 = vunpack.c.1.s8 %v87_v28 }
  0x73   :  { %1642 = vmatpush.bf16.msra.mxu2 %v1279_v56  ;;  %v771_v1 = vcvt.s32.f32 %v259_v58  ;;  %v775_v2 = vcvt.s32.f32 %v263_v59  ;;  %v387_v3 = vunpack.c.0.s8 %v103_v33  ;;  %v391_v4 = vunpack.c.1.s8 %v103_v33 }
  0x74   :  { %1656 = vmatpush.bf16.msra.mxu3 %v1311_v61  ;;  %v1211_v6 = vpack.c.bf16 %v711_v62, %v707_v57  ;;  %v835_v7 = vcvt.s32.f32 %v323_v63  ;;  %v839_v8 = vcvt.s32.f32 %v327_v0  ;;  %v187_v10 = vunpack.c.2.s8 %v51_v60  ;;  %v143_v57 = vld [vmem:[#allocation2 + $0x2e8] sm:$0xff] }
  0x75   :  { %v1243_v13 = vpack.c.bf16 %v775_v2, %v771_v1  ;;  %v899_v15 = vcvt.s32.f32 %v387_v3  ;;  %v903_v16 = vcvt.s32.f32 %v391_v4  ;;  %v191_v18 = vunpack.c.3.s8 %v51_v60  ;;  %v159_v62 = vld [vmem:[#allocation2 + $0x368] sm:$0xff] }
  0x76   :  { %1615 = vmatpush.bf16.msra.mxu0 %v1211_v6  ;;  %v1275_v22 = vpack.c.bf16 %v839_v8, %v835_v7  ;;  %v699_v23 = vcvt.s32.f32 %v187_v10  ;;  %v251_v24 = vunpack.c.2.s8 %v67_v5  ;;  %v255_v25 = vunpack.c.3.s8 %v67_v5  ;;  %v175_v3 = vld [vmem:[#allocation2 + $0x3e8] sm:$0xff] }
  0x77   :  { %1629 = vmatpush.bf16.msra.mxu1 %v1243_v13  ;;  %v1307_v26 = vpack.c.bf16 %v903_v16, %v899_v15  ;;  %v703_v27 = vcvt.s32.f32 %v191_v18  ;;  %v315_v28 = vunpack.c.2.s8 %v83_v11  ;;  %v319_v29 = vunpack.c.3.s8 %v83_v11 }
  0x78   :  { %1643 = vmatpush.bf16.msra.mxu2 %v1275_v22  ;;  %v763_v31 = vcvt.s32.f32 %v251_v24  ;;  %v767_v32 = vcvt.s32.f32 %v255_v25  ;;  %v379_v30 = vunpack.c.2.s8 %v99_v21  ;;  %v383_v33 = vunpack.c.3.s8 %v99_v21 }
  0x79   :  { %1657 = vmatpush.bf16.msra.mxu3 %v1307_v26  ;;  %v1207_v34 = vpack.c.bf16 %v703_v27, %v699_v23  ;;  %v827_v35 = vcvt.s32.f32 %v315_v28  ;;  %v831_v36 = vcvt.s32.f32 %v319_v29  ;;  %v179_v37 = vunpack.c.0.s8 %v51_v60 }
  0x7a   :  { %v1239_v40 = vpack.c.bf16 %v767_v32, %v763_v31  ;;  %v891_v41 = vcvt.s32.f32 %v379_v30  ;;  %v895_v42 = vcvt.s32.f32 %v383_v33  ;;  %v183_v43 = vunpack.c.1.s8 %v51_v60 }
  0x7b   :  { %1616 = vmatpush.bf16.msra.mxu0 %v1207_v34  ;;  %v1271_v44 = vpack.c.bf16 %v831_v36, %v827_v35  ;;  %v691_v45 = vcvt.s32.f32 %v179_v37  ;;  %v243_v46 = vunpack.c.0.s8 %v67_v5  ;;  %v247_v47 = vunpack.c.1.s8 %v67_v5  ;;  %v123_v34 = vld [vmem:[#allocation2 + $0x248] sm:$0xff] }
  0x7c   :  { %1630 = vmatpush.bf16.msra.mxu1 %v1239_v40  ;;  %v1303_v49 = vpack.c.bf16 %v895_v42, %v891_v41  ;;  %v695_v50 = vcvt.s32.f32 %v183_v43  ;;  %v307_v52 = vunpack.c.0.s8 %v83_v11  ;;  %v311_v51 = vunpack.c.1.s8 %v83_v11 }
  0x7d   :  { %1644 = vmatpush.bf16.msra.mxu2 %v1271_v44  ;;  %v755_v53 = vcvt.s32.f32 %v243_v46  ;;  %v759_v54 = vcvt.s32.f32 %v247_v47  ;;  %v371_v55 = vunpack.c.0.s8 %v99_v21  ;;  %v375_v56 = vunpack.c.1.s8 %v99_v21 }
  0x7e   :  { %1658 = vmatpush.bf16.msra.mxu3 %v1303_v49  ;;  %v1203_v58 = vpack.c.bf16 %v695_v50, %v691_v45  ;;  %v819_v59 = vcvt.s32.f32 %v307_v52  ;;  %v823_v60 = vcvt.s32.f32 %v311_v51  ;;  %v491_v61 = vunpack.c.2.s8 %v127_v48  ;;  %v139_v45 = vld [vmem:[#allocation2 + $0x2c8] sm:$0xff] }
  0x7f   :  { %v1235_v63 = vpack.c.bf16 %v759_v54, %v755_v53  ;;  %v883_v0 = vcvt.s32.f32 %v371_v55  ;;  %v887_v1 = vcvt.s32.f32 %v375_v56  ;;  %v495_v2 = vunpack.c.3.s8 %v127_v48  ;;  %v155_v50 = vld [vmem:[#allocation2 + $0x348] sm:$0xff] }
  0x80   :  { %1617 = vmatpush.bf16.msra.mxu0 %v1203_v58  ;;  %v1267_v4 = vpack.c.bf16 %v823_v60, %v819_v59  ;;  %v1003_v5 = vcvt.s32.f32 %v491_v61  ;;  %v555_v6 = vunpack.c.2.s8 %v143_v57  ;;  %v559_v7 = vunpack.c.3.s8 %v143_v57  ;;  %v171_v55 = vld [vmem:[#allocation2 + $0x3c8] sm:$0xff] }
  0x81   :  { %1631 = vmatpush.bf16.msra.mxu1 %v1235_v63  ;;  %v1299_v8 = vpack.c.bf16 %v887_v1, %v883_v0  ;;  %v1007_v10 = vcvt.s32.f32 %v495_v2  ;;  %v619_v11 = vunpack.c.2.s8 %v159_v62  ;;  %v623_v13 = vunpack.c.3.s8 %v159_v62 }
  0x82   :  { %1645 = vmatpush.bf16.msra.mxu2 %v1267_v4  ;;  %v1067_v15 = vcvt.s32.f32 %v555_v6  ;;  %v1071_v16 = vcvt.s32.f32 %v559_v7  ;;  %v683_v18 = vunpack.c.2.s8 %v175_v3  ;;  %v687_v21 = vunpack.c.3.s8 %v175_v3 }
  0x83   :  { %1659 = vmatpush.bf16.msra.mxu3 %v1299_v8  ;;  %v1359_v22 = vpack.c.bf16 %v1007_v10, %v1003_v5  ;;  %v1131_v23 = vcvt.s32.f32 %v619_v11  ;;  %v1135_v24 = vcvt.s32.f32 %v623_v13  ;;  %v483_v25 = vunpack.c.0.s8 %v127_v48  ;;  %1618 = vmatmul.bf16.vlgmr.msra.gmra.mxu0 %v2421_v9 }
  0x84   :  { %v1391_v26 = vpack.c.bf16 %v1071_v16, %v1067_v15  ;;  %v1195_v27 = vcvt.s32.f32 %v683_v18  ;;  %v1199_v28 = vcvt.s32.f32 %v687_v21  ;;  %v487_v29 = vunpack.c.1.s8 %v127_v48  ;;  %1632 = vmatmul.bf16.vlgmr.msra.gmra.mxu1 %v2445_v38 }
  0x85   :  { %1666 = vmatpush.bf16.msrb.mxu0 %v1359_v22  ;;  %v1423_v31 = vpack.c.bf16 %v1135_v24, %v1131_v23  ;;  %v995_v32 = vcvt.s32.f32 %v483_v25  ;;  %v547_v30 = vunpack.c.0.s8 %v143_v57  ;;  %v551_v33 = vunpack.c.1.s8 %v143_v57  ;;  %1646 = vmatmul.bf16.vlgmr.msra.gmra.mxu2 %v2423_v14  ;;  %v119_v22 = vld [vmem:[#allocation2 + $0x228] sm:$0xff] }
  0x86   :  { %1680 = vmatpush.bf16.msrb.mxu1 %v1391_v26  ;;  %v1455_v35 = vpack.c.bf16 %v1199_v28, %v1195_v27  ;;  %v999_v36 = vcvt.s32.f32 %v487_v29  ;;  %v611_v37 = vunpack.c.0.s8 %v159_v62  ;;  %v615_v40 = vunpack.c.1.s8 %v159_v62  ;;  %1660 = vmatmul.bf16.vlgmr.msra.gmra.mxu3 %v2447_v39 }
  0x87   :  { %1694 = vmatpush.bf16.msrb.mxu2 %v1423_v31  ;;  %v1059_v41 = vcvt.s32.f32 %v547_v30  ;;  %v1063_v42 = vcvt.s32.f32 %v551_v33  ;;  %v675_v43 = vunpack.c.0.s8 %v175_v3  ;;  %v679_v44 = vunpack.c.1.s8 %v175_v3 }
  0x88   :  { %1708 = vmatpush.bf16.msrb.mxu3 %v1455_v35  ;;  %v1355_v46 = vpack.c.bf16 %v999_v36, %v995_v32  ;;  %v1123_v47 = vcvt.s32.f32 %v611_v37  ;;  %v1127_v48 = vcvt.s32.f32 %v615_v40  ;;  %v475_v49 = vunpack.c.2.s8 %v123_v34  ;;  %v135_v32 = vld [vmem:[#allocation2 + $0x2a8] sm:$0xff] }
  0x89   :  { %v1387_v52 = vpack.c.bf16 %v1063_v42, %v1059_v41  ;;  %v1187_v51 = vcvt.s32.f32 %v675_v43  ;;  %v1191_v53 = vcvt.s32.f32 %v679_v44  ;;  %v479_v54 = vunpack.c.3.s8 %v123_v34  ;;  %v151_v36 = vld [vmem:[#allocation2 + $0x328] sm:$0xff] }
  0x8a   :  { %1667 = vmatpush.bf16.msrb.mxu0 %v1355_v46  ;;  %v1419_v56 = vpack.c.bf16 %v1127_v48, %v1123_v47  ;;  %v987_v57 = vcvt.s32.f32 %v475_v49  ;;  %v539_v58 = vunpack.c.2.s8 %v139_v45  ;;  %v543_v59 = vunpack.c.3.s8 %v139_v45  ;;  %v167_v43 = vld [vmem:[#allocation2 + $0x3a8] sm:$0xff] }
  0x8b   :  { %1681 = vmatpush.bf16.msrb.mxu1 %v1387_v52  ;;  %v1451_v60 = vpack.c.bf16 %v1191_v53, %v1187_v51  ;;  %v991_v61 = vcvt.s32.f32 %v479_v54  ;;  %v603_v62 = vunpack.c.2.s8 %v155_v50  ;;  %v607_v63 = vunpack.c.3.s8 %v155_v50 }
  0x8c   :  { %1695 = vmatpush.bf16.msrb.mxu2 %v1419_v56  ;;  %v1051_v0 = vcvt.s32.f32 %v539_v58  ;;  %v1055_v1 = vcvt.s32.f32 %v543_v59  ;;  %v667_v2 = vunpack.c.2.s8 %v171_v55  ;;  %v671_v3 = vunpack.c.3.s8 %v171_v55 }
  0x8d   :  { %1709 = vmatpush.bf16.msrb.mxu3 %v1451_v60  ;;  %v1351_v4 = vpack.c.bf16 %v991_v61, %v987_v57  ;;  %v1115_v5 = vcvt.s32.f32 %v603_v62  ;;  %v1119_v6 = vcvt.s32.f32 %v607_v63  ;;  %v467_v7 = vunpack.c.0.s8 %v123_v34 }
  0x8e   :  { %v1383_v8 = vpack.c.bf16 %v1055_v1, %v1051_v0  ;;  %v1179_v10 = vcvt.s32.f32 %v667_v2  ;;  %v1183_v11 = vcvt.s32.f32 %v671_v3  ;;  %v471_v13 = vunpack.c.1.s8 %v123_v34 }
  0x8f   :  { %1668 = vmatpush.bf16.msrb.mxu0 %v1351_v4  ;;  %v1415_v15 = vpack.c.bf16 %v1119_v6, %v1115_v5  ;;  %v979_v16 = vcvt.s32.f32 %v467_v7  ;;  %v531_v18 = vunpack.c.0.s8 %v139_v45  ;;  %v535_v21 = vunpack.c.1.s8 %v139_v45  ;;  %v115_v4 = vld [vmem:[#allocation2 + $0x208] sm:$0xff] }
  0x90   :  { %1682 = vmatpush.bf16.msrb.mxu1 %v1383_v8  ;;  %v1447_v23 = vpack.c.bf16 %v1183_v11, %v1179_v10  ;;  %v983_v24 = vcvt.s32.f32 %v471_v13  ;;  %v595_v25 = vunpack.c.0.s8 %v155_v50  ;;  %v599_v26 = vunpack.c.1.s8 %v155_v50 }
  0x91   :  { %1696 = vmatpush.bf16.msrb.mxu2 %v1415_v15  ;;  %v1043_v27 = vcvt.s32.f32 %v531_v18  ;;  %v1047_v28 = vcvt.s32.f32 %v535_v21  ;;  %v659_v29 = vunpack.c.0.s8 %v171_v55  ;;  %v663_v31 = vunpack.c.1.s8 %v171_v55 }
  0x92   :  { %1710 = vmatpush.bf16.msrb.mxu3 %v1447_v23  ;;  %v1347_v30 = vpack.c.bf16 %v983_v24, %v979_v16  ;;  %v1107_v33 = vcvt.s32.f32 %v595_v25  ;;  %v1111_v34 = vcvt.s32.f32 %v599_v26  ;;  %v459_v35 = vunpack.c.2.s8 %v119_v22  ;;  %v131_v16 = vld [vmem:[#allocation2 + $0x288] sm:$0xff] }
  0x93   :  { %v1379_v37 = vpack.c.bf16 %v1047_v28, %v1043_v27  ;;  %v1171_v40 = vcvt.s32.f32 %v659_v29  ;;  %v1175_v41 = vcvt.s32.f32 %v663_v31  ;;  %v463_v42 = vunpack.c.3.s8 %v119_v22  ;;  %v147_v24 = vld [vmem:[#allocation2 + $0x308] sm:$0xff] }
  0x94   :  { %1669 = vmatpush.bf16.msrb.mxu0 %v1347_v30  ;;  %v1411_v44 = vpack.c.bf16 %v1111_v34, %v1107_v33  ;;  %v971_v45 = vcvt.s32.f32 %v459_v35  ;;  %v523_v46 = vunpack.c.2.s8 %v135_v32  ;;  %v527_v47 = vunpack.c.3.s8 %v135_v32  ;;  %v163_v29 = vld [vmem:[#allocation2 + $0x388] sm:$0xff] }
  0x95   :  { %1683 = vmatpush.bf16.msrb.mxu1 %v1379_v37  ;;  %v1443_v48 = vpack.c.bf16 %v1175_v41, %v1171_v40  ;;  %v975_v49 = vcvt.s32.f32 %v463_v42  ;;  %v587_v50 = vunpack.c.2.s8 %v151_v36  ;;  %v591_v52 = vunpack.c.3.s8 %v151_v36 }
  0x96   :  { %1697 = vmatpush.bf16.msrb.mxu2 %v1411_v44  ;;  %v1035_v51 = vcvt.s32.f32 %v523_v46  ;;  %v1039_v53 = vcvt.s32.f32 %v527_v47  ;;  %v651_v54 = vunpack.c.2.s8 %v167_v43  ;;  %v655_v55 = vunpack.c.3.s8 %v167_v43 }
  0x97   :  { %1711 = vmatpush.bf16.msrb.mxu3 %v1443_v48  ;;  %v1343_v56 = vpack.c.bf16 %v975_v49, %v971_v45  ;;  %v1099_v57 = vcvt.s32.f32 %v587_v50  ;;  %v1103_v58 = vcvt.s32.f32 %v591_v52  ;;  %v451_v59 = vunpack.c.0.s8 %v119_v22 }
  0x98   :  { %v1375_v60 = vpack.c.bf16 %v1039_v53, %v1035_v51  ;;  %v1163_v61 = vcvt.s32.f32 %v651_v54  ;;  %v1167_v62 = vcvt.s32.f32 %v655_v55  ;;  %v455_v63 = vunpack.c.1.s8 %v119_v22 }
  0x99   :  { %1670 = vmatpush.bf16.msrb.mxu0 %v1343_v56  ;;  %v1407_v0 = vpack.c.bf16 %v1103_v58, %v1099_v57  ;;  %v963_v1 = vcvt.s32.f32 %v451_v59  ;;  %v515_v2 = vunpack.c.0.s8 %v135_v32  ;;  %v519_v3 = vunpack.c.1.s8 %v135_v32  ;;  %v64_v56 = vld [vmem:[#allocation2 + $0x70] sm:$0xff] }
  0x9a   :  { %1684 = vmatpush.bf16.msrb.mxu1 %v1375_v60  ;;  %v1439_v5 = vpack.c.bf16 %v1167_v62, %v1163_v61  ;;  %v967_v6 = vcvt.s32.f32 %v455_v63  ;;  %v579_v7 = vunpack.c.0.s8 %v151_v36  ;;  %v583_v8 = vunpack.c.1.s8 %v151_v36 }
  0x9b   :  { %1698 = vmatpush.bf16.msrb.mxu2 %v1407_v0  ;;  %v1027_v10 = vcvt.s32.f32 %v515_v2  ;;  %v1031_v11 = vcvt.s32.f32 %v519_v3  ;;  %v643_v13 = vunpack.c.0.s8 %v167_v43  ;;  %v647_v15 = vunpack.c.1.s8 %v167_v43 }
  0x9c   :  { %1712 = vmatpush.bf16.msrb.mxu3 %v1439_v5  ;;  %v1339_v18 = vpack.c.bf16 %v967_v6, %v963_v1  ;;  %v1091_v21 = vcvt.s32.f32 %v579_v7  ;;  %v1095_v22 = vcvt.s32.f32 %v583_v8  ;;  %v443_v23 = vunpack.c.2.s8 %v115_v4  ;;  %v80_v1 = vld [vmem:[#allocation2 + $0xf0] sm:$0xff] }
  0x9d   :  { %v1371_v25 = vpack.c.bf16 %v1031_v11, %v1027_v10  ;;  %v1155_v26 = vcvt.s32.f32 %v643_v13  ;;  %v1159_v27 = vcvt.s32.f32 %v647_v15  ;;  %v447_v28 = vunpack.c.3.s8 %v115_v4  ;;  %v96_v6 = vld [vmem:[#allocation2 + $0x170] sm:$0xff] }
  0x9e   :  { %1671 = vmatpush.bf16.msrb.mxu0 %v1339_v18  ;;  %v1403_v31 = vpack.c.bf16 %v1095_v22, %v1091_v21  ;;  %v955_v32 = vcvt.s32.f32 %v443_v23  ;;  %v507_v30 = vunpack.c.2.s8 %v131_v16  ;;  %v511_v33 = vunpack.c.3.s8 %v131_v16  ;;  %v112_v13 = vld [vmem:[#allocation2 + $0x1f0] sm:$0xff] }
  0x9f   :  { %1685 = vmatpush.bf16.msrb.mxu1 %v1371_v25  ;;  %v1435_v34 = vpack.c.bf16 %v1159_v27, %v1155_v26  ;;  %v959_v35 = vcvt.s32.f32 %v447_v28  ;;  %v571_v36 = vunpack.c.2.s8 %v147_v24  ;;  %v575_v37 = vunpack.c.3.s8 %v147_v24 }
  0xa0   :  { %1699 = vmatpush.bf16.msrb.mxu2 %v1403_v31  ;;  %v1019_v40 = vcvt.s32.f32 %v507_v30  ;;  %v1023_v41 = vcvt.s32.f32 %v511_v33  ;;  %v635_v42 = vunpack.c.2.s8 %v163_v29  ;;  %v639_v43 = vunpack.c.3.s8 %v163_v29 }
  0xa1   :  { %1713 = vmatpush.bf16.msrb.mxu3 %v1435_v34  ;;  %v1335_v44 = vpack.c.bf16 %v959_v35, %v955_v32  ;;  %v1083_v45 = vcvt.s32.f32 %v571_v36  ;;  %v1087_v46 = vcvt.s32.f32 %v575_v37  ;;  %v435_v47 = vunpack.c.0.s8 %v115_v4 }
  0xa2   :  { %v1367_v48 = vpack.c.bf16 %v1023_v41, %v1019_v40  ;;  %v1147_v49 = vcvt.s32.f32 %v635_v42  ;;  %v1151_v50 = vcvt.s32.f32 %v639_v43  ;;  %v439_v52 = vunpack.c.1.s8 %v115_v4 }
  0xa3   :  { %1672 = vmatpush.bf16.msrb.mxu0 %v1335_v44  ;;  %v1399_v51 = vpack.c.bf16 %v1087_v46, %v1083_v45  ;;  %v947_v53 = vcvt.s32.f32 %v435_v47  ;;  %v499_v54 = vunpack.c.0.s8 %v131_v16  ;;  %v503_v55 = vunpack.c.1.s8 %v131_v16  ;;  %v60_v44 = vld [vmem:[#allocation2 + $0x50] sm:$0xff] }
  0xa4   :  { %1686 = vmatpush.bf16.msrb.mxu1 %v1367_v48  ;;  %v1431_v57 = vpack.c.bf16 %v1151_v50, %v1147_v49  ;;  %v951_v58 = vcvt.s32.f32 %v439_v52  ;;  %v563_v59 = vunpack.c.0.s8 %v147_v24  ;;  %v567_v60 = vunpack.c.1.s8 %v147_v24 }
  0xa5   :  { %1700 = vmatpush.bf16.msrb.mxu2 %v1399_v51  ;;  %v1011_v61 = vcvt.s32.f32 %v499_v54  ;;  %v1015_v62 = vcvt.s32.f32 %v503_v55  ;;  %v627_v63 = vunpack.c.0.s8 %v163_v29  ;;  %v631_v0 = vunpack.c.1.s8 %v163_v29 }
  0xa6   :  { %1714 = vmatpush.bf16.msrb.mxu3 %v1431_v57  ;;  %v1331_v2 = vpack.c.bf16 %v951_v58, %v947_v53  ;;  %v1075_v3 = vcvt.s32.f32 %v563_v59  ;;  %v1079_v4 = vcvt.s32.f32 %v567_v60  ;;  %v236_v5 = vunpack.c.2.s8 %v64_v56  ;;  %v76_v53 = vld [vmem:[#allocation2 + $0xd0] sm:$0xff] }
  0xa7   :  { %v1363_v7 = vpack.c.bf16 %v1015_v62, %v1011_v61  ;;  %v1139_v8 = vcvt.s32.f32 %v627_v63  ;;  %v1143_v10 = vcvt.s32.f32 %v631_v0  ;;  %v240_v11 = vunpack.c.3.s8 %v64_v56  ;;  %v92_v58 = vld [vmem:[#allocation2 + $0x150] sm:$0xff] }
  0xa8   :  { %1673 = vmatpush.bf16.msrb.mxu0 %v1331_v2  ;;  %v1395_v15 = vpack.c.bf16 %v1079_v4, %v1075_v3  ;;  %v748_v16 = vcvt.s32.f32 %v236_v5  ;;  %v300_v18 = vunpack.c.2.s8 %v80_v1  ;;  %v304_v21 = vunpack.c.3.s8 %v80_v1  ;;  %v108_v63 = vld [vmem:[#allocation2 + $0x1d0] sm:$0xff] }
  0xa9   :  { %1687 = vmatpush.bf16.msrb.mxu1 %v1363_v7  ;;  %v1427_v22 = vpack.c.bf16 %v1143_v10, %v1139_v8  ;;  %v752_v23 = vcvt.s32.f32 %v240_v11  ;;  %v364_v24 = vunpack.c.2.s8 %v96_v6  ;;  %v368_v25 = vunpack.c.3.s8 %v96_v6 }
  0xaa   :  { %1701 = vmatpush.bf16.msrb.mxu2 %v1395_v15  ;;  %v812_v26 = vcvt.s32.f32 %v300_v18  ;;  %v816_v27 = vcvt.s32.f32 %v304_v21  ;;  %v428_v28 = vunpack.c.2.s8 %v112_v13  ;;  %v432_v29 = vunpack.c.3.s8 %v112_v13 }
  0xab   :  { %1715 = vmatpush.bf16.msrb.mxu3 %v1427_v22  ;;  %v1232_v31 = vpack.c.bf16 %v752_v23, %v748_v16  ;;  %v876_v32 = vcvt.s32.f32 %v364_v24  ;;  %v880_v30 = vcvt.s32.f32 %v368_v25  ;;  %1674 = vmatmul.bf16.vlgmr.msrb.gmra.mxu0 %v2495_v12  ;;  %v228_v33 = vunpack.c.0.s8 %v64_v56 }
  0xac   :  { %v1264_v34 = vpack.c.bf16 %v816_v27, %v812_v26  ;;  %v940_v35 = vcvt.s32.f32 %v428_v28  ;;  %v944_v36 = vcvt.s32.f32 %v432_v29  ;;  %1688 = vmatmul.bf16.vlgmr.msrb.gmra.mxu1 %v2499_v19  ;;  %v232_v37 = vunpack.c.1.s8 %v64_v56 }
  0xad   :  { %1722 = vmatpush.bf16.msra.mxu0 %v1232_v31  ;;  %v1296_v40 = vpack.c.bf16 %v880_v30, %v876_v32  ;;  %1702 = vmatmul.bf16.vlgmr.msrb.gmra.mxu2 %v2497_v17  ;;  %v740_v41 = vcvt.s32.f32 %v228_v33  ;;  %v292_v42 = vunpack.c.0.s8 %v80_v1  ;;  %v296_v43 = vunpack.c.1.s8 %v80_v1  ;;  %v56_v31 = vld [vmem:[#allocation2 + $0x30] sm:$0xff] }
  0xae   :  { %1736 = vmatpush.bf16.msra.mxu1 %v1264_v34  ;;  %v1328_v45 = vpack.c.bf16 %v944_v36, %v940_v35  ;;  %1716 = vmatmul.bf16.vlgmr.msrb.gmra.mxu3 %v2501_v20  ;;  %v744_v46 = vcvt.s32.f32 %v232_v37  ;;  %v356_v47 = vunpack.c.0.s8 %v96_v6  ;;  %v360_v48 = vunpack.c.1.s8 %v96_v6 }
  0xaf   :  { %1750 = vmatpush.bf16.msra.mxu2 %v1296_v40  ;;  %v804_v49 = vcvt.s32.f32 %v292_v42  ;;  %v808_v50 = vcvt.s32.f32 %v296_v43  ;;  %v420_v52 = vunpack.c.0.s8 %v112_v13  ;;  %v424_v51 = vunpack.c.1.s8 %v112_v13 }
  0xb0   :  { %1764 = vmatpush.bf16.msra.mxu3 %v1328_v45  ;;  %v1228_v54 = vpack.c.bf16 %v744_v46, %v740_v41  ;;  %v868_v55 = vcvt.s32.f32 %v356_v47  ;;  %v872_v56 = vcvt.s32.f32 %v360_v48  ;;  %v220_v57 = vunpack.c.2.s8 %v60_v44  ;;  %v72_v41 = vld [vmem:[#allocation2 + $0xb0] sm:$0xff] }
  0xb1   :  { %v1260_v59 = vpack.c.bf16 %v808_v50, %v804_v49  ;;  %v932_v60 = vcvt.s32.f32 %v420_v52  ;;  %v936_v61 = vcvt.s32.f32 %v424_v51  ;;  %v224_v62 = vunpack.c.3.s8 %v60_v44  ;;  %v88_v46 = vld [vmem:[#allocation2 + $0x130] sm:$0xff] }
  0xb2   :  { %1723 = vmatpush.bf16.msra.mxu0 %v1228_v54  ;;  %v1292_v0 = vpack.c.bf16 %v872_v56, %v868_v55  ;;  %v732_v1 = vcvt.s32.f32 %v220_v57  ;;  %v284_v2 = vunpack.c.2.s8 %v76_v53  ;;  %v288_v3 = vunpack.c.3.s8 %v76_v53  ;;  %v104_v52 = vld [vmem:[#allocation2 + $0x1b0] sm:$0xff] }
  0xb3   :  { %1737 = vmatpush.bf16.msra.mxu1 %v1260_v59  ;;  %v1324_v4 = vpack.c.bf16 %v936_v61, %v932_v60  ;;  %v736_v5 = vcvt.s32.f32 %v224_v62  ;;  %v348_v6 = vunpack.c.2.s8 %v92_v58  ;;  %v352_v7 = vunpack.c.3.s8 %v92_v58 }
  0xb4   :  { %1751 = vmatpush.bf16.msra.mxu2 %v1292_v0  ;;  %v796_v8 = vcvt.s32.f32 %v284_v2  ;;  %v800_v10 = vcvt.s32.f32 %v288_v3  ;;  %v412_v11 = vunpack.c.2.s8 %v108_v63  ;;  %v416_v13 = vunpack.c.3.s8 %v108_v63 }
  0xb5   :  { %1765 = vmatpush.bf16.msra.mxu3 %v1324_v4  ;;  %v1224_v15 = vpack.c.bf16 %v736_v5, %v732_v1  ;;  %v860_v16 = vcvt.s32.f32 %v348_v6  ;;  %v864_v18 = vcvt.s32.f32 %v352_v7  ;;  %v212_v21 = vunpack.c.0.s8 %v60_v44 }
  0xb6   :  { %v1256_v22 = vpack.c.bf16 %v800_v10, %v796_v8  ;;  %v924_v23 = vcvt.s32.f32 %v412_v11  ;;  %v928_v24 = vcvt.s32.f32 %v416_v13  ;;  %v216_v25 = vunpack.c.1.s8 %v60_v44 }
  0xb7   :  { %1724 = vmatpush.bf16.msra.mxu0 %v1224_v15  ;;  %v1288_v26 = vpack.c.bf16 %v864_v18, %v860_v16  ;;  %v724_v27 = vcvt.s32.f32 %v212_v21  ;;  %v276_v28 = vunpack.c.0.s8 %v76_v53  ;;  %v280_v29 = vunpack.c.1.s8 %v76_v53  ;;  %v52_v15 = vld [vmem:[#allocation2 + $0x10] sm:$0xff] }
  0xb8   :  { %1738 = vmatpush.bf16.msra.mxu1 %v1256_v22  ;;  %v1320_v32 = vpack.c.bf16 %v928_v24, %v924_v23  ;;  %v728_v30 = vcvt.s32.f32 %v216_v25  ;;  %v340_v33 = vunpack.c.0.s8 %v92_v58  ;;  %v344_v34 = vunpack.c.1.s8 %v92_v58 }
  0xb9   :  { %1752 = vmatpush.bf16.msra.mxu2 %v1288_v26  ;;  %v788_v35 = vcvt.s32.f32 %v276_v28  ;;  %v792_v36 = vcvt.s32.f32 %v280_v29  ;;  %v404_v37 = vunpack.c.0.s8 %v108_v63  ;;  %v408_v40 = vunpack.c.1.s8 %v108_v63 }
  0xba   :  { %1766 = vmatpush.bf16.msra.mxu3 %v1320_v32  ;;  %v1220_v42 = vpack.c.bf16 %v728_v30, %v724_v27  ;;  %v852_v43 = vcvt.s32.f32 %v340_v33  ;;  %v856_v44 = vcvt.s32.f32 %v344_v34  ;;  %v204_v45 = vunpack.c.2.s8 %v56_v31  ;;  %v68_v27 = vld [vmem:[#allocation2 + $0x90] sm:$0xff] }
  0xbb   :  { %v1252_v47 = vpack.c.bf16 %v792_v36, %v788_v35  ;;  %v916_v48 = vcvt.s32.f32 %v404_v37  ;;  %v920_v49 = vcvt.s32.f32 %v408_v40  ;;  %v208_v50 = vunpack.c.3.s8 %v56_v31  ;;  %v84_v30 = vld [vmem:[#allocation2 + $0x110] sm:$0xff] }
  0xbc   :  { %1725 = vmatpush.bf16.msra.mxu0 %v1220_v42  ;;  %v1284_v51 = vpack.c.bf16 %v856_v44, %v852_v43  ;;  %v716_v53 = vcvt.s32.f32 %v204_v45  ;;  %v268_v54 = vunpack.c.2.s8 %v72_v41  ;;  %v272_v55 = vunpack.c.3.s8 %v72_v41  ;;  %v100_v37 = vld [vmem:[#allocation2 + $0x190] sm:$0xff] }
  0xbd   :  { %1739 = vmatpush.bf16.msra.mxu1 %v1252_v47  ;;  %v1316_v56 = vpack.c.bf16 %v920_v49, %v916_v48  ;;  %v720_v57 = vcvt.s32.f32 %v208_v50  ;;  %v332_v58 = vunpack.c.2.s8 %v88_v46  ;;  %v336_v59 = vunpack.c.3.s8 %v88_v46 }
  0xbe   :  { %1753 = vmatpush.bf16.msra.mxu2 %v1284_v51  ;;  %v780_v60 = vcvt.s32.f32 %v268_v54  ;;  %v784_v61 = vcvt.s32.f32 %v272_v55  ;;  %v396_v62 = vunpack.c.2.s8 %v104_v52  ;;  %v400_v63 = vunpack.c.3.s8 %v104_v52 }
  0xbf   :  { %1767 = vmatpush.bf16.msra.mxu3 %v1316_v56  ;;  %v1216_v0 = vpack.c.bf16 %v720_v57, %v716_v53  ;;  %v844_v1 = vcvt.s32.f32 %v332_v58  ;;  %v848_v2 = vcvt.s32.f32 %v336_v59  ;;  %v196_v3 = vunpack.c.0.s8 %v56_v31 }
  0xc0   :  { %v1248_v4 = vpack.c.bf16 %v784_v61, %v780_v60  ;;  %v908_v5 = vcvt.s32.f32 %v396_v62  ;;  %v912_v6 = vcvt.s32.f32 %v400_v63  ;;  %v200_v7 = vunpack.c.1.s8 %v56_v31 }
  0xc1   :  { %1726 = vmatpush.bf16.msra.mxu0 %v1216_v0  ;;  %v1280_v8 = vpack.c.bf16 %v848_v2, %v844_v1  ;;  %v708_v10 = vcvt.s32.f32 %v196_v3  ;;  %v260_v11 = vunpack.c.0.s8 %v72_v41  ;;  %v264_v13 = vunpack.c.1.s8 %v72_v41  ;;  %v128_v0 = vld [vmem:[#allocation2 + $0x270] sm:$0xff] }
  0xc2   :  { %1740 = vmatpush.bf16.msra.mxu1 %v1248_v4  ;;  %v1312_v16 = vpack.c.bf16 %v912_v6, %v908_v5  ;;  %v712_v18 = vcvt.s32.f32 %v200_v7  ;;  %v324_v21 = vunpack.c.0.s8 %v88_v46  ;;  %v328_v22 = vunpack.c.1.s8 %v88_v46 }
  0xc3   :  { %1754 = vmatpush.bf16.msra.mxu2 %v1280_v8  ;;  %v772_v23 = vcvt.s32.f32 %v260_v11  ;;  %v776_v24 = vcvt.s32.f32 %v264_v13  ;;  %v388_v25 = vunpack.c.0.s8 %v104_v52  ;;  %v392_v26 = vunpack.c.1.s8 %v104_v52 }
  0xc4   :  { %1768 = vmatpush.bf16.msra.mxu3 %v1312_v16  ;;  %v1212_v28 = vpack.c.bf16 %v712_v18, %v708_v10  ;;  %v836_v29 = vcvt.s32.f32 %v324_v21  ;;  %v840_v31 = vcvt.s32.f32 %v328_v22  ;;  %v188_v32 = vunpack.c.2.s8 %v52_v15  ;;  %v144_v10 = vld [vmem:[#allocation2 + $0x2f0] sm:$0xff] }
  0xc5   :  { %v1244_v33 = vpack.c.bf16 %v776_v24, %v772_v23  ;;  %v900_v34 = vcvt.s32.f32 %v388_v25  ;;  %v904_v35 = vcvt.s32.f32 %v392_v26  ;;  %v192_v36 = vunpack.c.3.s8 %v52_v15  ;;  %v160_v18 = vld [vmem:[#allocation2 + $0x370] sm:$0xff] }
  0xc6   :  { %1727 = vmatpush.bf16.msra.mxu0 %v1212_v28  ;;  %v1276_v40 = vpack.c.bf16 %v840_v31, %v836_v29  ;;  %v700_v41 = vcvt.s32.f32 %v188_v32  ;;  %v252_v42 = vunpack.c.2.s8 %v68_v27  ;;  %v256_v43 = vunpack.c.3.s8 %v68_v27  ;;  %v176_v25 = vld [vmem:[#allocation2 + $0x3f0] sm:$0xff] }
  0xc7   :  { %1741 = vmatpush.bf16.msra.mxu1 %v1244_v33  ;;  %v1308_v44 = vpack.c.bf16 %v904_v35, %v900_v34  ;;  %v704_v45 = vcvt.s32.f32 %v192_v36  ;;  %v316_v46 = vunpack.c.2.s8 %v84_v30  ;;  %v320_v47 = vunpack.c.3.s8 %v84_v30 }
  0xc8   :  { %1755 = vmatpush.bf16.msra.mxu2 %v1276_v40  ;;  %v764_v48 = vcvt.s32.f32 %v252_v42  ;;  %v768_v49 = vcvt.s32.f32 %v256_v43  ;;  %v380_v50 = vunpack.c.2.s8 %v100_v37  ;;  %v384_v52 = vunpack.c.3.s8 %v100_v37 }
  0xc9   :  { %1769 = vmatpush.bf16.msra.mxu3 %v1308_v44  ;;  %v1208_v51 = vpack.c.bf16 %v704_v45, %v700_v41  ;;  %v828_v53 = vcvt.s32.f32 %v316_v46  ;;  %v832_v54 = vcvt.s32.f32 %v320_v47  ;;  %v180_v55 = vunpack.c.0.s8 %v52_v15 }
  0xca   :  { %v1240_v56 = vpack.c.bf16 %v768_v49, %v764_v48  ;;  %v892_v57 = vcvt.s32.f32 %v380_v50  ;;  %v896_v58 = vcvt.s32.f32 %v384_v52  ;;  %v184_v59 = vunpack.c.1.s8 %v52_v15 }
  0xcb   :  { %1728 = vmatpush.bf16.msra.mxu0 %v1208_v51  ;;  %v1272_v60 = vpack.c.bf16 %v832_v54, %v828_v53  ;;  %v692_v61 = vcvt.s32.f32 %v180_v55  ;;  %v244_v62 = vunpack.c.0.s8 %v68_v27  ;;  %v248_v63 = vunpack.c.1.s8 %v68_v27  ;;  %v124_v51 = vld [vmem:[#allocation2 + $0x250] sm:$0xff] }
  0xcc   :  { %1742 = vmatpush.bf16.msra.mxu1 %v1240_v56  ;;  %v1304_v1 = vpack.c.bf16 %v896_v58, %v892_v57  ;;  %v696_v2 = vcvt.s32.f32 %v184_v59  ;;  %v308_v3 = vunpack.c.0.s8 %v84_v30  ;;  %v312_v4 = vunpack.c.1.s8 %v84_v30 }
  0xcd   :  { %1756 = vmatpush.bf16.msra.mxu2 %v1272_v60  ;;  %v756_v5 = vcvt.s32.f32 %v244_v62  ;;  %v760_v6 = vcvt.s32.f32 %v248_v63  ;;  %v372_v7 = vunpack.c.0.s8 %v100_v37  ;;  %v376_v8 = vunpack.c.1.s8 %v100_v37 }
  0xce   :  { %1770 = vmatpush.bf16.msra.mxu3 %v1304_v1  ;;  %v1204_v11 = vpack.c.bf16 %v696_v2, %v692_v61  ;;  %v820_v13 = vcvt.s32.f32 %v308_v3  ;;  %v824_v15 = vcvt.s32.f32 %v312_v4  ;;  %v492_v16 = vunpack.c.2.s8 %v128_v0  ;;  %v140_v61 = vld [vmem:[#allocation2 + $0x2d0] sm:$0xff] }
  0xcf   :  { %v1236_v21 = vpack.c.bf16 %v760_v6, %v756_v5  ;;  %v884_v22 = vcvt.s32.f32 %v372_v7  ;;  %v888_v23 = vcvt.s32.f32 %v376_v8  ;;  %v496_v24 = vunpack.c.3.s8 %v128_v0  ;;  %v156_v2 = vld [vmem:[#allocation2 + $0x350] sm:$0xff] }
  0xd0   :  { %1729 = vmatpush.bf16.msra.mxu0 %v1204_v11  ;;  %v1268_v26 = vpack.c.bf16 %v824_v15, %v820_v13  ;;  %v1004_v27 = vcvt.s32.f32 %v492_v16  ;;  %v556_v28 = vunpack.c.2.s8 %v144_v10  ;;  %v560_v29 = vunpack.c.3.s8 %v144_v10  ;;  %v172_v7 = vld [vmem:[#allocation2 + $0x3d0] sm:$0xff] }
  0xd1   :  { %1743 = vmatpush.bf16.msra.mxu1 %v1236_v21  ;;  %v1300_v31 = vpack.c.bf16 %v888_v23, %v884_v22  ;;  %v1008_v32 = vcvt.s32.f32 %v496_v24  ;;  %v620_v30 = vunpack.c.2.s8 %v160_v18  ;;  %v624_v33 = vunpack.c.3.s8 %v160_v18 }
  0xd2   :  { %1757 = vmatpush.bf16.msra.mxu2 %v1268_v26  ;;  %v1068_v34 = vcvt.s32.f32 %v556_v28  ;;  %v1072_v35 = vcvt.s32.f32 %v560_v29  ;;  %v684_v36 = vunpack.c.2.s8 %v176_v25  ;;  %v688_v37 = vunpack.c.3.s8 %v176_v25 }
  0xd3   :  { %1771 = vmatpush.bf16.msra.mxu3 %v1300_v31  ;;  %v1360_v40 = vpack.c.bf16 %v1008_v32, %v1004_v27  ;;  %v1132_v41 = vcvt.s32.f32 %v620_v30  ;;  %v1136_v42 = vcvt.s32.f32 %v624_v33  ;;  %v484_v43 = vunpack.c.0.s8 %v128_v0  ;;  %1730 = vmatmul.bf16.vlgmr.msra.gmra.mxu0 %v2421_v9 }
  0xd4   :  { %v1392_v44 = vpack.c.bf16 %v1072_v35, %v1068_v34  ;;  %v1196_v45 = vcvt.s32.f32 %v684_v36  ;;  %v1200_v46 = vcvt.s32.f32 %v688_v37  ;;  %v488_v47 = vunpack.c.1.s8 %v128_v0  ;;  %1744 = vmatmul.bf16.vlgmr.msra.gmra.mxu1 %v2445_v38 }
  0xd5   :  { %1778 = vmatpush.bf16.msrb.mxu0 %v1360_v40  ;;  %v1424_v48 = vpack.c.bf16 %v1136_v42, %v1132_v41  ;;  %v996_v49 = vcvt.s32.f32 %v484_v43  ;;  %v548_v50 = vunpack.c.0.s8 %v144_v10  ;;  %v552_v52 = vunpack.c.1.s8 %v144_v10  ;;  %1758 = vmatmul.bf16.vlgmr.msra.gmra.mxu2 %v2423_v14  ;;  %v120_v40 = vld [vmem:[#allocation2 + $0x230] sm:$0xff] }
  0xd6   :  { %1792 = vmatpush.bf16.msrb.mxu1 %v1392_v44  ;;  %v1456_v53 = vpack.c.bf16 %v1200_v46, %v1196_v45  ;;  %v1000_v54 = vcvt.s32.f32 %v488_v47  ;;  %v612_v55 = vunpack.c.0.s8 %v160_v18  ;;  %v616_v56 = vunpack.c.1.s8 %v160_v18  ;;  %1772 = vmatmul.bf16.vlgmr.msra.gmra.mxu3 %v2447_v39 }
  0xd7   :  { %1806 = vmatpush.bf16.msrb.mxu2 %v1424_v48  ;;  %v1060_v57 = vcvt.s32.f32 %v548_v50  ;;  %v1064_v58 = vcvt.s32.f32 %v552_v52  ;;  %v676_v59 = vunpack.c.0.s8 %v176_v25  ;;  %v680_v60 = vunpack.c.1.s8 %v176_v25 }
  0xd8   :  { %1820 = vmatpush.bf16.msrb.mxu3 %v1456_v53  ;;  %v1356_v62 = vpack.c.bf16 %v1000_v54, %v996_v49  ;;  %v1124_v63 = vcvt.s32.f32 %v612_v55  ;;  %v1128_v0 = vcvt.s32.f32 %v616_v56  ;;  %v476_v1 = vunpack.c.2.s8 %v124_v51  ;;  %v136_v49 = vld [vmem:[#allocation2 + $0x2b0] sm:$0xff] }
  0xd9   :  { %v1388_v3 = vpack.c.bf16 %v1064_v58, %v1060_v57  ;;  %v1188_v4 = vcvt.s32.f32 %v676_v59  ;;  %v1192_v5 = vcvt.s32.f32 %v680_v60  ;;  %v480_v6 = vunpack.c.3.s8 %v124_v51  ;;  %v152_v54 = vld [vmem:[#allocation2 + $0x330] sm:$0xff] }
  0xda   :  { %1779 = vmatpush.bf16.msrb.mxu0 %v1356_v62  ;;  %v1420_v8 = vpack.c.bf16 %v1128_v0, %v1124_v63  ;;  %v988_v10 = vcvt.s32.f32 %v476_v1  ;;  %v540_v11 = vunpack.c.2.s8 %v140_v61  ;;  %v544_v13 = vunpack.c.3.s8 %v140_v61  ;;  %v168_v59 = vld [vmem:[#allocation2 + $0x3b0] sm:$0xff] }
  0xdb   :  { %1793 = vmatpush.bf16.msrb.mxu1 %v1388_v3  ;;  %v1452_v15 = vpack.c.bf16 %v1192_v5, %v1188_v4  ;;  %v992_v16 = vcvt.s32.f32 %v480_v6  ;;  %v604_v18 = vunpack.c.2.s8 %v156_v2  ;;  %v608_v21 = vunpack.c.3.s8 %v156_v2 }
  0xdc   :  { %1807 = vmatpush.bf16.msrb.mxu2 %v1420_v8  ;;  %v1052_v22 = vcvt.s32.f32 %v540_v11  ;;  %v1056_v23 = vcvt.s32.f32 %v544_v13  ;;  %v668_v24 = vunpack.c.2.s8 %v172_v7  ;;  %v672_v25 = vunpack.c.3.s8 %v172_v7 }
  0xdd   :  { %1821 = vmatpush.bf16.msrb.mxu3 %v1452_v15  ;;  %v1352_v26 = vpack.c.bf16 %v992_v16, %v988_v10  ;;  %v1116_v27 = vcvt.s32.f32 %v604_v18  ;;  %v1120_v28 = vcvt.s32.f32 %v608_v21  ;;  %v468_v29 = vunpack.c.0.s8 %v124_v51 }
  0xde   :  { %v1384_v31 = vpack.c.bf16 %v1056_v23, %v1052_v22  ;;  %v1180_v32 = vcvt.s32.f32 %v668_v24  ;;  %v1184_v30 = vcvt.s32.f32 %v672_v25  ;;  %v472_v33 = vunpack.c.1.s8 %v124_v51 }
  0xdf   :  { %1780 = vmatpush.bf16.msrb.mxu0 %v1352_v26  ;;  %v1416_v34 = vpack.c.bf16 %v1120_v28, %v1116_v27  ;;  %v980_v35 = vcvt.s32.f32 %v468_v29  ;;  %v532_v36 = vunpack.c.0.s8 %v140_v61  ;;  %v536_v37 = vunpack.c.1.s8 %v140_v61  ;;  %v116_v26 = vld [vmem:[#allocation2 + $0x210] sm:$0xff] }
  0xe0   :  { %1794 = vmatpush.bf16.msrb.mxu1 %v1384_v31  ;;  %v1448_v41 = vpack.c.bf16 %v1184_v30, %v1180_v32  ;;  %v984_v42 = vcvt.s32.f32 %v472_v33  ;;  %v596_v43 = vunpack.c.0.s8 %v156_v2  ;;  %v600_v44 = vunpack.c.1.s8 %v156_v2 }
  0xe1   :  { %1808 = vmatpush.bf16.msrb.mxu2 %v1416_v34  ;;  %v1044_v45 = vcvt.s32.f32 %v532_v36  ;;  %v1048_v46 = vcvt.s32.f32 %v536_v37  ;;  %v660_v47 = vunpack.c.0.s8 %v172_v7  ;;  %v664_v48 = vunpack.c.1.s8 %v172_v7 }
  0xe2   :  { %1822 = vmatpush.bf16.msrb.mxu3 %v1448_v41  ;;  %v1348_v50 = vpack.c.bf16 %v984_v42, %v980_v35  ;;  %v1108_v52 = vcvt.s32.f32 %v596_v43  ;;  %v1112_v51 = vcvt.s32.f32 %v600_v44  ;;  %v460_v53 = vunpack.c.2.s8 %v120_v40  ;;  %v132_v35 = vld [vmem:[#allocation2 + $0x290] sm:$0xff] }
  0xe3   :  { %v1380_v55 = vpack.c.bf16 %v1048_v46, %v1044_v45  ;;  %v1172_v56 = vcvt.s32.f32 %v660_v47  ;;  %v1176_v57 = vcvt.s32.f32 %v664_v48  ;;  %v464_v58 = vunpack.c.3.s8 %v120_v40  ;;  %v148_v42 = vld [vmem:[#allocation2 + $0x310] sm:$0xff] }
  0xe4   :  { %1781 = vmatpush.bf16.msrb.mxu0 %v1348_v50  ;;  %v1412_v60 = vpack.c.bf16 %v1112_v51, %v1108_v52  ;;  %v972_v61 = vcvt.s32.f32 %v460_v53  ;;  %v524_v62 = vunpack.c.2.s8 %v136_v49  ;;  %v528_v63 = vunpack.c.3.s8 %v136_v49  ;;  %v164_v47 = vld [vmem:[#allocation2 + $0x390] sm:$0xff] }
  0xe5   :  { %1795 = vmatpush.bf16.msrb.mxu1 %v1380_v55  ;;  %v1444_v0 = vpack.c.bf16 %v1176_v57, %v1172_v56  ;;  %v976_v1 = vcvt.s32.f32 %v464_v58  ;;  %v588_v2 = vunpack.c.2.s8 %v152_v54  ;;  %v592_v3 = vunpack.c.3.s8 %v152_v54 }
  0xe6   :  { %1809 = vmatpush.bf16.msrb.mxu2 %v1412_v60  ;;  %v1036_v4 = vcvt.s32.f32 %v524_v62  ;;  %v1040_v5 = vcvt.s32.f32 %v528_v63  ;;  %v652_v6 = vunpack.c.2.s8 %v168_v59  ;;  %v656_v7 = vunpack.c.3.s8 %v168_v59 }
  0xe7   :  { %1823 = vmatpush.bf16.msrb.mxu3 %v1444_v0  ;;  %v1344_v8 = vpack.c.bf16 %v976_v1, %v972_v61  ;;  %v1100_v10 = vcvt.s32.f32 %v588_v2  ;;  %v1104_v11 = vcvt.s32.f32 %v592_v3  ;;  %v452_v13 = vunpack.c.0.s8 %v120_v40 }
  0xe8   :  { %v1376_v15 = vpack.c.bf16 %v1040_v5, %v1036_v4  ;;  %v1164_v16 = vcvt.s32.f32 %v652_v6  ;;  %v1168_v18 = vcvt.s32.f32 %v656_v7  ;;  %v456_v21 = vunpack.c.1.s8 %v120_v40  ;;  %v65_v7 = vld [vmem:[#allocation2 + $0x78] sm:$0xff] }
  0xe9   :  { %1782 = vmatpush.bf16.msrb.mxu0 %v1344_v8  ;;  %v1408_v22 = vpack.c.bf16 %v1104_v11, %v1100_v10  ;;  %v964_v23 = vcvt.s32.f32 %v452_v13  ;;  %v516_v24 = vunpack.c.0.s8 %v136_v49  ;;  %v520_v25 = vunpack.c.1.s8 %v136_v49 }
  0xea   :  { %1796 = vmatpush.bf16.msrb.mxu1 %v1376_v15  ;;  %v1440_v27 = vpack.c.bf16 %v1168_v18, %v1164_v16  ;;  %v968_v28 = vcvt.s32.f32 %v456_v21  ;;  %v580_v29 = vunpack.c.0.s8 %v152_v54  ;;  %v584_v31 = vunpack.c.1.s8 %v152_v54 }
  0xeb   :  { %1810 = vmatpush.bf16.msrb.mxu2 %v1408_v22  ;;  %v1028_v32 = vcvt.s32.f32 %v516_v24  ;;  %v1032_v30 = vcvt.s32.f32 %v520_v25  ;;  %v644_v33 = vunpack.c.0.s8 %v168_v59  ;;  %v648_v34 = vunpack.c.1.s8 %v168_v59  ;;  %v81_v22 = vld [vmem:[#allocation2 + $0xf8] sm:$0xff] }
  0xec   :  { %1824 = vmatpush.bf16.msrb.mxu3 %v1440_v27  ;;  %v1340_v36 = vpack.c.bf16 %v968_v28, %v964_v23  ;;  %v1092_v37 = vcvt.s32.f32 %v580_v29  ;;  %v1096_v40 = vcvt.s32.f32 %v584_v31  ;;  %v444_v41 = vunpack.c.2.s8 %v116_v26 }
  0xed   :  { %v1372_v43 = vpack.c.bf16 %v1032_v30, %v1028_v32  ;;  %v1156_v44 = vcvt.s32.f32 %v644_v33  ;;  %v1160_v45 = vcvt.s32.f32 %v648_v34  ;;  %v448_v46 = vunpack.c.3.s8 %v116_v26  ;;  %v113_v30 = vld [vmem:[#allocation2 + $0x1f8] sm:$0xff] }
  0xee   :  { %1783 = vmatpush.bf16.msrb.mxu0 %v1340_v36  ;;  %v1404_v48 = vpack.c.bf16 %v1096_v40, %v1092_v37  ;;  %v956_v49 = vcvt.s32.f32 %v444_v41  ;;  %v508_v50 = vunpack.c.2.s8 %v132_v35  ;;  %v512_v52 = vunpack.c.3.s8 %v132_v35 }
  0xef   :  { %1797 = vmatpush.bf16.msrb.mxu1 %v1372_v43  ;;  %v1436_v51 = vpack.c.bf16 %v1160_v45, %v1156_v44  ;;  %v960_v53 = vcvt.s32.f32 %v448_v46  ;;  %v572_v54 = vunpack.c.2.s8 %v148_v42  ;;  %v576_v55 = vunpack.c.3.s8 %v148_v42 }
  0xf0   :  { %1811 = vmatpush.bf16.msrb.mxu2 %v1404_v48  ;;  %v1020_v56 = vcvt.s32.f32 %v508_v50  ;;  %v1024_v57 = vcvt.s32.f32 %v512_v52  ;;  %v636_v58 = vunpack.c.2.s8 %v164_v47  ;;  %v640_v59 = vunpack.c.3.s8 %v164_v47 }
  0xf1   :  { %1825 = vmatpush.bf16.msrb.mxu3 %v1436_v51  ;;  %v1336_v60 = vpack.c.bf16 %v960_v53, %v956_v49  ;;  %v1084_v61 = vcvt.s32.f32 %v572_v54  ;;  %v1088_v62 = vcvt.s32.f32 %v576_v55  ;;  %v436_v2 = vunpack.c.0.s8 %v116_v26 }
  0xf2   :  { %v1368_v63 = vpack.c.bf16 %v1024_v57, %v1020_v56  ;;  %v1148_v0 = vcvt.s32.f32 %v636_v58  ;;  %v1152_v1 = vcvt.s32.f32 %v640_v59  ;;  %v440_v4 = vunpack.c.1.s8 %v116_v26  ;;  %v97_v26 = vld [vmem:[#allocation2 + $0x178] sm:$0xff] }
  0xf3   :  { %1784 = vmatpush.bf16.msrb.mxu0 %v1336_v60  ;;  %v1400_v3 = vpack.c.bf16 %v1088_v62, %v1084_v61  ;;  %v500_v5 = vunpack.c.0.s8 %v132_v35  ;;  %v504_v6 = vunpack.c.1.s8 %v132_v35  ;;  %v948_v10 = vcvt.s32.f32 %v436_v2  ;;  %v61_v61 = vld [vmem:[#allocation2 + $0x58] sm:$0xff] }
  0xf4   :  { %1798 = vmatpush.bf16.msrb.mxu1 %v1368_v63  ;;  %v1432_v8 = vpack.c.bf16 %v1152_v1, %v1148_v0  ;;  %v564_v11 = vunpack.c.0.s8 %v148_v42  ;;  %v568_v13 = vunpack.c.1.s8 %v148_v42  ;;  %v952_v15 = vcvt.s32.f32 %v440_v4 }
  0xf5   :  { %1812 = vmatpush.bf16.msrb.mxu2 %v1400_v3  ;;  %v1012_v16 = vcvt.s32.f32 %v500_v5  ;;  %v1016_v18 = vcvt.s32.f32 %v504_v6  ;;  %v628_v21 = vunpack.c.0.s8 %v164_v47  ;;  %v632_v25 = vunpack.c.1.s8 %v164_v47  ;;  %v77_v5 = vld [vmem:[#allocation2 + $0xd8] sm:$0xff] }
  0xf6   :  { %1826 = vmatpush.bf16.msrb.mxu3 %v1432_v8  ;;  %v1076_v23 = vcvt.s32.f32 %v564_v11  ;;  %v1080_v24 = vcvt.s32.f32 %v568_v13  ;;  %v237_v27 = vunpack.c.2.s8 %v65_v7  ;;  %v1332_v28 = vpack.c.bf16 %v952_v15, %v948_v10  ;;  %v93_v11 = vld [vmem:[#allocation2 + $0x158] sm:$0xff] }
  0xf7   :  { %v1364_v29 = vpack.c.bf16 %v1016_v18, %v1012_v16  ;;  %v1140_v31 = vcvt.s32.f32 %v628_v21  ;;  %v241_v32 = vunpack.c.3.s8 %v65_v7  ;;  %v1144_v34 = vcvt.s32.f32 %v632_v25  ;;  %v109_v21 = vld [vmem:[#allocation2 + $0x1d8] sm:$0xff] }
  0xf8   :  { %v1396_v33 = vpack.c.bf16 %v1080_v24, %v1076_v23  ;;  %v749_v35 = vcvt.s32.f32 %v237_v27  ;;  %v301_v36 = vunpack.c.2.s8 %v81_v22  ;;  %1785 = vmatpush.bf16.msrb.mxu0 %v1332_v28  ;;  %v305_v40 = vunpack.c.3.s8 %v81_v22 }
  0xf9   :  { %1799 = vmatpush.bf16.msrb.mxu1 %v1364_v29  ;;  %v753_v37 = vcvt.s32.f32 %v241_v32  ;;  %v365_v41 = vunpack.c.2.s8 %v97_v26  ;;  %v369_v42 = vunpack.c.3.s8 %v97_v26  ;;  %v1428_v43 = vpack.c.bf16 %v1144_v34, %v1140_v31 }
  0xfa   :  { %1813 = vmatpush.bf16.msrb.mxu2 %v1396_v33  ;;  %v813_v44 = vcvt.s32.f32 %v301_v36  ;;  %v429_v45 = vunpack.c.2.s8 %v113_v30  ;;  %v433_v46 = vunpack.c.3.s8 %v113_v30  ;;  %v817_v48 = vcvt.s32.f32 %v305_v40 }
  0xfb   :  { %v1233_v47 = vpack.c.bf16 %v753_v37, %v749_v35  ;;  %v877_v49 = vcvt.s32.f32 %v365_v41  ;;  %v881_v50 = vcvt.s32.f32 %v369_v42  ;;  %1827 = vmatpush.bf16.msrb.mxu3 %v1428_v43  ;;  %1786 = vmatmul.bf16.vlgmr.msrb.gmra.mxu0 %v2495_v12  ;;  %v229_v53 = vunpack.c.0.s8 %v65_v7 }
  0xfc   :  { %v941_v52 = vcvt.s32.f32 %v429_v45  ;;  %v945_v51 = vcvt.s32.f32 %v433_v46  ;;  %v1265_v54 = vpack.c.bf16 %v817_v48, %v813_v44  ;;  %v233_v56 = vunpack.c.1.s8 %v65_v7  ;;  %1800 = vmatmul.bf16.vlgmr.msrb.gmra.mxu1 %v2499_v19 }
  0xfd   :  { %1834 = vmatpush.bf16.msra.mxu0 %v1233_v47  ;;  %v1297_v55 = vpack.c.bf16 %v881_v50, %v877_v49  ;;  %1814 = vmatmul.bf16.vlgmr.msrb.gmra.mxu2 %v2497_v17  ;;  %v293_v57 = vunpack.c.0.s8 %v81_v22  ;;  %v741_v59 = vcvt.s32.f32 %v229_v53  ;;  %v297_v60 = vunpack.c.1.s8 %v81_v22  ;;  %v57_v53 = vld [vmem:[#allocation2 + $0x38] sm:$0xff] }
  0xfe   :  { %v1329_v58 = vpack.c.bf16 %v945_v51, %v941_v52  ;;  %1848 = vmatpush.bf16.msra.mxu1 %v1265_v54  ;;  %v745_v62 = vcvt.s32.f32 %v233_v56  ;;  %v357_v0 = vunpack.c.0.s8 %v97_v26  ;;  %v361_v1 = vunpack.c.1.s8 %v97_v26  ;;  %1828 = vmatmul.bf16.vlgmr.msrb.gmra.mxu3 %v2501_v20 }
  0xff   :  { %1862 = vmatpush.bf16.msra.mxu2 %v1297_v55  ;;  %v805_v63 = vcvt.s32.f32 %v293_v57  ;;  %v809_v2 = vcvt.s32.f32 %v297_v60  ;;  %v421_v3 = vunpack.c.0.s8 %v113_v30  ;;  %v425_v4 = vunpack.c.1.s8 %v113_v30 }
 0x100   :  { %1876 = vmatpush.bf16.msra.mxu3 %v1329_v58  ;;  %v1229_v6 = vpack.c.bf16 %v745_v62, %v741_v59  ;;  %v869_v7 = vcvt.s32.f32 %v357_v0  ;;  %v873_v8 = vcvt.s32.f32 %v361_v1  ;;  %v221_v10 = vunpack.c.2.s8 %v61_v61  ;;  %v73_v58 = vld [vmem:[#allocation2 + $0xb8] sm:$0xff] }
 0x101   :  { %v1261_v13 = vpack.c.bf16 %v809_v2, %v805_v63  ;;  %v933_v15 = vcvt.s32.f32 %v421_v3  ;;  %v937_v16 = vcvt.s32.f32 %v425_v4  ;;  %v225_v18 = vunpack.c.3.s8 %v61_v61  ;;  %v89_v59 = vld [vmem:[#allocation2 + $0x138] sm:$0xff]  ;;  %v1507_v4 = vpop.f32.mrf.mxu0 }
 0x102   :  { %1835 = vmatpush.bf16.msra.mxu0 %v1229_v6  ;;  %v1293_v22 = vpack.c.bf16 %v873_v8, %v869_v7  ;;  %v733_v23 = vcvt.s32.f32 %v221_v10  ;;  %v285_v24 = vunpack.c.2.s8 %v77_v5  ;;  %v289_v25 = vunpack.c.3.s8 %v77_v5  ;;  %v105_v3 = vld [vmem:[#allocation2 + $0x1b8] sm:$0xff] }
 0x103   :  { %1849 = vmatpush.bf16.msra.mxu1 %v1261_v13  ;;  %v1325_v27 = vpack.c.bf16 %v937_v16, %v933_v15  ;;  %v737_v26 = vcvt.s32.f32 %v225_v18  ;;  %v349_v28 = vunpack.c.2.s8 %v93_v11  ;;  %v353_v29 = vunpack.c.3.s8 %v93_v11 }
 0x104   :  { %1863 = vmatpush.bf16.msra.mxu2 %v1293_v22  ;;  %v797_v31 = vcvt.s32.f32 %v285_v24  ;;  %v801_v32 = vcvt.s32.f32 %v289_v25  ;;  %v413_v30 = vunpack.c.2.s8 %v109_v21  ;;  %v417_v33 = vunpack.c.3.s8 %v109_v21 }
 0x105   :  { %1877 = vmatpush.bf16.msra.mxu3 %v1325_v27  ;;  %v1225_v34 = vpack.c.bf16 %v737_v26, %v733_v23  ;;  %v861_v35 = vcvt.s32.f32 %v349_v28  ;;  %v865_v36 = vcvt.s32.f32 %v353_v29  ;;  %v213_v43 = vunpack.c.0.s8 %v61_v61  ;;  %v1521_v27 = vpop.f32.mrf.mxu1 }
 0x106   :  { %v1257_v37 = vpack.c.bf16 %v801_v32, %v797_v31  ;;  %v925_v40 = vcvt.s32.f32 %v413_v30  ;;  %v929_v41 = vcvt.s32.f32 %v417_v33  ;;  %v217_v44 = vunpack.c.1.s8 %v61_v61 }
 0x107   :  { %1836 = vmatpush.bf16.msra.mxu0 %v1225_v34  ;;  %v1289_v42 = vpack.c.bf16 %v865_v36, %v861_v35  ;;  %v277_v46 = vunpack.c.0.s8 %v77_v5  ;;  %v281_v47 = vunpack.c.1.s8 %v77_v5  ;;  %v341_v48 = vunpack.c.0.s8 %v93_v11 }
 0x108   :  { %1850 = vmatpush.bf16.msra.mxu1 %v1257_v37  ;;  %v1321_v45 = vpack.c.bf16 %v929_v41, %v925_v40  ;;  %v725_v49 = vcvt.s32.f32 %v213_v43  ;;  %v729_v50 = vcvt.s32.f32 %v217_v44  ;;  %v345_v52 = vunpack.c.1.s8 %v93_v11  ;;  %v1535_v43 = vpop.f32.mrf.mxu2 }
 0x109   :  { %1864 = vmatpush.bf16.msra.mxu2 %v1289_v42  ;;  %v405_v51 = vunpack.c.0.s8 %v109_v21  ;;  %v789_v54 = vcvt.s32.f32 %v277_v46  ;;  %v793_v55 = vcvt.s32.f32 %v281_v47  ;;  %v853_v56 = vcvt.s32.f32 %v341_v48  ;;  %v53_v42 = vld [vmem:[#allocation2 + $0x18] sm:$0xff] }
 0x10a   :  { %1878 = vmatpush.bf16.msra.mxu3 %v1321_v45  ;;  %v409_v57 = vunpack.c.1.s8 %v109_v21  ;;  %v1221_v60 = vpack.c.bf16 %v729_v50, %v725_v49  ;;  %v857_v61 = vcvt.s32.f32 %v345_v52  ;;  %v205_v1 = vunpack.c.2.s8 %v57_v53  ;;  %v69_v52 = vld [vmem:[#allocation2 + $0x98] sm:$0xff] }
 0x10b   :  { %v917_v62 = vcvt.s32.f32 %v405_v51  ;;  %v1253_v63 = vpack.c.bf16 %v793_v55, %v789_v54  ;;  %v209_v2 = vunpack.c.3.s8 %v57_v53  ;;  %v269_v6 = vunpack.c.2.s8 %v73_v58  ;;  %v2531_v51 = vld [vmem:[#allocation2 + $0x118] sm:$0xff]  ;;  %v1509_v54 = vpop.f32.mrf.mxu0 }
 0x10c   :  { %v921_v0 = vcvt.s32.f32 %v409_v57  ;;  %1837 = vmatpush.bf16.msra.mxu0 %v1221_v60  ;;  %v1285_v5 = vpack.c.bf16 %v857_v61, %v853_v56  ;;  %v273_v7 = vunpack.c.3.s8 %v73_v58  ;;  %v333_v8 = vunpack.c.2.s8 %v89_v59 }
 0x10d   :  { %1851 = vmatpush.bf16.msra.mxu1 %v1253_v63  ;;  %v717_v11 = vcvt.s32.f32 %v205_v1  ;;  %v721_v13 = vcvt.s32.f32 %v209_v2  ;;  %v337_v15 = vunpack.c.3.s8 %v89_v59  ;;  %v781_v16 = vcvt.s32.f32 %v269_v6  ;;  %v1549_v63 = vpop.f32.mrf.mxu3 }
 0x10e   :  { %v1317_v10 = vpack.c.bf16 %v921_v0, %v917_v62  ;;  %1865 = vmatpush.bf16.msra.mxu2 %v1285_v5  ;;  %v785_v18 = vcvt.s32.f32 %v273_v7  ;;  %v845_v21 = vcvt.s32.f32 %v333_v8  ;;  %v397_v22 = vunpack.c.2.s8 %v105_v3  ;;  %v1523_v8 = vpop.f32.mrf.mxu1 }
 0x10f   :  { %v1217_v23 = vpack.c.bf16 %v721_v13, %v717_v11  ;;  %v849_v24 = vcvt.s32.f32 %v337_v15  ;;  %v401_v25 = vunpack.c.3.s8 %v105_v3  ;;  %v1522_v29 = vadd.f32 %v1521_v27, %v1507_v4 }
 0x110   :  { %1879 = vmatpush.bf16.msra.mxu3 %v1317_v10  ;;  %v1249_v26 = vpack.c.bf16 %v785_v18, %v781_v16  ;;  %v909_v28 = vcvt.s32.f32 %v397_v22  ;;  %v197_v30 = vunpack.c.0.s8 %v57_v53  ;;  %v201_v33 = vunpack.c.1.s8 %v57_v53 }
 0x111   :  { %1838 = vmatpush.bf16.msra.mxu0 %v1217_v23  ;;  %v1281_v31 = vpack.c.bf16 %v849_v24, %v845_v21  ;;  %v913_v32 = vcvt.s32.f32 %v401_v25  ;;  %v261_v34 = vunpack.c.0.s8 %v73_v58  ;;  %v265_v35 = vunpack.c.1.s8 %v73_v58  ;;  %v2533_v58 = vld [vmem:[#allocation2 + $0x198] sm:$0xff] }
 0x112   :  { %1852 = vmatpush.bf16.msra.mxu1 %v1249_v26  ;;  %v325_v36 = vunpack.c.0.s8 %v89_v59  ;;  %v709_v40 = vcvt.s32.f32 %v197_v30  ;;  %v329_v41 = vunpack.c.1.s8 %v89_v59  ;;  %v713_v44 = vcvt.s32.f32 %v201_v33 }
 0x113   :  { %1866 = vmatpush.bf16.msra.mxu2 %v1281_v31  ;;  %v1313_v37 = vpack.c.bf16 %v913_v32, %v909_v28  ;;  %v773_v45 = vcvt.s32.f32 %v261_v34  ;;  %v777_v46 = vcvt.s32.f32 %v265_v35  ;;  %v389_v49 = vunpack.c.0.s8 %v105_v3  ;;  %v1537_v32 = vpop.f32.mrf.mxu2 }
 0x114   :  { %v837_v47 = vcvt.s32.f32 %v325_v36  ;;  %v841_v48 = vcvt.s32.f32 %v329_v41  ;;  %v393_v50 = vunpack.c.1.s8 %v105_v3  ;;  %v1536_v53 = vadd.f32 %v1535_v43, %v1522_v29  ;;  %v129_v36 = vld [vmem:[#allocation2 + $0x278] sm:$0xff] }
 0x115   :  { %1880 = vmatpush.bf16.msra.mxu3 %v1313_v37  ;;  %v1213_v55 = vpack.c.bf16 %v713_v44, %v709_v40  ;;  %v1245_v56 = vpack.c.bf16 %v777_v46, %v773_v45  ;;  %v189_v57 = vunpack.c.2.s8 %v53_v42  ;;  %v901_v60 = vcvt.s32.f32 %v389_v49  ;;  %v1563_v44 = vpop.f32.mrf.mxu0 }
 0x116   :  { %v1277_v59 = vpack.c.bf16 %v841_v48, %v837_v47  ;;  %v905_v61 = vcvt.s32.f32 %v393_v50  ;;  %v193_v62 = vunpack.c.3.s8 %v53_v42  ;;  %v253_v1 = vunpack.c.2.s8 %v69_v52 }
 0x117   :  { %1839 = vmatpush.bf16.msra.mxu0 %v1213_v55  ;;  %1853 = vmatpush.bf16.msra.mxu1 %v1245_v56  ;;  %v701_v0 = vcvt.s32.f32 %v189_v57  ;;  %v257_v2 = vunpack.c.3.s8 %v69_v52  ;;  %v317_v3 = vunpack.c.2.s8 %v2531_v51  ;;  %v321_v6 = vunpack.c.3.s8 %v2531_v51  ;;  %v1551_v55 = vpop.f32.mrf.mxu3 }
 0x118   :  { %1867 = vmatpush.bf16.msra.mxu2 %v1277_v59  ;;  %v1309_v4 = vpack.c.bf16 %v905_v61, %v901_v60  ;;  %v705_v5 = vcvt.s32.f32 %v193_v62  ;;  %v381_v7 = vunpack.c.2.s8 %v2533_v58  ;;  %v765_v10 = vcvt.s32.f32 %v253_v1  ;;  %v177_v60 = vld [vmem:[#allocation2 + $0x3f8] sm:$0xff] }
 0x119   :  { %v769_v11 = vcvt.s32.f32 %v257_v2  ;;  %v829_v13 = vcvt.s32.f32 %v317_v3  ;;  %v385_v15 = vunpack.c.3.s8 %v2533_v58  ;;  %v1524_v16 = vadd.f32 %v1523_v8, %v1509_v54  ;;  %v161_v54 = vld [vmem:[#allocation2 + $0x378] sm:$0xff] }
 0x11a   :  { %1881 = vmatpush.bf16.msra.mxu3 %v1309_v4  ;;  %v1209_v18 = vpack.c.bf16 %v705_v5, %v701_v0  ;;  %v833_v21 = vcvt.s32.f32 %v321_v6  ;;  %v893_v22 = vcvt.s32.f32 %v381_v7  ;;  %v181_v25 = vunpack.c.0.s8 %v53_v42 }
 0x11b   :  { %v1241_v23 = vpack.c.bf16 %v769_v11, %v765_v10  ;;  %v897_v24 = vcvt.s32.f32 %v385_v15  ;;  %v185_v27 = vunpack.c.1.s8 %v53_v42  ;;  %v1550_v26 = vadd.f32 %v1549_v63, %v1536_v53  ;;  %v145_v42 = vld [vmem:[#allocation2 + $0x2f8] sm:$0xff]  ;;  %v2549_v15 = vpop.f32.mrf.mxu1 }
 0x11c   :  { %1840 = vmatpush.bf16.msra.mxu0 %v1209_v18  ;;  %v1273_v28 = vpack.c.bf16 %v833_v21, %v829_v13  ;;  %v245_v29 = vunpack.c.0.s8 %v69_v52  ;;  %v249_v31 = vunpack.c.1.s8 %v69_v52  ;;  %v693_v33 = vcvt.s32.f32 %v181_v25 }
 0x11d   :  { %1854 = vmatpush.bf16.msra.mxu1 %v1241_v23  ;;  %v1305_v30 = vpack.c.bf16 %v897_v24, %v893_v22  ;;  %v697_v34 = vcvt.s32.f32 %v185_v27  ;;  %v309_v35 = vunpack.c.0.s8 %v2531_v51  ;;  %v1538_v37 = vadd.f32 %v1537_v32, %v1524_v16  ;;  %v2553_v32 = vpop.f32.mrf.mxu2 }
 0x11e   :  { %1868 = vmatpush.bf16.msra.mxu2 %v1273_v28  ;;  %v757_v40 = vcvt.s32.f32 %v245_v29  ;;  %v761_v41 = vcvt.s32.f32 %v249_v31  ;;  %v313_v43 = vunpack.c.1.s8 %v2531_v51  ;;  %v373_v47 = vunpack.c.0.s8 %v2533_v58 }
 0x11f   :  { %1882 = vmatpush.bf16.msra.mxu3 %v1305_v30  ;;  %v1205_v45 = vpack.c.bf16 %v697_v34, %v693_v33  ;;  %v821_v46 = vcvt.s32.f32 %v309_v35  ;;  %v377_v48 = vunpack.c.1.s8 %v2533_v58  ;;  %v2543_v49 = vadd.f32 %v1563_v44, %v1550_v26 }
 0x120   :  { %v1237_v50 = vpack.c.bf16 %v761_v41, %v757_v40  ;;  %v825_v52 = vcvt.s32.f32 %v313_v43  ;;  %v493_v53 = vunpack.c.2.s8 %v129_v36  ;;  %v885_v56 = vcvt.s32.f32 %v373_v47  ;;  %v157_v41 = vld [vmem:[#allocation2 + $0x358] sm:$0xff] }
 0x121   :  { %1841 = vmatpush.bf16.msra.mxu0 %v1205_v45  ;;  %v889_v57 = vcvt.s32.f32 %v377_v48  ;;  %v497_v51 = vunpack.c.3.s8 %v129_v36  ;;  %v557_v59 = vunpack.c.2.s8 %v145_v42  ;;  %v2545_v61 = vadd.f32 %v1551_v55, %v1538_v37 }
 0x122   :  { %1855 = vmatpush.bf16.msra.mxu1 %v1237_v50  ;;  %v1269_v62 = vpack.c.bf16 %v825_v52, %v821_v46  ;;  %v1005_v63 = vcvt.s32.f32 %v493_v53  ;;  %v561_v0 = vunpack.c.3.s8 %v145_v42  ;;  %v621_v3 = vunpack.c.2.s8 %v161_v54  ;;  %v2555_v52 = vpop.f32.mrf.mxu0  ;;  %v2557_v53 = vpop.f32.mrf.mxu3 }
 0x123   :  { %v1301_v58 = vpack.c.bf16 %v889_v57, %v885_v56  ;;  %v1009_v1 = vcvt.s32.f32 %v497_v51  ;;  %v1069_v2 = vcvt.s32.f32 %v557_v59  ;;  %v625_v5 = vunpack.c.3.s8 %v161_v54 }
 0x124   :  { %1869 = vmatpush.bf16.msra.mxu2 %v1269_v62  ;;  %v1073_v4 = vcvt.s32.f32 %v561_v0  ;;  %v685_v6 = vunpack.c.2.s8 %v177_v60  ;;  %v689_v7 = vunpack.c.3.s8 %v177_v60  ;;  %1842 = vmatmul.bf16.vlgmr.msra.gmra.mxu0 %v2421_v9  ;;  %v1133_v10 = vcvt.s32.f32 %v621_v3  ;;  %v125_v9 = vld [vmem:[#allocation2 + $0x258] sm:$0xff] }
 0x125   :  { %1883 = vmatpush.bf16.msra.mxu3 %v1301_v58  ;;  %v1361_v8 = vpack.c.bf16 %v1009_v1, %v1005_v63  ;;  %v485_v11 = vunpack.c.0.s8 %v129_v36  ;;  %v489_v13 = vunpack.c.1.s8 %v129_v36  ;;  %1856 = vmatmul.bf16.vlgmr.msra.gmra.mxu1 %v2445_v38  ;;  %v1137_v18 = vcvt.s32.f32 %v625_v5  ;;  %v141_v38 = vld [vmem:[#allocation2 + $0x2d8] sm:$0xff] }
 0x126   :  { %v1393_v16 = vpack.c.bf16 %v1073_v4, %v1069_v2  ;;  %v1197_v21 = vcvt.s32.f32 %v685_v6  ;;  %v1201_v22 = vcvt.s32.f32 %v689_v7  ;;  %v549_v25 = vunpack.c.0.s8 %v145_v42  ;;  %v2559_v2 = vpop.f32.mrf.mxu1 }
 0x127   :  { %1890 = vmatpush.bf16.msrb.mxu0 %v1361_v8  ;;  %v997_v23 = vcvt.s32.f32 %v485_v11  ;;  %v1001_v24 = vcvt.s32.f32 %v489_v13  ;;  %v553_v27 = vunpack.c.1.s8 %v145_v42  ;;  %1870 = vmatmul.bf16.vlgmr.msra.gmra.mxu2 %v2423_v14  ;;  %v1425_v26 = vpack.c.bf16 %v1137_v18, %v1133_v10  ;;  %v121_v13 = vld [vmem:[#allocation2 + $0x238] sm:$0xff] }
 0x128   :  { %1904 = vmatpush.bf16.msrb.mxu1 %v1393_v16  ;;  %v1457_v28 = vpack.c.bf16 %v1201_v22, %v1197_v21  ;;  %v613_v29 = vunpack.c.0.s8 %v161_v54  ;;  %v617_v31 = vunpack.c.1.s8 %v161_v54  ;;  %1884 = vmatmul.bf16.vlgmr.msra.gmra.mxu3 %v2447_v39  ;;  %v1061_v33 = vcvt.s32.f32 %v549_v25  ;;  %v173_v39 = vld [vmem:[#allocation2 + $0x3d8] sm:$0xff] }
 0x129   :  { %v1357_v30 = vpack.c.bf16 %v1001_v24, %v997_v23  ;;  %v1065_v34 = vcvt.s32.f32 %v553_v27  ;;  %v677_v35 = vunpack.c.0.s8 %v177_v60  ;;  %1918 = vmatpush.bf16.msrb.mxu2 %v1425_v26  ;;  %v681_v14 = vunpack.c.1.s8 %v177_v60  ;;  %v2561_v23 = vpop.f32.mrf.mxu2 }
 0x12a   :  { %1932 = vmatpush.bf16.msrb.mxu3 %v1457_v28  ;;  %v1125_v36 = vcvt.s32.f32 %v613_v29  ;;  %v1129_v37 = vcvt.s32.f32 %v617_v31  ;;  %v477_v40 = vunpack.c.2.s8 %v125_v9  ;;  %v481_v44 = vunpack.c.3.s8 %v125_v9  ;;  %v137_v28 = vld [vmem:[#allocation2 + $0x2b8] sm:$0xff] }
 0x12b   :  { %1891 = vmatpush.bf16.msrb.mxu0 %v1357_v30  ;;  %v1389_v43 = vpack.c.bf16 %v1065_v34, %v1061_v33  ;;  %v1189_v42 = vcvt.s32.f32 %v677_v35  ;;  %v541_v45 = vunpack.c.2.s8 %v141_v38  ;;  %v1193_v47 = vcvt.s32.f32 %v681_v14  ;;  %v2563_v14 = vpop.f32.mrf.mxu0 }
 0x12c   :  { %v1421_v46 = vpack.c.bf16 %v1129_v37, %v1125_v36  ;;  %v989_v48 = vcvt.s32.f32 %v477_v40  ;;  %v545_v50 = vunpack.c.3.s8 %v141_v38  ;;  %v993_v54 = vcvt.s32.f32 %v481_v44  ;;  %v169_v37 = vld [vmem:[#allocation2 + $0x3b8] sm:$0xff]  ;;  %v2565_v44 = vpop.f32.mrf.mxu3 }
 0x12d   :  { %1905 = vmatpush.bf16.msrb.mxu1 %v1389_v43  ;;  %v1053_v55 = vcvt.s32.f32 %v541_v45  ;;  %v605_v56 = vunpack.c.2.s8 %v157_v41  ;;  %v609_v57 = vunpack.c.3.s8 %v157_v41  ;;  %v1453_v51 = vpack.c.bf16 %v1193_v47, %v1189_v42 }
 0x12e   :  { %1919 = vmatpush.bf16.msrb.mxu2 %v1421_v46  ;;  %v1057_v59 = vcvt.s32.f32 %v545_v50  ;;  %v669_v60 = vunpack.c.2.s8 %v173_v39  ;;  %v673_v62 = vunpack.c.3.s8 %v173_v39  ;;  %v1353_v63 = vpack.c.bf16 %v993_v54, %v989_v48 }
 0x12f   :  { %v1117_v0 = vcvt.s32.f32 %v605_v56  ;;  %v1121_v58 = vcvt.s32.f32 %v609_v57  ;;  %v469_v1 = vunpack.c.0.s8 %v125_v9  ;;  %1933 = vmatpush.bf16.msrb.mxu3 %v1453_v51  ;;  %v473_v6 = vunpack.c.1.s8 %v125_v9  ;;  %v1633_v56 = vpop.f32.mrf.mxu1 }
 0x130   :  { %v1385_v3 = vpack.c.bf16 %v1057_v59, %v1053_v55  ;;  %v1181_v4 = vcvt.s32.f32 %v669_v60  ;;  %v1185_v5 = vcvt.s32.f32 %v673_v62  ;;  %1892 = vmatpush.bf16.msrb.mxu0 %v1353_v63  ;;  %v533_v10 = vunpack.c.0.s8 %v141_v38 }
 0x131   :  { %v1417_v7 = vpack.c.bf16 %v1121_v58, %v1117_v0  ;;  %v981_v8 = vcvt.s32.f32 %v469_v1  ;;  %v537_v11 = vunpack.c.1.s8 %v141_v38  ;;  %v985_v18 = vcvt.s32.f32 %v473_v6  ;;  %v153_v38 = vld [vmem:[#allocation2 + $0x338] sm:$0xff] }
 0x132   :  { %1906 = vmatpush.bf16.msrb.mxu1 %v1385_v3  ;;  %v1449_v16 = vpack.c.bf16 %v1185_v5, %v1181_v4  ;;  %v597_v21 = vunpack.c.0.s8 %v157_v41  ;;  %v601_v22 = vunpack.c.1.s8 %v157_v41  ;;  %v1045_v24 = vcvt.s32.f32 %v533_v10  ;;  %v2567_v6 = vld [vmem:[#allocation2 + $0x218] sm:$0xff] }
 0x133   :  { %1920 = vmatpush.bf16.msrb.mxu2 %v1417_v7  ;;  %v1049_v25 = vcvt.s32.f32 %v537_v11  ;;  %v661_v27 = vunpack.c.0.s8 %v173_v39  ;;  %v665_v26 = vunpack.c.1.s8 %v173_v39  ;;  %v1349_v9 = vpack.c.bf16 %v985_v18, %v981_v8  ;;  %v2569_v7 = vpop.f32.mrf.mxu2 }
 0x134   :  { %1934 = vmatpush.bf16.msrb.mxu3 %v1449_v16  ;;  %v1109_v29 = vcvt.s32.f32 %v597_v21  ;;  %v1113_v31 = vcvt.s32.f32 %v601_v22  ;;  %v461_v30 = vunpack.c.2.s8 %v121_v13  ;;  %v465_v36 = vunpack.c.3.s8 %v121_v13 }
 0x135   :  { %v1381_v33 = vpack.c.bf16 %v1049_v25, %v1045_v24  ;;  %v1173_v34 = vcvt.s32.f32 %v661_v27  ;;  %v1177_v35 = vcvt.s32.f32 %v665_v26  ;;  %1893 = vmatpush.bf16.msrb.mxu0 %v1349_v9  ;;  %v525_v43 = vunpack.c.2.s8 %v137_v28  ;;  %v149_v9 = vld [vmem:[#allocation2 + $0x318] sm:$0xff] }
 0x136   :  { %v1413_v40 = vpack.c.bf16 %v1113_v31, %v1109_v29  ;;  %v973_v41 = vcvt.s32.f32 %v461_v30  ;;  %v529_v42 = vunpack.c.3.s8 %v137_v28  ;;  %v977_v39 = vcvt.s32.f32 %v465_v36 }
 0x137   :  { %1907 = vmatpush.bf16.msrb.mxu1 %v1381_v33  ;;  %v1445_v45 = vpack.c.bf16 %v1177_v35, %v1173_v34  ;;  %v589_v46 = vunpack.c.2.s8 %v153_v38  ;;  %v593_v47 = vunpack.c.3.s8 %v153_v38  ;;  %v1037_v48 = vcvt.s32.f32 %v525_v43  ;;  %v165_v34 = vld [vmem:[#allocation2 + $0x398] sm:$0xff]  ;;  %v2575_v35 = vpop.f32.mrf.mxu3 }
 0x138   :  { %1921 = vmatpush.bf16.msrb.mxu2 %v1413_v40  ;;  %v1041_v50 = vcvt.s32.f32 %v529_v42  ;;  %v653_v54 = vunpack.c.2.s8 %v169_v37  ;;  %v657_v55 = vunpack.c.3.s8 %v169_v37  ;;  %v1345_v57 = vpack.c.bf16 %v977_v39, %v973_v41 }
 0x139   :  { %1935 = vmatpush.bf16.msrb.mxu3 %v1445_v45  ;;  %v1101_v51 = vcvt.s32.f32 %v589_v46  ;;  %v1105_v59 = vcvt.s32.f32 %v593_v47  ;;  %v453_v60 = vunpack.c.0.s8 %v121_v13  ;;  %v457_v58 = vunpack.c.1.s8 %v121_v13  ;;  %v133_v13 = vld [vmem:[#allocation2 + $0x298] sm:$0xff] }
 0x13a   :  { %v1377_v62 = vpack.c.bf16 %v1041_v50, %v1037_v48  ;;  %v1165_v63 = vcvt.s32.f32 %v653_v54  ;;  %v1169_v0 = vcvt.s32.f32 %v657_v55  ;;  %1894 = vmatpush.bf16.msrb.mxu0 %v1345_v57  ;;  %v517_v4 = vunpack.c.0.s8 %v137_v28  ;;  %v1635_v54 = vpop.f32.mrf.mxu1 }
 0x13b   :  { %v1409_v1 = vpack.c.bf16 %v1105_v59, %v1101_v51  ;;  %v965_v3 = vcvt.s32.f32 %v453_v60  ;;  %v521_v5 = vunpack.c.1.s8 %v137_v28  ;;  %v969_v10 = vcvt.s32.f32 %v457_v58 }
 0x13c   :  { %1908 = vmatpush.bf16.msrb.mxu1 %v1377_v62  ;;  %v1441_v8 = vpack.c.bf16 %v1169_v0, %v1165_v63  ;;  %v581_v11 = vunpack.c.0.s8 %v153_v38  ;;  %v585_v16 = vunpack.c.1.s8 %v153_v38  ;;  %v1029_v18 = vcvt.s32.f32 %v517_v4  ;;  %v2573_v38 = vpop.f32.mrf.mxu0 }
 0x13d   :  { %1922 = vmatpush.bf16.msrb.mxu2 %v1409_v1  ;;  %v1033_v21 = vcvt.s32.f32 %v521_v5  ;;  %v645_v22 = vunpack.c.0.s8 %v169_v37  ;;  %v649_v24 = vunpack.c.1.s8 %v169_v37  ;;  %v1341_v25 = vpack.c.bf16 %v969_v10, %v965_v3  ;;  %v1979_v5 = vld [vmem:[%s2688_s2 + $0x18] sm:$0xff] }
 0x13e   :  { %1936 = vmatpush.bf16.msrb.mxu3 %v1441_v8  ;;  %v1093_v27 = vcvt.s32.f32 %v581_v11  ;;  %v1097_v26 = vcvt.s32.f32 %v585_v16  ;;  %v445_v28 = vunpack.c.2.s8 %v2567_v6  ;;  %v449_v33 = vunpack.c.3.s8 %v2567_v6  ;;  %v1649_v8 = vpop.f32.mrf.mxu2 }
 0x13f   :  { %v1373_v29 = vpack.c.bf16 %v1033_v21, %v1029_v18  ;;  %v1157_v31 = vcvt.s32.f32 %v645_v22  ;;  %v1161_v30 = vcvt.s32.f32 %v649_v24  ;;  %1895 = vmatpush.bf16.msrb.mxu0 %v1341_v25  ;;  %v509_v40 = vunpack.c.2.s8 %v133_v13 }
 0x140   :  { %v1405_v36 = vpack.c.bf16 %v1097_v26, %v1093_v27  ;;  %v957_v37 = vcvt.s32.f32 %v445_v28  ;;  %v513_v41 = vunpack.c.3.s8 %v133_v13  ;;  %v961_v42 = vcvt.s32.f32 %v449_v33 }
 0x141   :  { %1909 = vmatpush.bf16.msrb.mxu1 %v1373_v29  ;;  %v1437_v43 = vpack.c.bf16 %v1161_v30, %v1157_v31  ;;  %v573_v45 = vunpack.c.2.s8 %v149_v9  ;;  %v577_v39 = vunpack.c.3.s8 %v149_v9  ;;  %v1021_v46 = vcvt.s32.f32 %v509_v40  ;;  %v1983_v31 = vld [vmem:[%s2688_s2 + $0x38] sm:$0xff]  ;;  %v1663_v30 = vpop.f32.mrf.mxu3 }
 0x142   :  { %1923 = vmatpush.bf16.msrb.mxu2 %v1405_v36  ;;  %v1025_v47 = vcvt.s32.f32 %v513_v41  ;;  %v637_v48 = vunpack.c.2.s8 %v165_v34  ;;  %v641_v50 = vunpack.c.3.s8 %v165_v34  ;;  %v1337_v55 = vpack.c.bf16 %v961_v42, %v957_v37 }
 0x143   :  { %1937 = vmatpush.bf16.msrb.mxu3 %v1437_v43  ;;  %v1085_v57 = vcvt.s32.f32 %v573_v45  ;;  %v1089_v51 = vcvt.s32.f32 %v577_v39  ;;  %v1634_v59 = vadd.f32 %v1633_v56, %v2563_v14  ;;  %v437_v0 = vunpack.c.0.s8 %v2567_v6 }
 0x144   :  { %v1369_v60 = vpack.c.bf16 %v1025_v47, %v1021_v46  ;;  %v1149_v62 = vcvt.s32.f32 %v637_v48  ;;  %v1153_v63 = vcvt.s32.f32 %v641_v50  ;;  %1896 = vmatpush.bf16.msrb.mxu0 %v1337_v55  ;;  %v441_v1 = vunpack.c.1.s8 %v2567_v6  ;;  %v2595_v47 = vpop.f32.mrf.mxu1 }
 0x145   :  { %v1401_v58 = vpack.c.bf16 %v1089_v51, %v1085_v57  ;;  %v501_v3 = vunpack.c.0.s8 %v133_v13  ;;  %v505_v4 = vunpack.c.1.s8 %v133_v13  ;;  %v949_v11 = vcvt.s32.f32 %v437_v0  ;;  %v1982_v0 = vld [vmem:[%s2688_s2 + $0x30] sm:$0xff] }
 0x146   :  { %1910 = vmatpush.bf16.msrb.mxu1 %v1369_v60  ;;  %v1433_v10 = vpack.c.bf16 %v1153_v63, %v1149_v62  ;;  %v565_v14 = vunpack.c.0.s8 %v149_v9  ;;  %v569_v56 = vunpack.c.1.s8 %v149_v9  ;;  %v953_v16 = vcvt.s32.f32 %v441_v1  ;;  %v1675_v9 = vpop.f32.mrf.mxu0 }
 0x147   :  { %1924 = vmatpush.bf16.msrb.mxu2 %v1401_v58  ;;  %v1013_v18 = vcvt.s32.f32 %v501_v3  ;;  %v1017_v21 = vcvt.s32.f32 %v505_v4  ;;  %v629_v22 = vunpack.c.0.s8 %v165_v34  ;;  %v633_v25 = vunpack.c.1.s8 %v165_v34  ;;  %v1978_v34 = vld [vmem:[%s2688_s2 + $0x10] sm:$0xff]  ;;  %v2602_v58 = vpop.f32.mrf.mxu2 }
 0x148   :  { %1938 = vmatpush.bf16.msrb.mxu3 %v1433_v10  ;;  %v1077_v24 = vcvt.s32.f32 %v565_v14  ;;  %v1081_v6 = vcvt.s32.f32 %v569_v56  ;;  %v2006_v13 = vunpack.c.2.s8 %v1979_v5  ;;  %v1333_v27 = vpack.c.bf16 %v953_v16, %v949_v11 }
 0x149   :  { %v1365_v26 = vpack.c.bf16 %v1017_v21, %v1013_v18  ;;  %v1141_v28 = vcvt.s32.f32 %v629_v22  ;;  %v2007_v29 = vunpack.c.3.s8 %v1979_v5  ;;  %v2588_v33 = vadd.f32 %v2549_v15, %v2543_v49  ;;  %v1717_v22 = vpop.f32.mrf.mxu3 }
 0x14a   :  { %v1397_v36 = vpack.c.bf16 %v1081_v6, %v1077_v24  ;;  %v1145_v37 = vcvt.s32.f32 %v633_v25  ;;  %v2070_v40 = vcvt.s32.f32 %v2006_v13  ;;  %1897 = vmatpush.bf16.msrb.mxu0 %v1333_v27  ;;  %v2004_v43 = vunpack.c.0.s8 %v1979_v5 }
 0x14b   :  { %1911 = vmatpush.bf16.msrb.mxu1 %v1365_v26  ;;  %v2071_v41 = vcvt.s32.f32 %v2007_v29  ;;  %v2005_v42 = vunpack.c.1.s8 %v1979_v5  ;;  %v1636_v45 = vadd.f32 %v1635_v54, %v2573_v38  ;;  %v1648_v46 = vadd.f32 %v2569_v7, %v1634_v59 }
 0x14c   :  { %1925 = vmatpush.bf16.msrb.mxu2 %v1397_v36  ;;  %v1429_v39 = vpack.c.bf16 %v1145_v37, %v1141_v28  ;;  %v2022_v49 = vunpack.c.2.s8 %v1983_v31  ;;  %v2023_v15 = vunpack.c.3.s8 %v1983_v31  ;;  %v2068_v50 = vcvt.s32.f32 %v2004_v43  ;;  %v1981_v28 = vld [vmem:[%s2688_s2 + $0x28] sm:$0xff]  ;;  %v1691_v37 = vpop.f32.mrf.mxu1 }
 0x14d   :  { %v2127_v48 = vpack.c.bf16 %v2071_v41, %v2070_v40  ;;  %v2069_v55 = vcvt.s32.f32 %v2005_v42  ;;  %v2002_v57 = vunpack.c.2.s8 %v1978_v34  ;;  %1898 = vmatmul.bf16.vlgmr.msrb.gmra.mxu0 %v2495_v12  ;;  %v2003_v62 = vunpack.c.3.s8 %v1978_v34 }
 0x14e   :  { %1939 = vmatpush.bf16.msrb.mxu3 %v1429_v39  ;;  %v2086_v51 = vcvt.s32.f32 %v2022_v49  ;;  %v2087_v60 = vcvt.s32.f32 %v2023_v15  ;;  %v1650_v63 = vadd.f32 %v1649_v8, %v1636_v45  ;;  %1912 = vmatmul.bf16.vlgmr.msrb.gmra.mxu1 %v2499_v19  ;;  %v2020_v54 = vunpack.c.0.s8 %v1983_v31  ;;  %v1977_v19 = vld [vmem:[%s2688_s2 + $0x8] sm:$0xff]  ;;  %v1677_v21 = vpop.f32.mrf.mxu0 }
 0x14f   :  { %2152 = vmatpush.bf16.msra.mxu0 %v2127_v48  ;;  %v2126_v38 = vpack.c.bf16 %v2069_v55, %v2068_v50  ;;  %v2066_v7 = vcvt.s32.f32 %v2002_v57  ;;  %v2021_v59 = vunpack.c.1.s8 %v1983_v31  ;;  %v1566_v12 = vadd.f32 %v2555_v52, %v2545_v61  ;;  %1926 = vmatmul.bf16.vlgmr.msrb.gmra.mxu2 %v2497_v17  ;;  %v1705_v55 = vpop.f32.mrf.mxu2 }
 0x150   :  { %v1662_v1 = vadd.f32 %v2575_v35, %v1648_v46  ;;  %v2135_v3 = vpack.c.bf16 %v2087_v60, %v2086_v51  ;;  %v2067_v4 = vcvt.s32.f32 %v2003_v62  ;;  %v2084_v5 = vcvt.s32.f32 %v2020_v54  ;;  %v2625_v46 = vld [vmem:[%s2690_s4] sm:$0xf] }
 0x151   :  { %1940 = vmatmul.bf16.vlgmr.msrb.gmra.mxu3 %v2501_v20  ;;  %v2085_v8 = vcvt.s32.f32 %v2021_v59  ;;  %v2000_v10 = vunpack.c.0.s8 %v1978_v34  ;;  %v2001_v11 = vunpack.c.1.s8 %v1978_v34  ;;  %v1664_v56 = vadd.f32 %v1663_v30, %v1650_v63 }
 0x152   :  { %2166 = vmatpush.bf16.msra.mxu1 %v2135_v3  ;;  %v2125_v14 = vpack.c.bf16 %v2067_v4, %v2066_v7  ;;  %v2018_v61 = vunpack.c.2.s8 %v1982_v0  ;;  %v2019_v52 = vunpack.c.3.s8 %v1982_v0  ;;  %v1998_v18 = vunpack.c.2.s8 %v1977_v19  ;;  %v1719_v4 = vpop.f32.mrf.mxu3 }
 0x153   :  { %2153 = vmatpush.bf16.msra.mxu0 %v2126_v38  ;;  %v2134_v17 = vpack.c.bf16 %v2085_v8, %v2084_v5  ;;  %v2064_v35 = vcvt.s32.f32 %v2000_v10  ;;  %v2065_v16 = vcvt.s32.f32 %v2001_v11  ;;  %v1676_v24 = vadd.f32 %v1675_v9, %v1662_v1  ;;  %v1980_v38 = vld [vmem:[%s2688_s2 + $0x20] sm:$0xff] }
 0x154   :  { %v2082_v6 = vcvt.s32.f32 %v2018_v61  ;;  %v2083_v25 = vcvt.s32.f32 %v2019_v52  ;;  %v1999_v20 = vunpack.c.3.s8 %v1977_v19  ;;  %v1580_v13 = vadd.f32 %v2559_v2, %v1566_v12  ;;  %v1976_v2 = vld [vmem:[%s2688_s2] sm:$0xff] }
 0x155   :  { %v2016_v27 = vunpack.c.0.s8 %v1982_v0  ;;  %v2017_v26 = vunpack.c.1.s8 %v1982_v0  ;;  %v2124_v29 = vpack.c.bf16 %v2065_v16, %v2064_v35  ;;  %v2062_v30 = vcvt.s32.f32 %v1998_v18 }
 0x156   :  { %2167 = vmatpush.bf16.msra.mxu1 %v2134_v17  ;;  %v2133_v31 = vpack.c.bf16 %v2083_v25, %v2082_v6  ;;  %v1678_v36 = vadd.f32 %v1677_v21, %v1664_v56  ;;  %v2063_v40 = vcvt.s32.f32 %v1999_v20  ;;  %v1996_v41 = vunpack.c.0.s8 %v1977_v19  ;;  %v1731_v25 = vpop.f32.mrf.mxu0 }
 0x157   :  { %2154 = vmatpush.bf16.msra.mxu0 %v2125_v14  ;;  %v2080_v9 = vcvt.s32.f32 %v2016_v27  ;;  %v2081_v34 = vcvt.s32.f32 %v2017_v26  ;;  %v1592_v43 = vadd.f32 %v2553_v32, %v2588_v33  ;;  %v1690_v42 = vadd.f32 %v2595_v47, %v1676_v24 }
 0x158   :  { %v1997_v45 = vunpack.c.1.s8 %v1977_v19  ;;  %v2014_v39 = vunpack.c.2.s8 %v1981_v28  ;;  %v1594_v49 = vadd.f32 %v2561_v23, %v1580_v13  ;;  %v2060_v15 = vcvt.s32.f32 %v1996_v41  ;;  %v1986_v13 = vld [vmem:[%s2688_s2 + $0x50] sm:$0xff] }
 0x159   :  { %v1692_v48 = vadd.f32 %v1691_v37, %v1678_v36  ;;  %v2015_v50 = vunpack.c.3.s8 %v1981_v28  ;;  %v2132_v57 = vpack.c.bf16 %v2081_v34, %v2080_v9  ;;  %v1994_v32 = vunpack.c.2.s8 %v1976_v2 }
 0x15a   :  { %2168 = vmatpush.bf16.msra.mxu1 %v2133_v31  ;;  %v2061_v51 = vcvt.s32.f32 %v1997_v45  ;;  %v2078_v60 = vcvt.s32.f32 %v2014_v39  ;;  %v2123_v33 = vpack.c.bf16 %v2063_v40, %v2062_v30  ;;  %v1995_v62 = vunpack.c.3.s8 %v1976_v2  ;;  %v1745_v30 = vpop.f32.mrf.mxu1 }
 0x15b   :  { %2155 = vmatpush.bf16.msra.mxu0 %v2124_v29  ;;  %v2079_v47 = vcvt.s32.f32 %v2015_v50  ;;  %v2012_v63 = vunpack.c.0.s8 %v1981_v28  ;;  %v1948_v23 = vperm.slane %v2625_v46, 0  ;;  %v1704_v7 = vadd.f32 %v2602_v58, %v1690_v42  ;;  %v1987_v58 = vld [vmem:[%s2688_s2 + $0x58] sm:$0xff] }
 0x15c   :  { %v1706_v54 = vadd.f32 %v1705_v55, %v1692_v48  ;;  %v2013_v59 = vunpack.c.1.s8 %v1981_v28  ;;  %v1606_v0 = vadd.f32 %v2557_v53, %v1592_v43  ;;  %v1608_v12 = vadd.f32 %v2565_v44, %v1594_v49 }
 0x15d   :  { %v2122_v1 = vpack.c.bf16 %v2061_v51, %v2060_v15  ;;  %v2076_v3 = vcvt.s32.f32 %v2012_v63  ;;  %v2131_v19 = vpack.c.bf16 %v2079_v47, %v2078_v60  ;;  %v2058_v5 = vcvt.s32.f32 %v1994_v32 }
 0x15e   :  { %2169 = vmatpush.bf16.msra.mxu1 %v2132_v57  ;;  %v2077_v8 = vcvt.s32.f32 %v2013_v59  ;;  %v2010_v10 = vunpack.c.2.s8 %v1980_v38  ;;  %v2059_v11 = vcvt.s32.f32 %v1995_v62  ;;  %v1992_v14 = vunpack.c.0.s8 %v1976_v2  ;;  %v1759_v57 = vpop.f32.mrf.mxu2 }
 0x15f   :  { %2156 = vmatpush.bf16.msra.mxu0 %v2123_v33  ;;  %v1993_v56 = vunpack.c.1.s8 %v1976_v2  ;;  %v2011_v61 = vunpack.c.3.s8 %v1980_v38  ;;  %v1718_v53 = vadd.f32 %v1717_v22, %v1704_v7  ;;  %v1949_v44 = vperm.slane %v2625_v46, 1 }
 0x160   :  { %v1720_v52 = vadd.f32 %v1719_v4, %v1706_v54  ;;  %v1956_v17 = vmul.f32 %v1948_v23, %v1606_v0  ;;  %v1960_v35 = vmul.f32 %v1948_v23, %v1608_v12  ;;  %v2130_v16 = vpack.c.bf16 %v2077_v8, %v2076_v3  ;;  %v1733_v54 = vpop.f32.mrf.mxu0  ;;  %v1773_v0 = vpop.f32.mrf.mxu3 }
 0x161   :  { %v2008_v18 = vunpack.c.0.s8 %v1980_v38  ;;  %v2074_v21 = vcvt.s32.f32 %v2010_v10  ;;  %v2075_v24 = vcvt.s32.f32 %v2011_v61  ;;  %v2009_v6 = vunpack.c.1.s8 %v1980_v38  ;;  %v1985_v38 = vld [vmem:[%s2688_s2 + $0x48] sm:$0xff] }
 0x162   :  { %2170 = vmatpush.bf16.msra.mxu1 %v2131_v19  ;;  %v2038_v20 = vunpack.c.2.s8 %v1987_v58  ;;  %v2121_v27 = vpack.c.bf16 %v2059_v11, %v2058_v5  ;;  %v2056_v22 = vcvt.s32.f32 %v1992_v14  ;;  %v2057_v26 = vcvt.s32.f32 %v1993_v56  ;;  %v1747_v5 = vpop.f32.mrf.mxu1 }
 0x163   :  { %2157 = vmatpush.bf16.msra.mxu0 %v2122_v1  ;;  %v2039_v28 = vunpack.c.3.s8 %v1987_v58  ;;  %v1957_v29 = vmul.f32 %v1949_v44, %v1718_v53  ;;  %v1961_v31 = vmul.f32 %v1949_v44, %v1720_v52  ;;  %v2036_v37 = vunpack.c.0.s8 %v1987_v58 }
 0x164   :  { %v2102_v36 = vcvt.s32.f32 %v2038_v20  ;;  %v2072_v40 = vcvt.s32.f32 %v2008_v18  ;;  %v2037_v34 = vunpack.c.1.s8 %v1987_v58  ;;  %v2034_v41 = vunpack.c.2.s8 %v1986_v13  ;;  %v1984_v58 = vld [vmem:[%s2688_s2 + $0x40] sm:$0xff] }
 0x165   :  { %v2103_v9 = vcvt.s32.f32 %v2039_v28  ;;  %v2129_v2 = vpack.c.bf16 %v2075_v24, %v2074_v21  ;;  %v2073_v43 = vcvt.s32.f32 %v2009_v6  ;;  %v2100_v42 = vcvt.s32.f32 %v2036_v37 }
 0x166   :  { %2171 = vmatpush.bf16.msra.mxu1 %v2130_v16  ;;  %v2035_v45 = vunpack.c.3.s8 %v1986_v13  ;;  %v2120_v39 = vpack.c.bf16 %v2057_v26, %v2056_v22  ;;  %v2101_v15 = vcvt.s32.f32 %v2037_v34  ;;  %v1968_v48 = vmax.f32 %v1960_v35, 0.0  ;;  %v1761_v53 = vpop.f32.mrf.mxu2 }
 0x167   :  { %2158 = vmatpush.bf16.msra.mxu0 %v2121_v27  ;;  %v2143_v49 = vpack.c.bf16 %v2103_v9, %v2102_v36  ;;  %v1969_v50 = vmax.f32 %v1961_v31, 0.0  ;;  %v2032_v55 = vunpack.c.0.s8 %v1986_v13  ;;  %v2098_v60 = vcvt.s32.f32 %v2034_v41 }
 0x168   :  { %v2142_v51 = vpack.c.bf16 %v2101_v15, %v2100_v42  ;;  %v2099_v32 = vcvt.s32.f32 %v2035_v45  ;;  %v2033_v33 = vunpack.c.1.s8 %v1986_v13  ;;  %v1964_v47 = vmax.f32 %v1956_v17, 0.0  ;;  %v1775_v6 = vpop.f32.mrf.mxu3 }
 0x169   :  { %2180 = vmatpush.bf16.msra.mxu2 %v2143_v49  ;;  %v1965_v62 = vmax.f32 %v1957_v29, 0.0  ;;  %v2128_v63 = vpack.c.bf16 %v2073_v43, %v2072_v40  ;;  %v2096_v59 = vcvt.s32.f32 %v2032_v55  ;;  %v2030_v3 = vunpack.c.2.s8 %v1985_v38 }
 0x16a   :  { %2172 = vmatpush.bf16.msra.mxu1 %v2129_v2  ;;  %v1972_v23 = vpack.c.bf16 %v1968_v48, %v1964_v47  ;;  %v2141_v12 = vpack.c.bf16 %v2099_v32, %v2098_v60  ;;  %v2097_v1 = vcvt.s32.f32 %v2033_v33  ;;  %v2031_v4 = vunpack.c.3.s8 %v1985_v38 }
 0x16b   :  { %2159 = vmatpush.bf16.msra.mxu0 %v2120_v39  ;;  %v1973_v7 = vpack.c.bf16 %v1969_v50, %v1965_v62  ;;  %v1746_v19 = vadd.f32 %v1745_v30, %v1731_v25  ;;  %v2028_v8 = vunpack.c.0.s8 %v1985_v38  ;;  %v2029_v10 = vunpack.c.1.s8 %v1985_v38  ;;  %v1991_v62 = vld [vmem:[%s2688_s2 + $0x78] sm:$0xff] }
 0x16c   :  { %v2140_v11 = vpack.c.bf16 %v2097_v1, %v2096_v59  ;;  %v2094_v14 = vcvt.s32.f32 %v2030_v3  ;;  %v2095_v56 = vcvt.s32.f32 %v2031_v4  ;;  %v2026_v35 = vunpack.c.2.s8 %v1984_v58  ;;  %v1990_v4 = vld [vmem:[%s2688_s2 + $0x70] sm:$0xff] }
 0x16d   :  { %2181 = vmatpush.bf16.msra.mxu2 %v2142_v51  ;;  %v1760_v61 = vadd.f32 %v1759_v57, %v1746_v19  ;;  %v2092_v44 = vcvt.s32.f32 %v2028_v8  ;;  %v2093_v52 = vcvt.s32.f32 %v2029_v10  ;;  %v2027_v16 = vunpack.c.3.s8 %v1984_v58 }
 0x16e   :  { %2160 = vmatmul.bf16.vlgmr.msra.gmra.mxu0 %v1972_v23  ;;  %2173 = vmatpush.bf16.msra.mxu1 %v2128_v63  ;;  %v2139_v17 = vpack.c.bf16 %v2095_v56, %v2094_v14  ;;  %v1748_v21 = vadd.f32 %v1747_v5, %v1733_v54  ;;  %v2090_v13 = vcvt.s32.f32 %v2026_v35  ;;  %v2024_v22 = vunpack.c.0.s8 %v1984_v58 }
 0x16f   :  { %v1774_v18 = vadd.f32 %v1773_v0, %v1760_v61  ;;  %v2138_v20 = vpack.c.bf16 %v2093_v52, %v2092_v44  ;;  %v2091_v27 = vcvt.s32.f32 %v2027_v16  ;;  %v2025_v26 = vunpack.c.1.s8 %v1984_v58 }
 0x170   :  { %v1762_v28 = vadd.f32 %v1761_v53, %v1748_v21  ;;  %v2088_v36 = vcvt.s32.f32 %v2024_v22  ;;  %v1950_v48 = vperm.slane %v2625_v46, 2  ;;  %v2054_v63 = vunpack.c.2.s8 %v1991_v62  ;;  %v1989_v53 = vld [vmem:[%s2688_s2 + $0x68] sm:$0xff] }
 0x171   :  { %2174 = vmatmul.bf16.vlgmr.msra.gmra.mxu1 %v1973_v7  ;;  %2182 = vmatpush.bf16.msra.mxu2 %v2141_v12  ;;  %v2137_v30 = vpack.c.bf16 %v2091_v27, %v2090_v13  ;;  %v2089_v37 = vcvt.s32.f32 %v2025_v26  ;;  %v2055_v38 = vunpack.c.3.s8 %v1991_v62  ;;  %v2052_v23 = vunpack.c.0.s8 %v1991_v62  ;;  %v1988_v13 = vld [vmem:[%s2688_s2 + $0x60] sm:$0xff] }
 0x172   :  { %v1776_v40 = vadd.f32 %v1775_v6, %v1762_v28  ;;  %v2053_v7 = vunpack.c.1.s8 %v1991_v62  ;;  %v2118_v54 = vcvt.s32.f32 %v2054_v63  ;;  %v2050_v19 = vunpack.c.2.s8 %v1990_v4 }
 0x173   :  { %v2136_v42 = vpack.c.bf16 %v2089_v37, %v2088_v36  ;;  %v2119_v59 = vcvt.s32.f32 %v2055_v38  ;;  %v2116_v0 = vcvt.s32.f32 %v2052_v23  ;;  %v2051_v5 = vunpack.c.3.s8 %v1990_v4 }
 0x174   :  { %v2117_v12 = vcvt.s32.f32 %v2053_v7  ;;  %v2114_v8 = vcvt.s32.f32 %v2050_v19  ;;  %v2048_v14 = vunpack.c.0.s8 %v1990_v4  ;;  %v2049_v56 = vunpack.c.1.s8 %v1990_v4 }
 0x175   :  { %2183 = vmatpush.bf16.msra.mxu2 %v2140_v11  ;;  %v2151_v1 = vpack.c.bf16 %v2119_v59, %v2118_v54  ;;  %v2115_v10 = vcvt.s32.f32 %v2051_v5  ;;  %v2046_v52 = vunpack.c.2.s8 %v1989_v53  ;;  %v2044_v21 = vunpack.c.0.s8 %v1989_v53 }
 0x176   :  { %v2150_v3 = vpack.c.bf16 %v2117_v12, %v2116_v0  ;;  %v2112_v61 = vcvt.s32.f32 %v2048_v14  ;;  %v2113_v58 = vcvt.s32.f32 %v2049_v56  ;;  %v2042_v22 = vunpack.c.2.s8 %v1988_v13  ;;  %v2220_v14 = vld [vmem:[%s2689_s3 + $0x18] sm:$0xff]  ;;  %v2219_v56 = vld [vmem:[%s2689_s3 + $0x10] sm:$0xff] }
 0x177   :  { %2194 = vmatpush.bf16.msra.mxu3 %v2151_v1  ;;  %v2149_v11 = vpack.c.bf16 %v2115_v10, %v2114_v8  ;;  %v2110_v35 = vcvt.s32.f32 %v2046_v52  ;;  %v2108_v6 = vcvt.s32.f32 %v2044_v21  ;;  %v2043_v26 = vunpack.c.3.s8 %v1988_v13 }
 0x178   :  { %v1787_v24 = vpop.f32.mrf.mxu0  ;;  %v2148_v44 = vpack.c.bf16 %v2113_v58, %v2112_v61  ;;  %v2106_v28 = vcvt.s32.f32 %v2042_v22  ;;  %v2040_v36 = vunpack.c.0.s8 %v1988_v13  ;;  %v2041_v37 = vunpack.c.1.s8 %v1988_v13 }
 0x179   :  { %v1801_v25 = vpop.f32.mrf.mxu1  ;;  %2184 = vmatpush.bf16.msra.mxu2 %v2139_v17  ;;  %v1788_v29 = vadd.f32 %v1787_v24, %v1774_v18  ;;  %v2047_v17 = vunpack.c.3.s8 %v1989_v53  ;;  %v2045_v24 = vunpack.c.1.s8 %v1989_v53  ;;  %v1951_v59 = vperm.slane %v2625_v46, 3 }
 0x17a   :  { %v2235_v46 = vunpack.c.2.s8 %v2220_v14  ;;  %v2236_v61 = vunpack.c.3.s8 %v2220_v14  ;;  %v2233_v58 = vunpack.c.0.s8 %v2220_v14  ;;  %v2234_v53 = vunpack.c.1.s8 %v2220_v14  ;;  %v2334_v14 = vld [vmem:[%s2692_s6] ss:$0 sm:$0xff] }
 0x17b   :  { %v1802_v9 = vadd.f32 %v1801_v25, %v1788_v29  ;;  %2195 = vmatpush.bf16.msra.mxu3 %v2150_v3  ;;  %v2111_v16 = vcvt.s32.f32 %v2047_v17  ;;  %v2109_v25 = vcvt.s32.f32 %v2045_v24  ;;  %v2107_v29 = vcvt.s32.f32 %v2043_v26 }
 0x17c   :  { %v2232_v52 = vunpack.c.3.s8 %v2219_v56  ;;  %v2251_v17 = vcvt.s32.f32 %v2235_v46  ;;  %v2229_v24 = vunpack.c.0.s8 %v2219_v56  ;;  %v2230_v13 = vunpack.c.1.s8 %v2219_v56 }
 0x17d   :  { %2185 = vmatpush.bf16.msra.mxu2 %v2138_v20  ;;  %v2147_v18 = vpack.c.bf16 %v2111_v16, %v2110_v35  ;;  %v2146_v27 = vpack.c.bf16 %v2109_v25, %v2108_v6  ;;  %v2252_v35 = vcvt.s32.f32 %v2236_v61  ;;  %v2249_v16 = vcvt.s32.f32 %v2233_v58 }
 0x17e   :  { %v2245_v22 = vcvt.s32.f32 %v2229_v24  ;;  %v2246_v26 = vcvt.s32.f32 %v2230_v13 }
 0x17f   :  { %2196 = vmatpush.bf16.msra.mxu3 %v2149_v11  ;;  %v2260_v21 = vpack.c.bf16 %v2252_v35, %v2251_v17 }
 0x180   :  { %v1815_v31 = vpop.f32.mrf.mxu2  ;;  %v1789_v34 = vpop.f32.mrf.mxu0 }
 0x181   :  { %v1790_v41 = vadd.f32 %v1789_v34, %v1776_v40  ;;  %v1829_v2 = vpop.f32.mrf.mxu3  ;;  %v1803_v43 = vpop.f32.mrf.mxu1  ;;  %2186 = vmatpush.bf16.msra.mxu2 %v2137_v30  ;;  %v1816_v45 = vadd.f32 %v1815_v31, %v1802_v9  ;;  %v2145_v30 = vpack.c.bf16 %v2107_v29, %v2106_v28  ;;  %v2104_v40 = vcvt.s32.f32 %v2040_v36  ;;  %2261 = vmatpush.bf16.msrb.mxu0 %v2260_v21  ;;  %v2218_v29 = vld [vmem:[%s2689_s3 + $0x8] sm:$0xff] }
 0x182   :  { %v2105_v9 = vcvt.s32.f32 %v2041_v37  ;;  %v2257_v28 = vpack.c.bf16 %v2246_v26, %v2245_v22 }
 0x183   :  { %v1804_v39 = vadd.f32 %v1803_v43, %v1790_v41  ;;  %v1830_v15 = vadd.f32 %v1829_v2, %v1816_v45  ;;  %2197 = vmatpush.bf16.msra.mxu3 %v2148_v44  ;;  %v2231_v44 = vunpack.c.2.s8 %v2219_v56 }
 0x184   :  { %v2144_v2 = vpack.c.bf16 %v2105_v9, %v2104_v40  ;;  %v2225_v9 = vunpack.c.0.s8 %v2218_v29 }
 0x185   :  { %2187 = vmatpush.bf16.msra.mxu2 %v2136_v42  ;;  %v1958_v57 = vmul.f32 %v1950_v48, %v1830_v15  ;;  %v2247_v25 = vcvt.s32.f32 %v2231_v44 }
 0x187   :  { %v1966_v32 = vmax.f32 %v1958_v57, 0.0  ;;  %2198 = vmatpush.bf16.msra.mxu3 %v2147_v18  ;;  %v2250_v18 = vcvt.s32.f32 %v2234_v53 }
 0x188   :  { %v1817_v49 = vpop.f32.mrf.mxu2 }
 0x189   :  { %v1818_v50 = vadd.f32 %v1817_v49, %v1804_v39  ;;  %v1831_v55 = vpop.f32.mrf.mxu3  ;;  %v2259_v6 = vpack.c.bf16 %v2250_v18, %v2249_v16 }
 0x18b   :  { %v1832_v51 = vadd.f32 %v1831_v55, %v1818_v50  ;;  %2199 = vmatpush.bf16.msra.mxu3 %v2146_v27  ;;  %2262 = vmatpush.bf16.msrb.mxu0 %v2259_v6 }
 0x18d   :  { %v1962_v60 = vmul.f32 %v1950_v48, %v1832_v51 }
 0x18f   :  { %v1970_v33 = vmax.f32 %v1962_v60, 0.0  ;;  %2200 = vmatpush.bf16.msra.mxu3 %v2145_v30  ;;  %v2228_v30 = vunpack.c.3.s8 %v2218_v29 }
 0x191   :  { %v1974_v47 = vpack.c.bf16 %v1970_v33, %v1966_v32  ;;  %v2244_v37 = vcvt.s32.f32 %v2228_v30 }
 0x193   :  { %2188 = vmatmul.bf16.vlgmr.msra.gmra.mxu2 %v1974_v47  ;;  %2201 = vmatpush.bf16.msra.mxu3 %v2144_v2 }
 0x1a1   :  { %v1843_v20 = vpop.f32.mrf.mxu0 }
 0x1a2   :  { %v1857_v31 = vpop.f32.mrf.mxu1 }
 0x1a3   :  { %v1858_v42 = vadd.f32 %v1857_v31, %v1843_v20  ;;  %v2248_v20 = vcvt.s32.f32 %v2232_v52  ;;  %v2227_v31 = vunpack.c.2.s8 %v2218_v29 }
 0x1a5   :  { %v2258_v27 = vpack.c.bf16 %v2248_v20, %v2247_v25  ;;  %v2243_v36 = vcvt.s32.f32 %v2227_v31 }
 0x1a7   :  { %2263 = vmatpush.bf16.msrb.mxu0 %v2258_v27  ;;  %v2256_v40 = vpack.c.bf16 %v2244_v37, %v2243_v36 }
 0x1a9   :  { %v1845_v43 = vpop.f32.mrf.mxu0 }
 0x1aa   :  { %v1871_v34 = vpop.f32.mrf.mxu2  ;;  %v1859_v45 = vpop.f32.mrf.mxu1 }
 0x1ab   :  { %v1885_v41 = vpop.f32.mrf.mxu3  ;;  %v1872_v39 = vadd.f32 %v1871_v34, %v1858_v42  ;;  %v1860_v48 = vadd.f32 %v1859_v45, %v1845_v43  ;;  %2264 = vmatpush.bf16.msrb.mxu0 %v2257_v28  ;;  %v2226_v34 = vunpack.c.1.s8 %v2218_v29  ;;  %v2217_v43 = vld [vmem:[%s2689_s3] sm:$0xff] }
 0x1ac   :  { %v2223_v45 = vunpack.c.2.s8 %v2217_v43 }
 0x1ad   :  { %v1886_v55 = vadd.f32 %v1885_v41, %v1872_v39  ;;  %v2241_v41 = vcvt.s32.f32 %v2225_v9  ;;  %v2242_v2 = vcvt.s32.f32 %v2226_v34  ;;  %v2224_v39 = vunpack.c.3.s8 %v2217_v43 }
 0x1af   :  { %2265 = vmatpush.bf16.msrb.mxu0 %v2256_v40  ;;  %v2255_v42 = vpack.c.bf16 %v2242_v2, %v2241_v41 }
 0x1b2   :  { %v1873_v49 = vpop.f32.mrf.mxu2 }
 0x1b3   :  { %v1887_v50 = vpop.f32.mrf.mxu3  ;;  %v1874_v51 = vadd.f32 %v1873_v49, %v1860_v48  ;;  %2266 = vmatpush.bf16.msrb.mxu0 %v2255_v42  ;;  %v2239_v49 = vcvt.s32.f32 %v2223_v45 }
 0x1b5   :  { %v1888_v47 = vadd.f32 %v1887_v50, %v1874_v51  ;;  %v2221_v50 = vunpack.c.0.s8 %v2217_v43 }
 0x1ca   :  { %v1899_v15 = vpop.f32.mrf.mxu0 }
 0x1cb   :  { %v1913_v57 = vpop.f32.mrf.mxu1  ;;  %v1900_v60 = vadd.f32 %v1899_v15, %v1886_v55  ;;  %v2240_v15 = vcvt.s32.f32 %v2224_v39  ;;  %v2222_v55 = vunpack.c.1.s8 %v2217_v43 }
 0x1cd   :  { %v1914_v62 = vadd.f32 %v1913_v57, %v1900_v60  ;;  %v2254_v48 = vpack.c.bf16 %v2240_v15, %v2239_v49  ;;  %v2237_v57 = vcvt.s32.f32 %v2221_v50  ;;  %v2238_v51 = vcvt.s32.f32 %v2222_v55 }
 0x1cf   :  { %2267 = vmatpush.bf16.msrb.mxu0 %v2254_v48  ;;  %v2253_v60 = vpack.c.bf16 %v2238_v51, %v2237_v57 }
 0x1d2   :  { %v1927_v32 = vpop.f32.mrf.mxu2  ;;  %v1901_v33 = vpop.f32.mrf.mxu0 }
 0x1d3   :  { %v1928_v38 = vadd.f32 %v1927_v32, %v1914_v62  ;;  %v1902_v23 = vadd.f32 %v1901_v33, %v1888_v47  ;;  %v1915_v7 = vpop.f32.mrf.mxu1  ;;  %2268 = vmatpush.bf16.msrb.mxu0 %v2253_v60 }
 0x1d4   :  { %v1941_v63 = vpop.f32.mrf.mxu3 }
 0x1d5   :  { %v1942_v54 = vadd.f32 %v1941_v63, %v1928_v38  ;;  %v1916_v0 = vadd.f32 %v1915_v7, %v1902_v23 }
 0x1d7   :  { %v1959_v4 = vmul.f32 %v1951_v59, %v1942_v54 }
 0x1d9   :  { %v1967_v8 = vmax.f32 %v1959_v4, 0.0 }
 0x1da   :  { %v1929_v12 = vpop.f32.mrf.mxu2 }
 0x1db   :  { %v1930_v1 = vadd.f32 %v1929_v12, %v1916_v0  ;;  %v2333_v12 = vld [vmem:[%s2691_s5] ss:$0 sm:$0xff] }
 0x1dc   :  { %v1943_v3 = vpop.f32.mrf.mxu3 }
 0x1dd   :  { %v1944_v19 = vadd.f32 %v1943_v3, %v1930_v1 }
 0x1df   :  { %v1963_v5 = vmul.f32 %v1951_v59, %v1944_v19 }
 0x1e1   :  { %v1971_v10 = vmax.f32 %v1963_v5, 0.0 }
 0x1e3   :  { %v1975_v11 = vpack.c.bf16 %v1971_v10, %v1967_v8 }
 0x1e5   :  { %2202 = vmatmul.bf16.vlgmr.msra.gmra.mxu3 %v1975_v11 }
 0x1eb   :  { %v2161_v33 = vpop.f32.mrf.mxu0 }
 0x1ee   :  { %v2175_v32 = vpop.f32.mrf.mxu1 }
 0x1ef   :  { %v2176_v63 = vadd.f32 %v2175_v32, %v2161_v33 }
 0x1f3   :  { %v2163_v7 = vpop.f32.mrf.mxu0 }
 0x1f6   :  { %v2177_v38 = vpop.f32.mrf.mxu1 }
 0x1f7   :  { %v2178_v59 = vadd.f32 %v2177_v38, %v2163_v7 }
 0x216   :  { %v2189_v47 = vpop.f32.mrf.mxu2 }
 0x217   :  { %v2190_v23 = vadd.f32 %v2189_v47, %v2176_v63 }
 0x21e   :  { %v2191_v54 = vpop.f32.mrf.mxu2 }
 0x21f   :  { %v2192_v1 = vadd.f32 %v2191_v54, %v2178_v59 }
 0x268   :  { %v2203_v62 = vpop.f32.mrf.mxu3 }
 0x269   :  { %v2204_v0 = vadd.f32 %v2203_v62, %v2190_v23 }
 0x26b   :  { %v2212_v4 = vmul.f32 %v2333_v12, %v2204_v0 }
 0x26d   :  { %v2214_v8 = vmax.f32 %v2212_v4, 0.0 }
 0x270   :  { %v2205_v3 = vpop.f32.mrf.mxu3 }
 0x271   :  { %v2206_v19 = vadd.f32 %v2205_v3, %v2192_v1 }
 0x273   :  { %v2213_v5 = vmul.f32 %v2333_v12, %v2206_v19 }
 0x275   :  { %v2215_v10 = vmax.f32 %v2213_v5, 0.0 }
 0x277   :  { %v2216_v11 = vpack.c.bf16 %v2215_v10, %v2214_v8 }
 0x279   :  { %2269 = vmatmul.bf16.vlgmr.msrb.gmra.mxu0 %v2216_v11 }
 0x2f6   :  { %v2270_v56 = vpop.f32.mrf.mxu0 }
 0x2f7   :  { %v2279_v46 = vmul.f32 %v2334_v14, %v2270_v56 }
 0x2f9   :  { %v2281_v61 = vmax.f32 %v2279_v46, 0.0 }
 0x2fb   :  { %2283 = vst [vmem:[%s2693_s7] sm:$0xff] %v2281_v61 }
 0x2fe   :  { %v2272_v58 = vpop.f32.mrf.mxu0 }
 0x2ff   :  { %v2280_v53 = vmul.f32 %v2334_v14, %v2272_v58 }
 0x301   :  { %v2282_v44 = vmax.f32 %v2280_v53, 0.0 }
 0x303   :  { %2284 = vst [vmem:[%s2693_s7 + $0x8] sm:$0xff] %v2282_v44 }
 0x304   :  { %2289 = vsyncpa [#allocation3], 1 }

</bundles_post_ra>
